<compile_context>
chip_gen: v6e
topology: v6e:2x2x1
jax: 0.10.0
libtpu: 0.0.40
codegen_flags: <defaults>
</compile_context>

<pallas_src>
import math
from functools import partial

import jax
import jax.numpy as jnp
from jax.experimental import pallas as pl
from jax.experimental.pallas import tpu as pltpu

_LN_EPS = 1e-6          # c2nl / OpenNMT LayerNorm eps
_NEG_INF = -1e9


def _round_up(n, m):
    return ((n + m - 1) // m) * m


def _pad_axis(a, axis, new_size):
    pad = new_size - a.shape[axis]
    if pad <= 0:
        return a
    widths = [(0, 0)] * a.ndim
    widths[axis] = (0, pad)
    return jnp.pad(a, widths)


def _clamp_vmem(nbytes):
    # explicit scoped-VMEM request: generous floor, capped below v7x's 64 MiB.
    return int(min(max(nbytes, 32 << 20), 64 << 20))


# ----------------------------------------------------------------------------
# Feature probe: single-buffered (Buffered(1)) blocks for constant-index inputs.
# Probed once with a tiny kernel so the main kernels never hit an unsupported
# pipeline_mode at lowering time.
# ----------------------------------------------------------------------------
def _probe_buffered1():
    try:
        def _k(x_ref, o_ref):
            o_ref[...] = x_ref[...] + 1.0

        fn = pl.pallas_call(
            _k,
            grid=(2,),
            in_specs=[pl.BlockSpec((8, 128), lambda i: (0, 0),
                                   pipeline_mode=pl.Buffered(1))],
            out_specs=pl.BlockSpec((8, 128), lambda i: (i, 0)),
            out_shape=jax.ShapeDtypeStruct((16, 128), jnp.float32),
        )
        jax.block_until_ready(fn(jnp.zeros((8, 128), jnp.float32)))
        return True
    except Exception:
        return False


_BUFFERED1_OK = _probe_buffered1()


def _const_spec(shape):
    """BlockSpec for an input whose block never changes across the grid."""
    nd = len(shape)
    if _BUFFERED1_OK:
        return pl.BlockSpec(shape, lambda *_: (0,) * nd,
                            pipeline_mode=pl.Buffered(1))
    return pl.BlockSpec(shape, lambda *_: (0,) * nd)


# ----------------------------------------------------------------------------
# Fused multi-head attention block kernel:
#   y = LayerNorm(x_q + MHA(x_q, x_kv))    grid = (batch, q-row tiles)
# ----------------------------------------------------------------------------
def _mha_block_kernel(*refs, heads, d_k, d_v, scale, q_tile, self_attn,
                      return_probs, ln_dim):
    it = iter(refs)
    if self_attn:
        x_ref = next(it)                    # (1, S, Dp) full sequence per batch
    else:
        xq_ref = next(it)                   # (1, Tq, Dp)
        xkv_ref = next(it)                  # (1, Sk, Dp)
    bias_ref = next(it)                     # (1, 1, Sk) additive key-pad bias
    wq_ref = next(it); bq_ref = next(it)
    wkv_ref = next(it); bkv_ref = next(it)
    wo_ref = next(it); bo_ref = next(it)
    g_ref = next(it); beta_ref = next(it)
    y_ref = next(it)
    p_ref = next(it) if return_probs else None

    qi = pl.program_id(1)
    q_start = pl.multiple_of(qi * q_tile, q_tile)

    if self_attn:
        xq = x_ref[0, pl.ds(q_start, q_tile), :]        # (Tq, Dp) f32
        xkv = x_ref[0]                                  # (S,  Dp) f32
    else:
        xq = xq_ref[0]
        xkv = xkv_ref[0]
    sk = xkv.shape[0]

    # Q projection (tile rows) + fused K|V projection (all key rows).
    q = jnp.dot(xq.astype(jnp.bfloat16), wq_ref[...],
                preferred_element_type=jnp.float32) + bq_ref[...]
    kv = jnp.dot(xkv.astype(jnp.bfloat16), wkv_ref[...],
                 preferred_element_type=jnp.float32) + bkv_ref[...]
    n_k = heads * d_k
    q_b = (q * scale).astype(jnp.bfloat16)
    k_b = kv[:, :n_k].astype(jnp.bfloat16)
    v_b = kv[:, n_k:].astype(jnp.bfloat16)

    # Additive mask: key-pad bias (1, Sk) broadcast over rows; the causal part
    # is generated in-kernel from iota (no (Sq, Sq) mask tensor in HBM).
    mask = bias_ref[0]                                  # (1, Sk) f32
    if self_attn:
        rows = q_start + jax.lax.broadcasted_iota(jnp.int32, (q_tile, sk), 0)
        cols = jax.lax.broadcasted_iota(jnp.int32, (q_tile, sk), 1)
        mask = mask + jnp.where(cols > rows, _NEG_INF, 0.0).astype(jnp.float32)

    wo = wo_ref[...]                                    # (H*d_v, Dp) bf16
    acc = xq + bo_ref[...]                              # residual + out-proj bias

    for h in range(heads):                              # static unroll
        qh = q_b[:, h * d_k:(h + 1) * d_k]              # (Tq, d_k)
        kh = k_b[:, h * d_k:(h + 1) * d_k]              # (Sk, d_k)
        vh = v_b[:, h * d_v:(h + 1) * d_v]              # (Sk, d_v)
        s = jax.lax.dot_general(qh, kh, (((1,), (1,)), ((), ())),
                                preferred_element_type=jnp.float32) + mask
        m = jnp.max(s, axis=-1, keepdims=True)
        e = jnp.exp(s - m)
        # exact reciprocal when the probabilities are returned, EUP-approx else
        p = e * pl.reciprocal(jnp.sum(e, axis=-1, keepdims=True),
                              approx=not return_probs)
        if return_probs:
            p_ref[0, h] = p
        ctx = jnp.dot(p.astype(jnp.bfloat16), vh,
                      preferred_element_type=jnp.float32)
        # fold the per-head context straight into the output projection
        # (no lane-shuffling concatenate of ctx parts).
        acc = acc + jnp.dot(ctx.astype(jnp.bfloat16),
                            wo[h * d_v:(h + 1) * d_v, :],
                            preferred_element_type=jnp.float32)

    # residual + LayerNorm in f32; padded feature columns are exactly zero so
    # moments use the true d_model denominator.
    inv_d = 1.0 / ln_dim
    mu = jnp.sum(acc, axis=-1, keepdims=True) * inv_d
    var = jnp.sum(acc * acc, axis=-1, keepdims=True) * inv_d - mu * mu
    y_ref[0] = ((acc - mu) * jax.lax.rsqrt(var + _LN_EPS)) * g_ref[...] + beta_ref[...]


def mha_block(mp, x_q, x_kv, key_bias, ln, *, heads, d_k, d_v, q_tile,
              self_attn, return_probs, ln_dim):
    """x_q:(B,Sq,Dp)  x_kv:(B,Sk,Dp)  key_bias:(B,1,Sk) additive key-pad bias."""
    B, Sq, Dp = x_q.shape
    x_kv = x_q if self_attn else x_kv
    Sk = x_kv.shape[1]
    n_q = Sq // q_tile
    scale = 1.0 / math.sqrt(d_k)

    in_specs = []
    inputs = []
    if self_attn:
        # K/V need every row: keep the full (padded) sequence resident per batch
        # element; query rows are sliced inside the kernel with pl.ds.
        in_specs.append(pl.BlockSpec((1, Sq, Dp), lambda b, qi: (b, 0, 0)))
        inputs.append(x_q)
    else:
        in_specs.append(pl.BlockSpec((1, q_tile, Dp), lambda b, qi: (b, qi, 0)))
        inputs.append(x_q)
        in_specs.append(pl.BlockSpec((1, Sk, Dp), lambda b, qi: (b, 0, 0)))
        inputs.append(x_kv)
    in_specs.append(pl.BlockSpec((1, 1, Sk), lambda b, qi: (b, 0, 0)))
    inputs.append(key_bias)
    for name in ("wq", "bq", "wkv", "bkv", "wo", "bo"):
        in_specs.append(_const_spec(mp[name].shape))
        inputs.append(mp[name])
    for arr in (ln["g"], ln["b"]):
        in_specs.append(_const_spec(arr.shape))
        inputs.append(arr)

    out_shape = [jax.ShapeDtypeStruct((B, Sq, Dp), jnp.float32)]
    out_specs = [pl.BlockSpec((1, q_tile, Dp), lambda b, qi: (b, qi, 0))]
    if return_probs:
        out_shape.append(jax.ShapeDtypeStruct((B, heads, Sq, Sk), jnp.float32))
        out_specs.append(pl.BlockSpec((1, heads, q_tile, Sk),
                                      lambda b, qi: (b, 0, qi, 0)))

    # rough per-step VMEM footprint -> explicit scoped-VMEM request
    n_kv = heads * (d_k + d_v)
    est = 4 * (Sq * Dp + 2 * q_tile * Dp + Sk)                       # activations
    est += 2 * (Dp * heads * d_k + Dp * n_kv + heads * d_v * Dp)     # bf16 weights
    est += 4 * (heads * d_k + n_kv + 3 * Dp)                         # biases / LN
    if return_probs:
        est += 4 * heads * q_tile * Sk
    vmem = _clamp_vmem(2 * est + (8 << 20))

    res = pl.pallas_call(
        partial(_mha_block_kernel, heads=heads, d_k=d_k, d_v=d_v, scale=scale,
                q_tile=q_tile, self_attn=self_attn, return_probs=return_probs,
                ln_dim=ln_dim),
        grid=(B, n_q),
        in_specs=in_specs,
        out_specs=out_specs,
        out_shape=out_shape,
        compiler_params=pltpu.CompilerParams(
            dimension_semantics=("parallel", "parallel"),
            vmem_limit_bytes=vmem),
    )(*inputs)
    if return_probs:
        return res[0], res[1]
    return res[0]


# ----------------------------------------------------------------------------
# Fused position-wise FFN kernel (OpenNMT / c2nl PositionwiseFeedForward):
#   y = x + W2 relu(W1 LayerNorm(x) + b1) + b2
# grid = (row tiles, d_ff chunks); the d_ff axis is an "arbitrary" reduction
# streamed through VMEM with an f32 accumulator scratch.
# ----------------------------------------------------------------------------
def _ffn_block_kernel(x_ref, w1_ref, b1_ref, w2_ref, b2_ref, g_ref, beta_ref,
                      y_ref, acc_ref, xn_ref, *, ln_dim):
    k = pl.program_id(1)

    @pl.when(k == 0)
    def _():
        x = x_ref[...]
        inv_d = 1.0 / ln_dim
        mu = jnp.sum(x, axis=-1, keepdims=True) * inv_d
        var = jnp.sum(x * x, axis=-1, keepdims=True) * inv_d - mu * mu
        xn = (x - mu) * jax.lax.rsqrt(var + _LN_EPS) * g_ref[...] + beta_ref[...]
        xn_ref[...] = xn.astype(jnp.bfloat16)
        acc_ref[...] = jnp.zeros_like(acc_ref)

    h = jnp.dot(xn_ref[...], w1_ref[...],
                preferred_element_type=jnp.float32) + b1_ref[...]
    h = jnp.maximum(h, 0.0)
    acc_ref[...] += jnp.dot(h.astype(jnp.bfloat16), w2_ref[...],
                            preferred_element_type=jnp.float32)

    @pl.when(k == pl.num_programs(1) - 1)
    def _():
        y_ref[...] = x_ref[...] + acc_ref[...] + b2_ref[...]


def _ff_tile(Fp):
    for t in (512, 384, 256, 128):
        if Fp % t == 0:
            return t
    return Fp


def ffn_block(fp, x, ln, *, ln_dim):
    B, S, Dp = x.shape
    M = B * S
    Fp = fp["w1"].shape[1]
    tm = 256 if M >= 256 else _round_up(M, 8)
    Mp = _round_up(M, tm)
    tk = _ff_tile(Fp)

    x2 = x.reshape(M, Dp)
    if Mp != M:
        x2 = jnp.pad(x2, ((0, Mp - M), (0, 0)))

    est = 4 * (2 * tm * Dp) + 2 * (Dp * tk + tk * Dp) + 4 * (tk + 3 * Dp)
    est += 4 * tm * Dp + 2 * tm * Dp                       # scratch acc + xn
    vmem = _clamp_vmem(2 * est + (8 << 20))

    y = pl.pallas_call(
        partial(_ffn_block_kernel, ln_dim=ln_dim),
        grid=(Mp // tm, Fp // tk),
        in_specs=[
            pl.BlockSpec((tm, Dp), lambda i, k: (i, 0)),   # x (resident across k)
            pl.BlockSpec((Dp, tk), lambda i, k: (0, k)),   # w1 chunk (streamed)
            pl.BlockSpec((1, tk), lambda i, k: (0, k)),    # b1 chunk
            pl.BlockSpec((tk, Dp), lambda i, k: (k, 0)),   # w2 chunk (streamed)
            _const_spec((1, Dp)),                          # b2
            _const_spec((1, Dp)),                          # LN gamma
            _const_spec((1, Dp)),                          # LN beta
        ],
        out_specs=pl.BlockSpec((tm, Dp), lambda i, k: (i, 0)),
        out_shape=jax.ShapeDtypeStruct((Mp, Dp), jnp.float32),
        scratch_shapes=[pltpu.VMEM((tm, Dp), jnp.float32),
                        pltpu.VMEM((tm, Dp), jnp.bfloat16)],
        compiler_params=pltpu.CompilerParams(
            dimension_semantics=("parallel", "arbitrary"),
            vmem_limit_bytes=vmem),
    )(x2, fp["w1"], fp["b1"], fp["w2"], fp["b2"], ln["g"], ln["b"])
    if Mp != M:
        y = y[:M]
    return y.reshape(B, S, Dp)


# ----------------------------------------------------------------------------
# Transformer decoder built from the fused kernels above
# ----------------------------------------------------------------------------
def decoder_forward(prep, memory_bank, memory_len, tgt_pad_mask, tgt_emb, *,
                    heads, d_k, d_v, d_model):
    """Mirrors Decoder.forward: init_state from memory_len, then decode."""
    B, S_tgt, _ = tgt_emb.shape
    S_src = memory_bank.shape[1]
    Dp = prep["layers"][0]["cross"]["wo"].shape[1]      # lane-padded d_model

    # lane-dense feature layout: pad d_model up to a multiple of 128
    x = _pad_axis(tgt_emb.astype(jnp.float32), 2, Dp)
    mem = _pad_axis(memory_bank.astype(jnp.float32), 2, Dp)

    # q-row tiling: second "parallel" grid axis (keeps both v7x TCs busy and
    # bounds the probs / y output blocks); pad target length to the tile.
    q_tile = 256 if S_tgt >= 256 else _round_up(S_tgt, 8)
    Sq_pad = _round_up(S_tgt, q_tile)
    pad_mask = tgt_pad_mask
    if Sq_pad != S_tgt:
        x = jnp.pad(x, ((0, 0), (0, Sq_pad - S_tgt), (0, 0)))
        pad_mask = jnp.pad(tgt_pad_mask, ((0, 0), (0, Sq_pad - S_tgt)),
                           constant_values=True)

    # init_decoder(src_lens, max_src_len): key-pad biases only; (B,1,Sk) each.
    # The causal (future) mask is generated in-kernel from iota.
    src_pad = jnp.arange(S_src)[None, :] >= memory_len[:, None]
    src_key_bias = jnp.where(src_pad, _NEG_INF, 0.0).astype(jnp.float32)[:, None, :]
    tgt_key_bias = jnp.where(pad_mask, _NEG_INF, 0.0).astype(jnp.float32)[:, None, :]

    ln_dim = float(d_model)
    attns = []
    for lp in prep["layers"]:
        # masked self-attention + residual + LN1 (probs discarded by reference)
        x = mha_block(lp["self"], x, None, tgt_key_bias, lp["ln1"],
                      heads=heads, d_k=d_k, d_v=d_v, q_tile=q_tile,
                      self_attn=True, return_probs=False, ln_dim=ln_dim)
        # cross-attention over the memory bank + residual + LN2 (probs returned)
        x, attn = mha_block(lp["cross"], x, mem, src_key_bias, lp["ln2"],
                            heads=heads, d_k=d_k, d_v=d_v, q_tile=q_tile,
                            self_attn=False, return_probs=True, ln_dim=ln_dim)
        # position-wise FFN with internal pre-LayerNorm + residual (no outer LN)
        x = ffn_block(lp["ffn"], x, lp["ln3"], ln_dim=ln_dim)
        attns.append(attn[:, :, :S_tgt, :])

    # decoder_outputs, attns (per-layer cross-attention weights)
    return x[:, :S_tgt, :d_model], attns


# ----------------------------------------------------------------------------
# Parameter init (raw, PyTorch-like layout) and prep (pad + fuse for kernels)
# ----------------------------------------------------------------------------
def init_decoder_params(key, nlayers, d_model, heads, d_k, d_v, d_ff):
    def dense(k, fi, fo):
        return jax.random.normal(k, (fi, fo), jnp.float32) * 0.02

    def mha_params(k):
        ks = jax.random.split(k, 4)
        return {
            "wq": dense(ks[0], d_model, heads * d_k), "bq": jnp.zeros((heads * d_k,), jnp.float32),
            "wk": dense(ks[1], d_model, heads * d_k), "bk": jnp.zeros((heads * d_k,), jnp.float32),
            "wv": dense(ks[2], d_model, heads * d_v), "bv": jnp.zeros((heads * d_v,), jnp.float32),
            "wo": dense(ks[3], heads * d_v, d_model), "bo": jnp.zeros((d_model,), jnp.float32),
        }

    def ln_params():
        return {"g": jnp.ones((d_model,), jnp.float32), "b": jnp.zeros((d_model,), jnp.float32)}

    layers = []
    for _ in range(nlayers):
        key, k_self, k_cross, k_w1, k_w2 = jax.random.split(key, 5)
        layers.append({
            "self": mha_params(k_self),
            "cross": mha_params(k_cross),
            "ffn": {"w1": dense(k_w1, d_model, d_ff), "b1": jnp.zeros((d_ff,), jnp.float32),
                    "w2": dense(k_w2, d_ff, d_model), "b2": jnp.zeros((d_model,), jnp.float32)},
            "ln1": ln_params(), "ln2": ln_params(), "ln3": ln_params(),
        })
    return {"layers": layers}


def prepare_decoder_params(params, d_model, d_ff):
    """Pad feature dims to 128-lane multiples, fuse K|V projection weights and
    cast weight matrices to bf16 (MXU operands).  Done once, outside kernels."""
    Dp = _round_up(max(d_model, 1), 128)
    Fp = _round_up(max(d_ff, 1), 128)

    def prep_mha(mp):
        return {
            "wq": _pad_axis(mp["wq"], 0, Dp).astype(jnp.bfloat16),
            "bq": mp["bq"].reshape(1, -1).astype(jnp.float32),
            "wkv": jnp.concatenate([_pad_axis(mp["wk"], 0, Dp),
                                    _pad_axis(mp["wv"], 0, Dp)],
                                   axis=1).astype(jnp.bfloat16),
            "bkv": jnp.concatenate([mp["bk"], mp["bv"]]).reshape(1, -1).astype(jnp.float32),
            "wo": _pad_axis(mp["wo"], 1, Dp).astype(jnp.bfloat16),
            "bo": _pad_axis(mp["bo"].reshape(1, -1), 1, Dp).astype(jnp.float32),
        }

    def prep_ln(lnp):
        return {"g": _pad_axis(lnp["g"].reshape(1, -1), 1, Dp).astype(jnp.float32),
                "b": _pad_axis(lnp["b"].reshape(1, -1), 1, Dp).astype(jnp.float32)}

    def prep_ffn(fpp):
        return {
            "w1": _pad_axis(_pad_axis(fpp["w1"], 0, Dp), 1, Fp).astype(jnp.bfloat16),
            "b1": _pad_axis(fpp["b1"].reshape(1, -1), 1, Fp).astype(jnp.float32),
            "w2": _pad_axis(_pad_axis(fpp["w2"], 0, Fp), 1, Dp).astype(jnp.bfloat16),
            "b2": _pad_axis(fpp["b2"].reshape(1, -1), 1, Dp).astype(jnp.float32),
        }

    return {"layers": [{
        "self": prep_mha(lp["self"]), "cross": prep_mha(lp["cross"]),
        "ffn": prep_ffn(lp["ffn"]),
        "ln1": prep_ln(lp["ln1"]), "ln2": prep_ln(lp["ln2"]), "ln3": prep_ln(lp["ln3"]),
    } for lp in params["layers"]]}


# TODO(synk): dropout (eval-mode no-op), args.reload_decoder_state checkpoint
# loading, coverage_attn / split-decoder(copy_attn) paths are intentionally not
# reproduced.

# ----------------------------------------------------------------------------
if __name__ == "__main__":
    # small shapes consistent with the module's forward signature
    B, S_src, S_tgt = 2, 10, 8
    d_model, heads, d_k, d_v, d_ff, nlayers = 32, 4, 8, 8, 64, 2

    key = jax.random.PRNGKey(0)
    k_mem, k_emb, k_par = jax.random.split(key, 3)

    memory_bank = jax.random.normal(k_mem, (B, S_src, d_model), jnp.float32)
    tgt_emb = jax.random.normal(k_emb, (B, S_tgt, d_model), jnp.float32)
    memory_len = jnp.array([10, 7], jnp.int32)
    tgt_len = jnp.array([8, 5], jnp.int32)
    tgt_pad_mask = jnp.arange(S_tgt)[None, :] >= tgt_len[:, None]   # True = pad

    raw_params = init_decoder_params(k_par, nlayers, d_model, heads, d_k, d_v, d_ff)
    prep_params = prepare_decoder_params(raw_params, d_model, d_ff)

    fwd = jax.jit(partial(decoder_forward, heads=heads, d_k=d_k, d_v=d_v,
                          d_model=d_model))
    dec_out, attns = fwd(prep_params, memory_bank, memory_len, tgt_pad_mask, tgt_emb)
    jax.block_until_ready(dec_out)
    jax.block_until_ready(attns[-1])

    assert dec_out.shape == (B, S_tgt, d_model)
    assert attns[-1].shape == (B, heads, S_tgt, S_src)
    assert bool(jnp.all(jnp.isfinite(dec_out)))
    assert bool(jnp.all(jnp.isfinite(attns[-1])))
    print("KERNEL_OK")
</pallas_src>

<mosaic_0001>
module attributes {stable_mosaic.version = 11 : i64} {
  func.func @_k(%arg0: i32, %arg1: memref<8x128xf32, #tpu.memory_space<vmem>>, %arg2: memref<8x128xf32, #tpu.memory_space<vmem>>) attributes {dimension_semantics = [#tpu.dimension_semantics<arbitrary>], iteration_bounds = array<i64: 2>, scalar_prefetch = 0 : i64, scratch_operands = 0 : i64, tpu.core_type = #tpu.core_type<tc>, window_params = [{pipeline_mode = #tpu.pipeline_mode<synchronous>, transform_indices = @transform_0, window_bounds = array<i64: 8, 128>}, {transform_indices = @transform_1, window_bounds = array<i64: 8, 128>}]} {
    %c0 = arith.constant 0 : index
    %c0_0 = arith.constant 0 : index
    %0 = vector.load %arg1[%c0, %c0_0] : memref<8x128xf32, #tpu.memory_space<vmem>>, vector<8x128xf32>
    %cst = arith.constant 1.000000e+00 : f32
    %1 = vector.broadcast %cst : f32 to vector<8x128xf32>
    %2 = arith.addf %0, %1 : vector<8x128xf32>
    %c0_1 = arith.constant 0 : index
    %c0_2 = arith.constant 0 : index
    %3 = vector.load %arg2[%c0_1, %c0_2] : memref<8x128xf32, #tpu.memory_space<vmem>>, vector<8x128xf32>
    tpu.vector_store %arg2[%c0_1, %c0_2], %2 {strides = array<i32>} : memref<8x128xf32, #tpu.memory_space<vmem>>, vector<8x128xf32>,
    return
  }
  func.func @transform_0(%arg0: i32) -> (i32, i32) {
    %c0_i32 = arith.constant 0 : i32
    %c0_i32_0 = arith.constant 0 : i32
    %c0_i32_1 = arith.constant 0 : i32
    return %c0_i32, %c0_i32_0 : i32, i32
  }
  func.func @transform_1(%arg0: i32) -> (i32, i32) {
    %c0_i32 = arith.constant 0 : i32
    %c0_i32_0 = arith.constant 0 : i32
    return %arg0, %c0_i32 : i32, i32
  }
}

module attributes {stable_mosaic.version = 11 : i64} {
  func.func @_mha_block_kernel(%arg0: i32, %arg1: i32, %arg2: memref<1x8x128xf32, #tpu.memory_space<vmem>>, %arg3: memref<1x1x8xf32, #tpu.memory_space<vmem>>, %arg4: memref<128x32xbf16, #tpu.memory_space<vmem>>, %arg5: memref<1x32xf32, #tpu.memory_space<vmem>>, %arg6: memref<128x64xbf16, #tpu.memory_space<vmem>>, %arg7: memref<1x64xf32, #tpu.memory_space<vmem>>, %arg8: memref<32x128xbf16, #tpu.memory_space<vmem>>, %arg9: memref<1x128xf32, #tpu.memory_space<vmem>>, %arg10: memref<1x128xf32, #tpu.memory_space<vmem>>, %arg11: memref<1x128xf32, #tpu.memory_space<vmem>>, %arg12: memref<1x8x128xf32, #tpu.memory_space<vmem>>) attributes {dimension_semantics = [#tpu.dimension_semantics<parallel>, #tpu.dimension_semantics<parallel>], iteration_bounds = array<i64: 2, 1>, scalar_prefetch = 0 : i64, scratch_operands = 0 : i64, tpu.core_type = #tpu.core_type<tc>, window_params = [{transform_indices = @transform_0, window_bounds = array<i64: 1, 8, 128>}, {transform_indices = @transform_1, window_bounds = array<i64: 1, 1, 8>}, {pipeline_mode = #tpu.pipeline_mode<synchronous>, transform_indices = @transform_2, window_bounds = array<i64: 128, 32>}, {pipeline_mode = #tpu.pipeline_mode<synchronous>, transform_indices = @transform_3, window_bounds = array<i64: 1, 32>}, {pipeline_mode = #tpu.pipeline_mode<synchronous>, transform_indices = @transform_4, window_bounds = array<i64: 128, 64>}, {pipeline_mode = #tpu.pipeline_mode<synchronous>, transform_indices = @transform_5, window_bounds = array<i64: 1, 64>}, {pipeline_mode = #tpu.pipeline_mode<synchronous>, transform_indices = @transform_6, window_bounds = array<i64: 32, 128>}, {pipeline_mode = #tpu.pipeline_mode<synchronous>, transform_indices = @transform_7, window_bounds = array<i64: 1, 128>}, {pipeline_mode = #tpu.pipeline_mode<synchronous>, transform_indices = @transform_8, window_bounds = array<i64: 1, 128>}, {pipeline_mode = #tpu.pipeline_mode<synchronous>, transform_indices = @transform_9, window_bounds = array<i64: 1, 128>}, {transform_indices = @transform_10, window_bounds = array<i64: 1, 8, 128>}]} {
    %c8_i32 = arith.constant 8 : i32
    %0 = arith.muli %arg1, %c8_i32 : i32
    %1 = tpu.assume_multiple %0, 8 : i32
    %c0 = arith.constant 0 : index
    %2 = arith.index_cast %1 : i32 to index
    %c0_0 = arith.constant 0 : index
    %3 = vector.load %arg2[%c0, %2, %c0_0] : memref<1x8x128xf32, #tpu.memory_space<vmem>>, vector<1x8x128xf32>
    %4 = vector.shape_cast %3 : vector<1x8x128xf32> to vector<8x128xf32>
    %c0_1 = arith.constant 0 : index
    %c0_2 = arith.constant 0 : index
    %c0_3 = arith.constant 0 : index
    %5 = vector.load %arg2[%c0_1, %c0_2, %c0_3] : memref<1x8x128xf32, #tpu.memory_space<vmem>>, vector<1x8x128xf32>
    %6 = vector.shape_cast %5 : vector<1x8x128xf32> to vector<8x128xf32>
    %7 = arith.truncf %4 : vector<8x128xf32> to vector<8x128xbf16>
    %c0_4 = arith.constant 0 : index
    %c0_5 = arith.constant 0 : index
    %8 = vector.load %arg4[%c0_4, %c0_5] : memref<128x32xbf16, #tpu.memory_space<vmem>>, vector<128x32xbf16>
    %cst = arith.constant dense<0.000000e+00> : vector<8x32xf32>
    %9 = tpu.matmul %7, %8, %cst {dimension_numbers = #tpu.dot_dimension_numbers<[1], [0], [0], [1], [0, 0, 1, 1], [], []>} : vector<8x128xbf16>, vector<128x32xbf16>, vector<8x32xf32> -> vector<8x32xf32>
    %c0_6 = arith.constant 0 : index
    %c0_7 = arith.constant 0 : index
    %10 = vector.load %arg5[%c0_6, %c0_7] : memref<1x32xf32, #tpu.memory_space<vmem>>, vector<1x32xf32>
    %11 = vector.broadcast %10 : vector<1x32xf32> to vector<8x32xf32>
    %12 = arith.addf %9, %11 : vector<8x32xf32>
    %13 = arith.truncf %6 : vector<8x128xf32> to vector<8x128xbf16>
    %c0_8 = arith.constant 0 : index
    %c0_9 = arith.constant 0 : index
    %14 = vector.load %arg6[%c0_8, %c0_9] : memref<128x64xbf16, #tpu.memory_space<vmem>>, vector<128x64xbf16>
    %cst_10 = arith.constant dense<0.000000e+00> : vector<8x64xf32>
    %15 = tpu.matmul %13, %14, %cst_10 {dimension_numbers = #tpu.dot_dimension_numbers<[1], [0], [0], [1], [0, 0, 1, 1], [], []>} : vector<8x128xbf16>, vector<128x64xbf16>, vector<8x64xf32> -> vector<8x64xf32>
    %c0_11 = arith.constant 0 : index
    %c0_12 = arith.constant 0 : index
    %16 = vector.load %arg7[%c0_11, %c0_12] : memref<1x64xf32, #tpu.memory_space<vmem>>, vector<1x64xf32>
    %17 = vector.broadcast %16 : vector<1x64xf32> to vector<8x64xf32>
    %18 = arith.addf %15, %17 : vector<8x64xf32>
    %cst_13 = arith.constant 0.353553385 : f32
    %19 = vector.broadcast %cst_13 : f32 to vector<8x32xf32>
    %20 = arith.mulf %12, %19 : vector<8x32xf32>
    %21 = arith.truncf %20 : vector<8x32xf32> to vector<8x32xbf16>
    %22 = vector.extract_strided_slice %18 {offsets = [0, 0], sizes = [8, 32], strides = [1, 1]} : vector<8x64xf32> to vector<8x32xf32>
    %23 = arith.truncf %22 : vector<8x32xf32> to vector<8x32xbf16>
    %24 = vector.extract_strided_slice %18 {offsets = [0, 32], sizes = [8, 32], strides = [1, 1]} : vector<8x64xf32> to vector<8x32xf32>
    %25 = arith.truncf %24 : vector<8x32xf32> to vector<8x32xbf16>
    %c0_14 = arith.constant 0 : index
    %c0_15 = arith.constant 0 : index
    %c0_16 = arith.constant 0 : index
    %26 = vector.load %arg3[%c0_14, %c0_15, %c0_16] : memref<1x1x8xf32, #tpu.memory_space<vmem>>, vector<1x1x8xf32>
    %27 = vector.shape_cast %26 : vector<1x1x8xf32> to vector<1x8xf32>
    %28 = tpu.iota {dimensions = array<i32: 0>} : vector<8x8xi32>
    %29 = vector.broadcast %1 : i32 to vector<8x8xi32>
    %30 = arith.addi %29, %28 : vector<8x8xi32>
    %31 = tpu.iota {dimensions = array<i32: 1>} : vector<8x8xi32>
    %32 = arith.cmpi sgt, %31, %30 : vector<8x8xi32>
    %cst_17 = arith.constant -1.000000e+09 : f32
    %cst_18 = arith.constant 0.000000e+00 : f32
    %33 = vector.broadcast %cst_17 : f32 to vector<8x8xf32>
    %34 = vector.broadcast %cst_18 : f32 to vector<8x8xf32>
    %35 = arith.select %32, %33, %34 : vector<8x8xi1>, vector<8x8xf32>
    %36 = vector.broadcast %27 : vector<1x8xf32> to vector<8x8xf32>
    %37 = arith.addf %36, %35 : vector<8x8xf32>
    %c0_19 = arith.constant 0 : index
    %c0_20 = arith.constant 0 : index
    %38 = vector.load %arg8[%c0_19, %c0_20] : memref<32x128xbf16, #tpu.memory_space<vmem>>, vector<32x128xbf16>
    %c0_21 = arith.constant 0 : index
    %c0_22 = arith.constant 0 : index
    %39 = vector.load %arg9[%c0_21, %c0_22] : memref<1x128xf32, #tpu.memory_space<vmem>>, vector<1x128xf32>
    %40 = vector.broadcast %39 : vector<1x128xf32> to vector<8x128xf32>
    %41 = arith.addf %4, %40 : vector<8x128xf32>
    %42 = vector.extract_strided_slice %21 {offsets = [0, 0], sizes = [8, 8], strides = [1, 1]} : vector<8x32xbf16> to vector<8x8xbf16>
    %43 = vector.extract_strided_slice %23 {offsets = [0, 0], sizes = [8, 8], strides = [1, 1]} : vector<8x32xbf16> to vector<8x8xbf16>
    %44 = vector.extract_strided_slice %25 {offsets = [0, 0], sizes = [8, 8], strides = [1, 1]} : vector<8x32xbf16> to vector<8x8xbf16>
    %cst_23 = arith.constant dense<0.000000e+00> : vector<8x8xf32>
    %45 = tpu.matmul %42, %43, %cst_23 {dimension_numbers = #tpu.dot_dimension_numbers<[1], [1], [0], [0], [0, 0, 1, 0], [], []>} : vector<8x8xbf16>, vector<8x8xbf16>, vector<8x8xf32> -> vector<8x8xf32>
    %46 = arith.addf %45, %37 : vector<8x8xf32>
    %cst_24 = arith.constant dense<0xFF800000> : vector<8xf32>
    %47 = vector.multi_reduction <maximumf>, %46, %cst_24 [1] : vector<8x8xf32> to vector<8xf32>
    %48 = vector.shape_cast %47 : vector<8xf32> to vector<8x1xf32>
    %49 = vector.broadcast %48 : vector<8x1xf32> to vector<8x8xf32>
    %50 = arith.subf %46, %49 : vector<8x8xf32>
    %51 = math.exp %50 : vector<8x8xf32>
    %cst_25 = arith.constant dense<0.000000e+00> : vector<8xf32>
    %52 = vector.multi_reduction <add>, %51, %cst_25 [1] : vector<8x8xf32> to vector<8xf32>
    %53 = vector.shape_cast %52 : vector<8xf32> to vector<8x1xf32>
    %54 = tpu.reciprocal %53 {approx = true} : vector<8x1xf32> -> vector<8x1xf32>
    %55 = vector.broadcast %54 : vector<8x1xf32> to vector<8x8xf32>
    %56 = arith.mulf %51, %55 : vector<8x8xf32>
    %57 = arith.truncf %56 : vector<8x8xf32> to vector<8x8xbf16>
    %cst_26 = arith.constant dense<0.000000e+00> : vector<8x8xf32>
    %58 = tpu.matmul %57, %44, %cst_26 {dimension_numbers = #tpu.dot_dimension_numbers<[1], [0], [0], [1], [0, 0, 1, 1], [], []>} : vector<8x8xbf16>, vector<8x8xbf16>, vector<8x8xf32> -> vector<8x8xf32>
    %59 = arith.truncf %58 : vector<8x8xf32> to vector<8x8xbf16>
    %60 = vector.extract_strided_slice %38 {offsets = [0, 0], sizes = [8, 128], strides = [1, 1]} : vector<32x128xbf16> to vector<8x128xbf16>
    %cst_27 = arith.constant dense<0.000000e+00> : vector<8x128xf32>
    %61 = tpu.matmul %59, %60, %cst_27 {dimension_numbers = #tpu.dot_dimension_numbers<[1], [0], [0], [1], [0, 0, 1, 1], [], []>} : vector<8x8xbf16>, vector<8x128xbf16>, vector<8x128xf32> -> vector<8x128xf32>
    %62 = arith.addf %41, %61 : vector<8x128xf32>
    %63 = vector.extract_strided_slice %21 {offsets = [0, 8], sizes = [8, 8], strides = [1, 1]} : vector<8x32xbf16> to vector<8x8xbf16>
    %64 = vector.extract_strided_slice %23 {offsets = [0, 8], sizes = [8, 8], strides = [1, 1]} : vector<8x32xbf16> to vector<8x8xbf16>
    %65 = vector.extract_strided_slice %25 {offsets = [0, 8], sizes = [8, 8], strides = [1, 1]} : vector<8x32xbf16> to vector<8x8xbf16>
    %cst_28 = arith.constant dense<0.000000e+00> : vector<8x8xf32>
    %66 = tpu.matmul %63, %64, %cst_28 {dimension_numbers = #tpu.dot_dimension_numbers<[1], [1], [0], [0], [0, 0, 1, 0], [], []>} : vector<8x8xbf16>, vector<8x8xbf16>, vector<8x8xf32> -> vector<8x8xf32>
    %67 = arith.addf %66, %37 : vector<8x8xf32>
    %cst_29 = arith.constant dense<0xFF800000> : vector<8xf32>
    %68 = vector.multi_reduction <maximumf>, %67, %cst_29 [1] : vector<8x8xf32> to vector<8xf32>
    %69 = vector.shape_cast %68 : vector<8xf32> to vector<8x1xf32>
    %70 = vector.broadcast %69 : vector<8x1xf32> to vector<8x8xf32>
    %71 = arith.subf %67, %70 : vector<8x8xf32>
    %72 = math.exp %71 : vector<8x8xf32>
    %cst_30 = arith.constant dense<0.000000e+00> : vector<8xf32>
    %73 = vector.multi_reduction <add>, %72, %cst_30 [1] : vector<8x8xf32> to vector<8xf32>
    %74 = vector.shape_cast %73 : vector<8xf32> to vector<8x1xf32>
    %75 = tpu.reciprocal %74 {approx = true} : vector<8x1xf32> -> vector<8x1xf32>
    %76 = vector.broadcast %75 : vector<8x1xf32> to vector<8x8xf32>
    %77 = arith.mulf %72, %76 : vector<8x8xf32>
    %78 = arith.truncf %77 : vector<8x8xf32> to vector<8x8xbf16>
    %cst_31 = arith.constant dense<0.000000e+00> : vector<8x8xf32>
    %79 = tpu.matmul %78, %65, %cst_31 {dimension_numbers = #tpu.dot_dimension_numbers<[1], [0], [0], [1], [0, 0, 1, 1], [], []>} : vector<8x8xbf16>, vector<8x8xbf16>, vector<8x8xf32> -> vector<8x8xf32>
    %80 = arith.truncf %79 : vector<8x8xf32> to vector<8x8xbf16>
    %81 = vector.extract_strided_slice %38 {offsets = [8, 0], sizes = [8, 128], strides = [1, 1]} : vector<32x128xbf16> to vector<8x128xbf16>
    %cst_32 = arith.constant dense<0.000000e+00> : vector<8x128xf32>
    %82 = tpu.matmul %80, %81, %cst_32 {dimension_numbers = #tpu.dot_dimension_numbers<[1], [0], [0], [1], [0, 0, 1, 1], [], []>} : vector<8x8xbf16>, vector<8x128xbf16>, vector<8x128xf32> -> vector<8x128xf32>
    %83 = arith.addf %62, %82 : vector<8x128xf32>
    %84 = vector.extract_strided_slice %21 {offsets = [0, 16], sizes = [8, 8], strides = [1, 1]} : vector<8x32xbf16> to vector<8x8xbf16>
    %85 = vector.extract_strided_slice %23 {offsets = [0, 16], sizes = [8, 8], strides = [1, 1]} : vector<8x32xbf16> to vector<8x8xbf16>
    %86 = vector.extract_strided_slice %25 {offsets = [0, 16], sizes = [8, 8], strides = [1, 1]} : vector<8x32xbf16> to vector<8x8xbf16>
    %cst_33 = arith.constant dense<0.000000e+00> : vector<8x8xf32>
    %87 = tpu.matmul %84, %85, %cst_33 {dimension_numbers = #tpu.dot_dimension_numbers<[1], [1], [0], [0], [0, 0, 1, 0], [], []>} : vector<8x8xbf16>, vector<8x8xbf16>, vector<8x8xf32> -> vector<8x8xf32>
    %88 = arith.addf %87, %37 : vector<8x8xf32>
    %cst_34 = arith.constant dense<0xFF800000> : vector<8xf32>
    %89 = vector.multi_reduction <maximumf>, %88, %cst_34 [1] : vector<8x8xf32> to vector<8xf32>
    %90 = vector.shape_cast %89 : vector<8xf32> to vector<8x1xf32>
    %91 = vector.broadcast %90 : vector<8x1xf32> to vector<8x8xf32>
    %92 = arith.subf %88, %91 : vector<8x8xf32>
    %93 = math.exp %92 : vector<8x8xf32>
    %cst_35 = arith.constant dense<0.000000e+00> : vector<8xf32>
    %94 = vector.multi_reduction <add>, %93, %cst_35 [1] : vector<8x8xf32> to vector<8xf32>
    %95 = vector.shape_cast %94 : vector<8xf32> to vector<8x1xf32>
    %96 = tpu.reciprocal %95 {approx = true} : vector<8x1xf32> -> vector<8x1xf32>
    %97 = vector.broadcast %96 : vector<8x1xf32> to vector<8x8xf32>
    %98 = arith.mulf %93, %97 : vector<8x8xf32>
    %99 = arith.truncf %98 : vector<8x8xf32> to vector<8x8xbf16>
    %cst_36 = arith.constant dense<0.000000e+00> : vector<8x8xf32>
    %100 = tpu.matmul %99, %86, %cst_36 {dimension_numbers = #tpu.dot_dimension_numbers<[1], [0], [0], [1], [0, 0, 1, 1], [], []>} : vector<8x8xbf16>, vector<8x8xbf16>, vector<8x8xf32> -> vector<8x8xf32>
    %101 = arith.truncf %100 : vector<8x8xf32> to vector<8x8xbf16>
    %102 = vector.extract_strided_slice %38 {offsets = [16, 0], sizes = [8, 128], strides = [1, 1]} : vector<32x128xbf16> to vector<8x128xbf16>
    %cst_37 = arith.constant dense<0.000000e+00> : vector<8x128xf32>
    %103 = tpu.matmul %101, %102, %cst_37 {dimension_numbers = #tpu.dot_dimension_numbers<[1], [0], [0], [1], [0, 0, 1, 1], [], []>} : vector<8x8xbf16>, vector<8x128xbf16>, vector<8x128xf32> -> vector<8x128xf32>
    %104 = arith.addf %83, %103 : vector<8x128xf32>
    %105 = vector.extract_strided_slice %21 {offsets = [0, 24], sizes = [8, 8], strides = [1, 1]} : vector<8x32xbf16> to vector<8x8xbf16>
    %106 = vector.extract_strided_slice %23 {offsets = [0, 24], sizes = [8, 8], strides = [1, 1]} : vector<8x32xbf16> to vector<8x8xbf16>
    %107 = vector.extract_strided_slice %25 {offsets = [0, 24], sizes = [8, 8], strides = [1, 1]} : vector<8x32xbf16> to vector<8x8xbf16>
    %cst_38 = arith.constant dense<0.000000e+00> : vector<8x8xf32>
    %108 = tpu.matmul %105, %106, %cst_38 {dimension_numbers = #tpu.dot_dimension_numbers<[1], [1], [0], [0], [0, 0, 1, 0], [], []>} : vector<8x8xbf16>, vector<8x8xbf16>, vector<8x8xf32> -> vector<8x8xf32>
    %109 = arith.addf %108, %37 : vector<8x8xf32>
    %cst_39 = arith.constant dense<0xFF800000> : vector<8xf32>
    %110 = vector.multi_reduction <maximumf>, %109, %cst_39 [1] : vector<8x8xf32> to vector<8xf32>
    %111 = vector.shape_cast %110 : vector<8xf32> to vector<8x1xf32>
    %112 = vector.broadcast %111 : vector<8x1xf32> to vector<8x8xf32>
    %113 = arith.subf %109, %112 : vector<8x8xf32>
    %114 = math.exp %113 : vector<8x8xf32>
    %cst_40 = arith.constant dense<0.000000e+00> : vector<8xf32>
    %115 = vector.multi_reduction <add>, %114, %cst_40 [1] : vector<8x8xf32> to vector<8xf32>
    %116 = vector.shape_cast %115 : vector<8xf32> to vector<8x1xf32>
    %117 = tpu.reciprocal %116 {approx = true} : vector<8x1xf32> -> vector<8x1xf32>
    %118 = vector.broadcast %117 : vector<8x1xf32> to vector<8x8xf32>
    %119 = arith.mulf %114, %118 : vector<8x8xf32>
    %120 = arith.truncf %119 : vector<8x8xf32> to vector<8x8xbf16>
    %cst_41 = arith.constant dense<0.000000e+00> : vector<8x8xf32>
    %121 = tpu.matmul %120, %107, %cst_41 {dimension_numbers = #tpu.dot_dimension_numbers<[1], [0], [0], [1], [0, 0, 1, 1], [], []>} : vector<8x8xbf16>, vector<8x8xbf16>, vector<8x8xf32> -> vector<8x8xf32>
    %122 = arith.truncf %121 : vector<8x8xf32> to vector<8x8xbf16>
    %123 = vector.extract_strided_slice %38 {offsets = [24, 0], sizes = [8, 128], strides = [1, 1]} : vector<32x128xbf16> to vector<8x128xbf16>
    %cst_42 = arith.constant dense<0.000000e+00> : vector<8x128xf32>
    %124 = tpu.matmul %122, %123, %cst_42 {dimension_numbers = #tpu.dot_dimension_numbers<[1], [0], [0], [1], [0, 0, 1, 1], [], []>} : vector<8x8xbf16>, vector<8x128xbf16>, vector<8x128xf32> -> vector<8x128xf32>
    %125 = arith.addf %104, %124 : vector<8x128xf32>
    %cst_43 = arith.constant dense<0.000000e+00> : vector<8xf32>
    %126 = vector.multi_reduction <add>, %125, %cst_43 [1] : vector<8x128xf32> to vector<8xf32>
    %127 = vector.shape_cast %126 : vector<8xf32> to vector<8x1xf32>
    %cst_44 = arith.constant 3.125000e-02 : f32
    %128 = vector.broadcast %cst_44 : f32 to vector<8x1xf32>
    %129 = arith.mulf %127, %128 : vector<8x1xf32>
    %130 = arith.mulf %125, %125 : vector<8x128xf32>
    %cst_45 = arith.constant dense<0.000000e+00> : vector<8xf32>
    %131 = vector.multi_reduction <add>, %130, %cst_45 [1] : vector<8x128xf32> to vector<8xf32>
    %132 = vector.shape_cast %131 : vector<8xf32> to vector<8x1xf32>
    %cst_46 = arith.constant 3.125000e-02 : f32
    %133 = vector.broadcast %cst_46 : f32 to vector<8x1xf32>
    %134 = arith.mulf %132, %133 : vector<8x1xf32>
    %135 = arith.mulf %129, %129 : vector<8x1xf32>
    %136 = arith.subf %134, %135 : vector<8x1xf32>
    %137 = vector.broadcast %129 : vector<8x1xf32> to vector<8x128xf32>
    %138 = arith.subf %125, %137 : vector<8x128xf32>
    %cst_47 = arith.constant 9.99999997E-7 : f32
    %139 = vector.broadcast %cst_47 : f32 to vector<8x1xf32>
    %140 = arith.addf %136, %139 : vector<8x1xf32>
    %141 = math.rsqrt %140 : vector<8x1xf32>
    %142 = vector.broadcast %141 : vector<8x1xf32> to vector<8x128xf32>
    %143 = arith.mulf %138, %142 : vector<8x128xf32>
    %c0_48 = arith.constant 0 : index
    %c0_49 = arith.constant 0 : index
    %144 = vector.load %arg10[%c0_48, %c0_49] : memref<1x128xf32, #tpu.memory_space<vmem>>, vector<1x128xf32>
    %145 = vector.broadcast %144 : vector<1x128xf32> to vector<8x128xf32>
    %146 = arith.mulf %143, %145 : vector<8x128xf32>
    %c0_50 = arith.constant 0 : index
    %c0_51 = arith.constant 0 : index
    %147 = vector.load %arg11[%c0_50, %c0_51] : memref<1x128xf32, #tpu.memory_space<vmem>>, vector<1x128xf32>
    %148 = vector.broadcast %147 : vector<1x128xf32> to vector<8x128xf32>
    %149 = arith.addf %146, %148 : vector<8x128xf32>
    %c0_52 = arith.constant 0 : index
    %c0_53 = arith.constant 0 : index
    %c0_54 = arith.constant 0 : index
    %150 = vector.load %arg12[%c0_52, %c0_53, %c0_54] : memref<1x8x128xf32, #tpu.memory_space<vmem>>, vector<1x8x128xf32>
    %151 = vector.shape_cast %150 : vector<1x8x128xf32> to vector<8x128xf32>
    %152 = vector.shape_cast %149 : vector<8x128xf32> to vector<1x8x128xf32>
    tpu.vector_store %arg12[%c0_52, %c0_53, %c0_54], %152 {strides = array<i32>} : memref<1x8x128xf32, #tpu.memory_space<vmem>>, vector<1x8x128xf32>,
    return
  }
  func.func @transform_0(%arg0: i32, %arg1: i32) -> (i32, i32, i32) {
    %c0_i32 = arith.constant 0 : i32
    %c0_i32_0 = arith.constant 0 : i32
    %c0_i32_1 = arith.constant 0 : i32
    return %arg0, %c0_i32, %c0_i32_0 : i32, i32, i32
  }
  func.func @transform_1(%arg0: i32, %arg1: i32) -> (i32, i32, i32) {
    %c0_i32 = arith.constant 0 : i32
    %c0_i32_0 = arith.constant 0 : i32
    %c0_i32_1 = arith.constant 0 : i32
    return %arg0, %c0_i32, %c0_i32_0 : i32, i32, i32
  }
  func.func @transform_2(%arg0: i32, %arg1: i32) -> (i32, i32) {
    %c0_i32 = arith.constant 0 : i32
    %c0_i32_0 = arith.constant 0 : i32
    %c0_i32_1 = arith.constant 0 : i32
    return %c0_i32, %c0_i32_0 : i32, i32
  }
  func.func @transform_3(%arg0: i32, %arg1: i32) -> (i32, i32) {
    %c0_i32 = arith.constant 0 : i32
    %c0_i32_0 = arith.constant 0 : i32
    %c0_i32_1 = arith.constant 0 : i32
    return %c0_i32, %c0_i32_0 : i32, i32
  }
  func.func @transform_4(%arg0: i32, %arg1: i32) -> (i32, i32) {
    %c0_i32 = arith.constant 0 : i32
    %c0_i32_0 = arith.constant 0 : i32
    %c0_i32_1 = arith.constant 0 : i32
    return %c0_i32, %c0_i32_0 : i32, i32
  }
  func.func @transform_5(%arg0: i32, %arg1: i32) -> (i32, i32) {
    %c0_i32 = arith.constant 0 : i32
    %c0_i32_0 = arith.constant 0 : i32
    %c0_i32_1 = arith.constant 0 : i32
    return %c0_i32, %c0_i32_0 : i32, i32
  }
  func.func @transform_6(%arg0: i32, %arg1: i32) -> (i32, i32) {
    %c0_i32 = arith.constant 0 : i32
    %c0_i32_0 = arith.constant 0 : i32
    %c0_i32_1 = arith.constant 0 : i32
    return %c0_i32, %c0_i32_0 : i32, i32
  }
  func.func @transform_7(%arg0: i32, %arg1: i32) -> (i32, i32) {
    %c0_i32 = arith.constant 0 : i32
    %c0_i32_0 = arith.constant 0 : i32
    %c0_i32_1 = arith.constant 0 : i32
    return %c0_i32, %c0_i32_0 : i32, i32
  }
  func.func @transform_8(%arg0: i32, %arg1: i32) -> (i32, i32) {
    %c0_i32 = arith.constant 0 : i32
    %c0_i32_0 = arith.constant 0 : i32
    %c0_i32_1 = arith.constant 0 : i32
    return %c0_i32, %c0_i32_0 : i32, i32
  }
  func.func @transform_9(%arg0: i32, %arg1: i32) -> (i32, i32) {
    %c0_i32 = arith.constant 0 : i32
    %c0_i32_0 = arith.constant 0 : i32
    %c0_i32_1 = arith.constant 0 : i32
    return %c0_i32, %c0_i32_0 : i32, i32
  }
  func.func @transform_10(%arg0: i32, %arg1: i32) -> (i32, i32, i32) {
    %c0_i32 = arith.constant 0 : i32
    %c0_i32_0 = arith.constant 0 : i32
    return %arg0, %arg1, %c0_i32 : i32, i32, i32
  }
}

module attributes {stable_mosaic.version = 11 : i64} {
  func.func @_mha_block_kernel(%arg0: i32, %arg1: i32, %arg2: memref<1x8x128xf32, #tpu.memory_space<vmem>>, %arg3: memref<1x10x128xf32, #tpu.memory_space<vmem>>, %arg4: memref<1x1x10xf32, #tpu.memory_space<vmem>>, %arg5: memref<128x32xbf16, #tpu.memory_space<vmem>>, %arg6: memref<1x32xf32, #tpu.memory_space<vmem>>, %arg7: memref<128x64xbf16, #tpu.memory_space<vmem>>, %arg8: memref<1x64xf32, #tpu.memory_space<vmem>>, %arg9: memref<32x128xbf16, #tpu.memory_space<vmem>>, %arg10: memref<1x128xf32, #tpu.memory_space<vmem>>, %arg11: memref<1x128xf32, #tpu.memory_space<vmem>>, %arg12: memref<1x128xf32, #tpu.memory_space<vmem>>, %arg13: memref<1x8x128xf32, #tpu.memory_space<vmem>>, %arg14: memref<1x4x8x10xf32, #tpu.memory_space<vmem>>) attributes {dimension_semantics = [#tpu.dimension_semantics<parallel>, #tpu.dimension_semantics<parallel>], iteration_bounds = array<i64: 2, 1>, scalar_prefetch = 0 : i64, scratch_operands = 0 : i64, tpu.core_type = #tpu.core_type<tc>, window_params = [{transform_indices = @transform_0, window_bounds = array<i64: 1, 8, 128>}, {transform_indices = @transform_1, window_bounds = array<i64: 1, 10, 128>}, {transform_indices = @transform_2, window_bounds = array<i64: 1, 1, 10>}, {pipeline_mode = #tpu.pipeline_mode<synchronous>, transform_indices = @transform_3, window_bounds = array<i64: 128, 32>}, {pipeline_mode = #tpu.pipeline_mode<synchronous>, transform_indices = @transform_4, window_bounds = array<i64: 1, 32>}, {pipeline_mode = #tpu.pipeline_mode<synchronous>, transform_indices = @transform_5, window_bounds = array<i64: 128, 64>}, {pipeline_mode = #tpu.pipeline_mode<synchronous>, transform_indices = @transform_6, window_bounds = array<i64: 1, 64>}, {pipeline_mode = #tpu.pipeline_mode<synchronous>, transform_indices = @transform_7, window_bounds = array<i64: 32, 128>}, {pipeline_mode = #tpu.pipeline_mode<synchronous>, transform_indices = @transform_8, window_bounds = array<i64: 1, 128>}, {pipeline_mode = #tpu.pipeline_mode<synchronous>, transform_indices = @transform_9, window_bounds = array<i64: 1, 128>}, {pipeline_mode = #tpu.pipeline_mode<synchronous>, transform_indices = @transform_10, window_bounds = array<i64: 1, 128>}, {transform_indices = @transform_11, window_bounds = array<i64: 1, 8, 128>}, {transform_indices = @transform_12, window_bounds = array<i64: 1, 4, 8, 10>}]} {
    %c0 = arith.constant 0 : index
    %c0_0 = arith.constant 0 : index
    %c0_1 = arith.constant 0 : index
    %0 = vector.load %arg2[%c0, %c0_0, %c0_1] : memref<1x8x128xf32, #tpu.memory_space<vmem>>, vector<1x8x128xf32>
    %1 = vector.shape_cast %0 : vector<1x8x128xf32> to vector<8x128xf32>
    %c0_2 = arith.constant 0 : index
    %c0_3 = arith.constant 0 : index
    %c0_4 = arith.constant 0 : index
    %2 = vector.load %arg3[%c0_2, %c0_3, %c0_4] : memref<1x10x128xf32, #tpu.memory_space<vmem>>, vector<1x10x128xf32>
    %3 = vector.shape_cast %2 : vector<1x10x128xf32> to vector<10x128xf32>
    %4 = arith.truncf %1 : vector<8x128xf32> to vector<8x128xbf16>
    %c0_5 = arith.constant 0 : index
    %c0_6 = arith.constant 0 : index
    %5 = vector.load %arg5[%c0_5, %c0_6] : memref<128x32xbf16, #tpu.memory_space<vmem>>, vector<128x32xbf16>
    %cst = arith.constant dense<0.000000e+00> : vector<8x32xf32>
    %6 = tpu.matmul %4, %5, %cst {dimension_numbers = #tpu.dot_dimension_numbers<[1], [0], [0], [1], [0, 0, 1, 1], [], []>} : vector<8x128xbf16>, vector<128x32xbf16>, vector<8x32xf32> -> vector<8x32xf32>
    %c0_7 = arith.constant 0 : index
    %c0_8 = arith.constant 0 : index
    %7 = vector.load %arg6[%c0_7, %c0_8] : memref<1x32xf32, #tpu.memory_space<vmem>>, vector<1x32xf32>
    %8 = vector.broadcast %7 : vector<1x32xf32> to vector<8x32xf32>
    %9 = arith.addf %6, %8 : vector<8x32xf32>
    %10 = arith.truncf %3 : vector<10x128xf32> to vector<10x128xbf16>
    %c0_9 = arith.constant 0 : index
    %c0_10 = arith.constant 0 : index
    %11 = vector.load %arg7[%c0_9, %c0_10] : memref<128x64xbf16, #tpu.memory_space<vmem>>, vector<128x64xbf16>
    %cst_11 = arith.constant dense<0.000000e+00> : vector<10x64xf32>
    %12 = tpu.matmul %10, %11, %cst_11 {dimension_numbers = #tpu.dot_dimension_numbers<[1], [0], [0], [1], [0, 0, 1, 1], [], []>} : vector<10x128xbf16>, vector<128x64xbf16>, vector<10x64xf32> -> vector<10x64xf32>
    %c0_12 = arith.constant 0 : index
    %c0_13 = arith.constant 0 : index
    %13 = vector.load %arg8[%c0_12, %c0_13] : memref<1x64xf32, #tpu.memory_space<vmem>>, vector<1x64xf32>
    %14 = vector.broadcast %13 : vector<1x64xf32> to vector<10x64xf32>
    %15 = arith.addf %12, %14 : vector<10x64xf32>
    %cst_14 = arith.constant 0.353553385 : f32
    %16 = vector.broadcast %cst_14 : f32 to vector<8x32xf32>
    %17 = arith.mulf %9, %16 : vector<8x32xf32>
    %18 = arith.truncf %17 : vector<8x32xf32> to vector<8x32xbf16>
    %19 = vector.extract_strided_slice %15 {offsets = [0, 0], sizes = [10, 32], strides = [1, 1]} : vector<10x64xf32> to vector<10x32xf32>
    %20 = arith.truncf %19 : vector<10x32xf32> to vector<10x32xbf16>
    %21 = vector.extract_strided_slice %15 {offsets = [0, 32], sizes = [10, 32], strides = [1, 1]} : vector<10x64xf32> to vector<10x32xf32>
    %22 = arith.truncf %21 : vector<10x32xf32> to vector<10x32xbf16>
    %c0_15 = arith.constant 0 : index
    %c0_16 = arith.constant 0 : index
    %c0_17 = arith.constant 0 : index
    %23 = vector.load %arg4[%c0_15, %c0_16, %c0_17] : memref<1x1x10xf32, #tpu.memory_space<vmem>>, vector<1x1x10xf32>
    %24 = vector.shape_cast %23 : vector<1x1x10xf32> to vector<1x10xf32>
    %c0_18 = arith.constant 0 : index
    %c0_19 = arith.constant 0 : index
    %25 = vector.load %arg9[%c0_18, %c0_19] : memref<32x128xbf16, #tpu.memory_space<vmem>>, vector<32x128xbf16>
    %c0_20 = arith.constant 0 : index
    %c0_21 = arith.constant 0 : index
    %26 = vector.load %arg10[%c0_20, %c0_21] : memref<1x128xf32, #tpu.memory_space<vmem>>, vector<1x128xf32>
    %27 = vector.broadcast %26 : vector<1x128xf32> to vector<8x128xf32>
    %28 = arith.addf %1, %27 : vector<8x128xf32>
    %29 = vector.extract_strided_slice %18 {offsets = [0, 0], sizes = [8, 8], strides = [1, 1]} : vector<8x32xbf16> to vector<8x8xbf16>
    %30 = vector.extract_strided_slice %20 {offsets = [0, 0], sizes = [10, 8], strides = [1, 1]} : vector<10x32xbf16> to vector<10x8xbf16>
    %31 = vector.extract_strided_slice %22 {offsets = [0, 0], sizes = [10, 8], strides = [1, 1]} : vector<10x32xbf16> to vector<10x8xbf16>
    %cst_22 = arith.constant dense<0.000000e+00> : vector<8x10xf32>
    %32 = tpu.matmul %29, %30, %cst_22 {dimension_numbers = #tpu.dot_dimension_numbers<[1], [1], [0], [0], [0, 0, 1, 0], [], []>} : vector<8x8xbf16>, vector<10x8xbf16>, vector<8x10xf32> -> vector<8x10xf32>
    %33 = vector.broadcast %24 : vector<1x10xf32> to vector<8x10xf32>
    %34 = arith.addf %32, %33 : vector<8x10xf32>
    %cst_23 = arith.constant dense<0xFF800000> : vector<8xf32>
    %35 = vector.multi_reduction <maximumf>, %34, %cst_23 [1] : vector<8x10xf32> to vector<8xf32>
    %36 = vector.shape_cast %35 : vector<8xf32> to vector<8x1xf32>
    %37 = vector.broadcast %36 : vector<8x1xf32> to vector<8x10xf32>
    %38 = arith.subf %34, %37 : vector<8x10xf32>
    %39 = math.exp %38 : vector<8x10xf32>
    %cst_24 = arith.constant dense<0.000000e+00> : vector<8xf32>
    %40 = vector.multi_reduction <add>, %39, %cst_24 [1] : vector<8x10xf32> to vector<8xf32>
    %41 = vector.shape_cast %40 : vector<8xf32> to vector<8x1xf32>
    %42 = tpu.reciprocal %41 : vector<8x1xf32> -> vector<8x1xf32>
    %43 = vector.broadcast %42 : vector<8x1xf32> to vector<8x10xf32>
    %44 = arith.mulf %39, %43 : vector<8x10xf32>
    %c0_25 = arith.constant 0 : index
    %c0_26 = arith.constant 0 : index
    %c0_27 = arith.constant 0 : index
    %c0_28 = arith.constant 0 : index
    %45 = vector.load %arg14[%c0_25, %c0_26, %c0_27, %c0_28] : memref<1x4x8x10xf32, #tpu.memory_space<vmem>>, vector<1x1x8x10xf32>
    %46 = vector.shape_cast %45 : vector<1x1x8x10xf32> to vector<8x10xf32>
    %47 = vector.shape_cast %44 : vector<8x10xf32> to vector<1x1x8x10xf32>
    tpu.vector_store %arg14[%c0_25, %c0_26, %c0_27, %c0_28], %47 {strides = array<i32>} : memref<1x4x8x10xf32, #tpu.memory_space<vmem>>, vector<1x1x8x10xf32>,
    %48 = arith.truncf %44 : vector<8x10xf32> to vector<8x10xbf16>
    %cst_29 = arith.constant dense<0.000000e+00> : vector<8x8xf32>
    %49 = tpu.matmul %48, %31, %cst_29 {dimension_numbers = #tpu.dot_dimension_numbers<[1], [0], [0], [1], [0, 0, 1, 1], [], []>} : vector<8x10xbf16>, vector<10x8xbf16>, vector<8x8xf32> -> vector<8x8xf32>
    %50 = arith.truncf %49 : vector<8x8xf32> to vector<8x8xbf16>
    %51 = vector.extract_strided_slice %25 {offsets = [0, 0], sizes = [8, 128], strides = [1, 1]} : vector<32x128xbf16> to vector<8x128xbf16>
    %cst_30 = arith.constant dense<0.000000e+00> : vector<8x128xf32>
    %52 = tpu.matmul %50, %51, %cst_30 {dimension_numbers = #tpu.dot_dimension_numbers<[1], [0], [0], [1], [0, 0, 1, 1], [], []>} : vector<8x8xbf16>, vector<8x128xbf16>, vector<8x128xf32> -> vector<8x128xf32>
    %53 = arith.addf %28, %52 : vector<8x128xf32>
    %54 = vector.extract_strided_slice %18 {offsets = [0, 8], sizes = [8, 8], strides = [1, 1]} : vector<8x32xbf16> to vector<8x8xbf16>
    %55 = vector.extract_strided_slice %20 {offsets = [0, 8], sizes = [10, 8], strides = [1, 1]} : vector<10x32xbf16> to vector<10x8xbf16>
    %56 = vector.extract_strided_slice %22 {offsets = [0, 8], sizes = [10, 8], strides = [1, 1]} : vector<10x32xbf16> to vector<10x8xbf16>
    %cst_31 = arith.constant dense<0.000000e+00> : vector<8x10xf32>
    %57 = tpu.matmul %54, %55, %cst_31 {dimension_numbers = #tpu.dot_dimension_numbers<[1], [1], [0], [0], [0, 0, 1, 0], [], []>} : vector<8x8xbf16>, vector<10x8xbf16>, vector<8x10xf32> -> vector<8x10xf32>
    %58 = vector.broadcast %24 : vector<1x10xf32> to vector<8x10xf32>
    %59 = arith.addf %57, %58 : vector<8x10xf32>
    %cst_32 = arith.constant dense<0xFF800000> : vector<8xf32>
    %60 = vector.multi_reduction <maximumf>, %59, %cst_32 [1] : vector<8x10xf32> to vector<8xf32>
    %61 = vector.shape_cast %60 : vector<8xf32> to vector<8x1xf32>
    %62 = vector.broadcast %61 : vector<8x1xf32> to vector<8x10xf32>
    %63 = arith.subf %59, %62 : vector<8x10xf32>
    %64 = math.exp %63 : vector<8x10xf32>
    %cst_33 = arith.constant dense<0.000000e+00> : vector<8xf32>
    %65 = vector.multi_reduction <add>, %64, %cst_33 [1] : vector<8x10xf32> to vector<8xf32>
    %66 = vector.shape_cast %65 : vector<8xf32> to vector<8x1xf32>
    %67 = tpu.reciprocal %66 : vector<8x1xf32> -> vector<8x1xf32>
    %68 = vector.broadcast %67 : vector<8x1xf32> to vector<8x10xf32>
    %69 = arith.mulf %64, %68 : vector<8x10xf32>
    %c0_34 = arith.constant 0 : index
    %c1 = arith.constant 1 : index
    %c0_35 = arith.constant 0 : index
    %c0_36 = arith.constant 0 : index
    %70 = vector.load %arg14[%c0_34, %c1, %c0_35, %c0_36] : memref<1x4x8x10xf32, #tpu.memory_space<vmem>>, vector<1x1x8x10xf32>
    %71 = vector.shape_cast %70 : vector<1x1x8x10xf32> to vector<8x10xf32>
    %72 = vector.shape_cast %69 : vector<8x10xf32> to vector<1x1x8x10xf32>
    tpu.vector_store %arg14[%c0_34, %c1, %c0_35, %c0_36], %72 {strides = array<i32>} : memref<1x4x8x10xf32, #tpu.memory_space<vmem>>, vector<1x1x8x10xf32>,
    %73 = arith.truncf %69 : vector<8x10xf32> to vector<8x10xbf16>
    %cst_37 = arith.constant dense<0.000000e+00> : vector<8x8xf32>
    %74 = tpu.matmul %73, %56, %cst_37 {dimension_numbers = #tpu.dot_dimension_numbers<[1], [0], [0], [1], [0, 0, 1, 1], [], []>} : vector<8x10xbf16>, vector<10x8xbf16>, vector<8x8xf32> -> vector<8x8xf32>
    %75 = arith.truncf %74 : vector<8x8xf32> to vector<8x8xbf16>
    %76 = vector.extract_strided_slice %25 {offsets = [8, 0], sizes = [8, 128], strides = [1, 1]} : vector<32x128xbf16> to vector<8x128xbf16>
    %cst_38 = arith.constant dense<0.000000e+00> : vector<8x128xf32>
    %77 = tpu.matmul %75, %76, %cst_38 {dimension_numbers = #tpu.dot_dimension_numbers<[1], [0], [0], [1], [0, 0, 1, 1], [], []>} : vector<8x8xbf16>, vector<8x128xbf16>, vector<8x128xf32> -> vector<8x128xf32>
    %78 = arith.addf %53, %77 : vector<8x128xf32>
    %79 = vector.extract_strided_slice %18 {offsets = [0, 16], sizes = [8, 8], strides = [1, 1]} : vector<8x32xbf16> to vector<8x8xbf16>
    %80 = vector.extract_strided_slice %20 {offsets = [0, 16], sizes = [10, 8], strides = [1, 1]} : vector<10x32xbf16> to vector<10x8xbf16>
    %81 = vector.extract_strided_slice %22 {offsets = [0, 16], sizes = [10, 8], strides = [1, 1]} : vector<10x32xbf16> to vector<10x8xbf16>
    %cst_39 = arith.constant dense<0.000000e+00> : vector<8x10xf32>
    %82 = tpu.matmul %79, %80, %cst_39 {dimension_numbers = #tpu.dot_dimension_numbers<[1], [1], [0], [0], [0, 0, 1, 0], [], []>} : vector<8x8xbf16>, vector<10x8xbf16>, vector<8x10xf32> -> vector<8x10xf32>
    %83 = vector.broadcast %24 : vector<1x10xf32> to vector<8x10xf32>
    %84 = arith.addf %82, %83 : vector<8x10xf32>
    %cst_40 = arith.constant dense<0xFF800000> : vector<8xf32>
    %85 = vector.multi_reduction <maximumf>, %84, %cst_40 [1] : vector<8x10xf32> to vector<8xf32>
    %86 = vector.shape_cast %85 : vector<8xf32> to vector<8x1xf32>
    %87 = vector.broadcast %86 : vector<8x1xf32> to vector<8x10xf32>
    %88 = arith.subf %84, %87 : vector<8x10xf32>
    %89 = math.exp %88 : vector<8x10xf32>
    %cst_41 = arith.constant dense<0.000000e+00> : vector<8xf32>
    %90 = vector.multi_reduction <add>, %89, %cst_41 [1] : vector<8x10xf32> to vector<8xf32>
    %91 = vector.shape_cast %90 : vector<8xf32> to vector<8x1xf32>
    %92 = tpu.reciprocal %91 : vector<8x1xf32> -> vector<8x1xf32>
    %93 = vector.broadcast %92 : vector<8x1xf32> to vector<8x10xf32>
    %94 = arith.mulf %89, %93 : vector<8x10xf32>
    %c0_42 = arith.constant 0 : index
    %c2 = arith.constant 2 : index
    %c0_43 = arith.constant 0 : index
    %c0_44 = arith.constant 0 : index
    %95 = vector.load %arg14[%c0_42, %c2, %c0_43, %c0_44] : memref<1x4x8x10xf32, #tpu.memory_space<vmem>>, vector<1x1x8x10xf32>
    %96 = vector.shape_cast %95 : vector<1x1x8x10xf32> to vector<8x10xf32>
    %97 = vector.shape_cast %94 : vector<8x10xf32> to vector<1x1x8x10xf32>
    tpu.vector_store %arg14[%c0_42, %c2, %c0_43, %c0_44], %97 {strides = array<i32>} : memref<1x4x8x10xf32, #tpu.memory_space<vmem>>, vector<1x1x8x10xf32>,
    %98 = arith.truncf %94 : vector<8x10xf32> to vector<8x10xbf16>
    %cst_45 = arith.constant dense<0.000000e+00> : vector<8x8xf32>
    %99 = tpu.matmul %98, %81, %cst_45 {dimension_numbers = #tpu.dot_dimension_numbers<[1], [0], [0], [1], [0, 0, 1, 1], [], []>} : vector<8x10xbf16>, vector<10x8xbf16>, vector<8x8xf32> -> vector<8x8xf32>
    %100 = arith.truncf %99 : vector<8x8xf32> to vector<8x8xbf16>
    %101 = vector.extract_strided_slice %25 {offsets = [16, 0], sizes = [8, 128], strides = [1, 1]} : vector<32x128xbf16> to vector<8x128xbf16>
    %cst_46 = arith.constant dense<0.000000e+00> : vector<8x128xf32>
    %102 = tpu.matmul %100, %101, %cst_46 {dimension_numbers = #tpu.dot_dimension_numbers<[1], [0], [0], [1], [0, 0, 1, 1], [], []>} : vector<8x8xbf16>, vector<8x128xbf16>, vector<8x128xf32> -> vector<8x128xf32>
    %103 = arith.addf %78, %102 : vector<8x128xf32>
    %104 = vector.extract_strided_slice %18 {offsets = [0, 24], sizes = [8, 8], strides = [1, 1]} : vector<8x32xbf16> to vector<8x8xbf16>
    %105 = vector.extract_strided_slice %20 {offsets = [0, 24], sizes = [10, 8], strides = [1, 1]} : vector<10x32xbf16> to vector<10x8xbf16>
    %106 = vector.extract_strided_slice %22 {offsets = [0, 24], sizes = [10, 8], strides = [1, 1]} : vector<10x32xbf16> to vector<10x8xbf16>
    %cst_47 = arith.constant dense<0.000000e+00> : vector<8x10xf32>
    %107 = tpu.matmul %104, %105, %cst_47 {dimension_numbers = #tpu.dot_dimension_numbers<[1], [1], [0], [0], [0, 0, 1, 0], [], []>} : vector<8x8xbf16>, vector<10x8xbf16>, vector<8x10xf32> -> vector<8x10xf32>
    %108 = vector.broadcast %24 : vector<1x10xf32> to vector<8x10xf32>
    %109 = arith.addf %107, %108 : vector<8x10xf32>
    %cst_48 = arith.constant dense<0xFF800000> : vector<8xf32>
    %110 = vector.multi_reduction <maximumf>, %109, %cst_48 [1] : vector<8x10xf32> to vector<8xf32>
    %111 = vector.shape_cast %110 : vector<8xf32> to vector<8x1xf32>
    %112 = vector.broadcast %111 : vector<8x1xf32> to vector<8x10xf32>
    %113 = arith.subf %109, %112 : vector<8x10xf32>
    %114 = math.exp %113 : vector<8x10xf32>
    %cst_49 = arith.constant dense<0.000000e+00> : vector<8xf32>
    %115 = vector.multi_reduction <add>, %114, %cst_49 [1] : vector<8x10xf32> to vector<8xf32>
    %116 = vector.shape_cast %115 : vector<8xf32> to vector<8x1xf32>
    %117 = tpu.reciprocal %116 : vector<8x1xf32> -> vector<8x1xf32>
    %118 = vector.broadcast %117 : vector<8x1xf32> to vector<8x10xf32>
    %119 = arith.mulf %114, %118 : vector<8x10xf32>
    %c0_50 = arith.constant 0 : index
    %c3 = arith.constant 3 : index
    %c0_51 = arith.constant 0 : index
    %c0_52 = arith.constant 0 : index
    %120 = vector.load %arg14[%c0_50, %c3, %c0_51, %c0_52] : memref<1x4x8x10xf32, #tpu.memory_space<vmem>>, vector<1x1x8x10xf32>
    %121 = vector.shape_cast %120 : vector<1x1x8x10xf32> to vector<8x10xf32>
    %122 = vector.shape_cast %119 : vector<8x10xf32> to vector<1x1x8x10xf32>
    tpu.vector_store %arg14[%c0_50, %c3, %c0_51, %c0_52], %122 {strides = array<i32>} : memref<1x4x8x10xf32, #tpu.memory_space<vmem>>, vector<1x1x8x10xf32>,
    %123 = arith.truncf %119 : vector<8x10xf32> to vector<8x10xbf16>
    %cst_53 = arith.constant dense<0.000000e+00> : vector<8x8xf32>
    %124 = tpu.matmul %123, %106, %cst_53 {dimension_numbers = #tpu.dot_dimension_numbers<[1], [0], [0], [1], [0, 0, 1, 1], [], []>} : vector<8x10xbf16>, vector<10x8xbf16>, vector<8x8xf32> -> vector<8x8xf32>
    %125 = arith.truncf %124 : vector<8x8xf32> to vector<8x8xbf16>
    %126 = vector.extract_strided_slice %25 {offsets = [24, 0], sizes = [8, 128], strides = [1, 1]} : vector<32x128xbf16> to vector<8x128xbf16>
    %cst_54 = arith.constant dense<0.000000e+00> : vector<8x128xf32>
    %127 = tpu.matmul %125, %126, %cst_54 {dimension_numbers = #tpu.dot_dimension_numbers<[1], [0], [0], [1], [0, 0, 1, 1], [], []>} : vector<8x8xbf16>, vector<8x128xbf16>, vector<8x128xf32> -> vector<8x128xf32>
    %128 = arith.addf %103, %127 : vector<8x128xf32>
    %cst_55 = arith.constant dense<0.000000e+00> : vector<8xf32>
    %129 = vector.multi_reduction <add>, %128, %cst_55 [1] : vector<8x128xf32> to vector<8xf32>
    %130 = vector.shape_cast %129 : vector<8xf32> to vector<8x1xf32>
    %cst_56 = arith.constant 3.125000e-02 : f32
    %131 = vector.broadcast %cst_56 : f32 to vector<8x1xf32>
    %132 = arith.mulf %130, %131 : vector<8x1xf32>
    %133 = arith.mulf %128, %128 : vector<8x128xf32>
    %cst_57 = arith.constant dense<0.000000e+00> : vector<8xf32>
    %134 = vector.multi_reduction <add>, %133, %cst_57 [1] : vector<8x128xf32> to vector<8xf32>
    %135 = vector.shape_cast %134 : vector<8xf32> to vector<8x1xf32>
    %cst_58 = arith.constant 3.125000e-02 : f32
    %136 = vector.broadcast %cst_58 : f32 to vector<8x1xf32>
    %137 = arith.mulf %135, %136 : vector<8x1xf32>
    %138 = arith.mulf %132, %132 : vector<8x1xf32>
    %139 = arith.subf %137, %138 : vector<8x1xf32>
    %140 = vector.broadcast %132 : vector<8x1xf32> to vector<8x128xf32>
    %141 = arith.subf %128, %140 : vector<8x128xf32>
    %cst_59 = arith.constant 9.99999997E-7 : f32
    %142 = vector.broadcast %cst_59 : f32 to vector<8x1xf32>
    %143 = arith.addf %139, %142 : vector<8x1xf32>
    %144 = math.rsqrt %143 : vector<8x1xf32>
    %145 = vector.broadcast %144 : vector<8x1xf32> to vector<8x128xf32>
    %146 = arith.mulf %141, %145 : vector<8x128xf32>
    %c0_60 = arith.constant 0 : index
    %c0_61 = arith.constant 0 : index
    %147 = vector.load %arg11[%c0_60, %c0_61] : memref<1x128xf32, #tpu.memory_space<vmem>>, vector<1x128xf32>
    %148 = vector.broadcast %147 : vector<1x128xf32> to vector<8x128xf32>
    %149 = arith.mulf %146, %148 : vector<8x128xf32>
    %c0_62 = arith.constant 0 : index
    %c0_63 = arith.constant 0 : index
    %150 = vector.load %arg12[%c0_62, %c0_63] : memref<1x128xf32, #tpu.memory_space<vmem>>, vector<1x128xf32>
    %151 = vector.broadcast %150 : vector<1x128xf32> to vector<8x128xf32>
    %152 = arith.addf %149, %151 : vector<8x128xf32>
    %c0_64 = arith.constant 0 : index
    %c0_65 = arith.constant 0 : index
    %c0_66 = arith.constant 0 : index
    %153 = vector.load %arg13[%c0_64, %c0_65, %c0_66] : memref<1x8x128xf32, #tpu.memory_space<vmem>>, vector<1x8x128xf32>
    %154 = vector.shape_cast %153 : vector<1x8x128xf32> to vector<8x128xf32>
    %155 = vector.shape_cast %152 : vector<8x128xf32> to vector<1x8x128xf32>
    tpu.vector_store %arg13[%c0_64, %c0_65, %c0_66], %155 {strides = array<i32>} : memref<1x8x128xf32, #tpu.memory_space<vmem>>, vector<1x8x128xf32>,
    return
  }
  func.func @transform_0(%arg0: i32, %arg1: i32) -> (i32, i32, i32) {
    %c0_i32 = arith.constant 0 : i32
    %c0_i32_0 = arith.constant 0 : i32
    return %arg0, %arg1, %c0_i32 : i32, i32, i32
  }
  func.func @transform_1(%arg0: i32, %arg1: i32) -> (i32, i32, i32) {
    %c0_i32 = arith.constant 0 : i32
    %c0_i32_0 = arith.constant 0 : i32
    %c0_i32_1 = arith.constant 0 : i32
    return %arg0, %c0_i32, %c0_i32_0 : i32, i32, i32
  }
  func.func @transform_2(%arg0: i32, %arg1: i32) -> (i32, i32, i32) {
    %c0_i32 = arith.constant 0 : i32
    %c0_i32_0 = arith.constant 0 : i32
    %c0_i32_1 = arith.constant 0 : i32
    return %arg0, %c0_i32, %c0_i32_0 : i32, i32, i32
  }
  func.func @transform_3(%arg0: i32, %arg1: i32) -> (i32, i32) {
    %c0_i32 = arith.constant 0 : i32
    %c0_i32_0 = arith.constant 0 : i32
    %c0_i32_1 = arith.constant 0 : i32
    return %c0_i32, %c0_i32_0 : i32, i32
  }
  func.func @transform_4(%arg0: i32, %arg1: i32) -> (i32, i32) {
    %c0_i32 = arith.constant 0 : i32
    %c0_i32_0 = arith.constant 0 : i32
    %c0_i32_1 = arith.constant 0 : i32
    return %c0_i32, %c0_i32_0 : i32, i32
  }
  func.func @transform_5(%arg0: i32, %arg1: i32) -> (i32, i32) {
    %c0_i32 = arith.constant 0 : i32
    %c0_i32_0 = arith.constant 0 : i32
    %c0_i32_1 = arith.constant 0 : i32
    return %c0_i32, %c0_i32_0 : i32, i32
  }
  func.func @transform_6(%arg0: i32, %arg1: i32) -> (i32, i32) {
    %c0_i32 = arith.constant 0 : i32
    %c0_i32_0 = arith.constant 0 : i32
    %c0_i32_1 = arith.constant 0 : i32
    return %c0_i32, %c0_i32_0 : i32, i32
  }
  func.func @transform_7(%arg0: i32, %arg1: i32) -> (i32, i32) {
    %c0_i32 = arith.constant 0 : i32
    %c0_i32_0 = arith.constant 0 : i32
    %c0_i32_1 = arith.constant 0 : i32
    return %c0_i32, %c0_i32_0 : i32, i32
  }
  func.func @transform_8(%arg0: i32, %arg1: i32) -> (i32, i32) {
    %c0_i32 = arith.constant 0 : i32
    %c0_i32_0 = arith.constant 0 : i32
    %c0_i32_1 = arith.constant 0 : i32
    return %c0_i32, %c0_i32_0 : i32, i32
  }
  func.func @transform_9(%arg0: i32, %arg1: i32) -> (i32, i32) {
    %c0_i32 = arith.constant 0 : i32
    %c0_i32_0 = arith.constant 0 : i32
    %c0_i32_1 = arith.constant 0 : i32
    return %c0_i32, %c0_i32_0 : i32, i32
  }
  func.func @transform_10(%arg0: i32, %arg1: i32) -> (i32, i32) {
    %c0_i32 = arith.constant 0 : i32
    %c0_i32_0 = arith.constant 0 : i32
    %c0_i32_1 = arith.constant 0 : i32
    return %c0_i32, %c0_i32_0 : i32, i32
  }
  func.func @transform_11(%arg0: i32, %arg1: i32) -> (i32, i32, i32) {
    %c0_i32 = arith.constant 0 : i32
    %c0_i32_0 = arith.constant 0 : i32
    return %arg0, %arg1, %c0_i32 : i32, i32, i32
  }
  func.func @transform_12(%arg0: i32, %arg1: i32) -> (i32, i32, i32, i32) {
    %c0_i32 = arith.constant 0 : i32
    %c0_i32_0 = arith.constant 0 : i32
    %c0_i32_1 = arith.constant 0 : i32
    return %arg0, %c0_i32, %arg1, %c0_i32_0 : i32, i32, i32, i32
  }
}

module attributes {stable_mosaic.version = 11 : i64} {
  func.func @_ffn_block_kernel(%arg0: i32, %arg1: i32, %arg2: memref<16x128xf32, #tpu.memory_space<vmem>>, %arg3: memref<128x128xbf16, #tpu.memory_space<vmem>>, %arg4: memref<1x128xf32, #tpu.memory_space<vmem>>, %arg5: memref<128x128xbf16, #tpu.memory_space<vmem>>, %arg6: memref<1x128xf32, #tpu.memory_space<vmem>>, %arg7: memref<1x128xf32, #tpu.memory_space<vmem>>, %arg8: memref<1x128xf32, #tpu.memory_space<vmem>>, %arg9: memref<16x128xf32, #tpu.memory_space<vmem>>, %arg10: memref<16x128xf32, #tpu.memory_space<vmem>>, %arg11: memref<16x128xbf16, #tpu.memory_space<vmem>>) attributes {dimension_semantics = [#tpu.dimension_semantics<parallel>, #tpu.dimension_semantics<arbitrary>], iteration_bounds = array<i64: 1, 1>, scalar_prefetch = 0 : i64, scratch_operands = 2 : i64, tpu.core_type = #tpu.core_type<tc>, window_params = [{transform_indices = @transform_0, window_bounds = array<i64: 16, 128>}, {transform_indices = @transform_1, window_bounds = array<i64: 128, 128>}, {transform_indices = @transform_2, window_bounds = array<i64: 1, 128>}, {transform_indices = @transform_3, window_bounds = array<i64: 128, 128>}, {pipeline_mode = #tpu.pipeline_mode<synchronous>, transform_indices = @transform_4, window_bounds = array<i64: 1, 128>}, {pipeline_mode = #tpu.pipeline_mode<synchronous>, transform_indices = @transform_5, window_bounds = array<i64: 1, 128>}, {pipeline_mode = #tpu.pipeline_mode<synchronous>, transform_indices = @transform_6, window_bounds = array<i64: 1, 128>}, {transform_indices = @transform_7, window_bounds = array<i64: 16, 128>}]} {
    %c0_i32 = arith.constant 0 : i32
    %0 = arith.cmpi eq, %arg1, %c0_i32 : i32
    %1 = arith.extui %0 : i1 to i32
    %c0_i32_0 = arith.constant 0 : i32
    %2 = arith.cmpi ne, %1, %c0_i32_0 : i32
    scf.if %2 {
      %c0_16 = arith.constant 0 : index
      %c0_17 = arith.constant 0 : index
      %20 = vector.load %arg2[%c0_16, %c0_17] : memref<16x128xf32, #tpu.memory_space<vmem>>, vector<16x128xf32>
      %cst_18 = arith.constant dense<0.000000e+00> : vector<16xf32>
      %21 = vector.multi_reduction <add>, %20, %cst_18 [1] : vector<16x128xf32> to vector<16xf32>
      %22 = vector.shape_cast %21 : vector<16xf32> to vector<16x1xf32>
      %cst_19 = arith.constant 3.125000e-02 : f32
      %23 = vector.broadcast %cst_19 : f32 to vector<16x1xf32>
      %24 = arith.mulf %22, %23 : vector<16x1xf32>
      %25 = arith.mulf %20, %20 : vector<16x128xf32>
      %cst_20 = arith.constant dense<0.000000e+00> : vector<16xf32>
      %26 = vector.multi_reduction <add>, %25, %cst_20 [1] : vector<16x128xf32> to vector<16xf32>
      %27 = vector.shape_cast %26 : vector<16xf32> to vector<16x1xf32>
      %cst_21 = arith.constant 3.125000e-02 : f32
      %28 = vector.broadcast %cst_21 : f32 to vector<16x1xf32>
      %29 = arith.mulf %27, %28 : vector<16x1xf32>
      %30 = arith.mulf %24, %24 : vector<16x1xf32>
      %31 = arith.subf %29, %30 : vector<16x1xf32>
      %32 = vector.broadcast %24 : vector<16x1xf32> to vector<16x128xf32>
      %33 = arith.subf %20, %32 : vector<16x128xf32>
      %cst_22 = arith.constant 9.99999997E-7 : f32
      %34 = vector.broadcast %cst_22 : f32 to vector<16x1xf32>
      %35 = arith.addf %31, %34 : vector<16x1xf32>
      %36 = math.rsqrt %35 : vector<16x1xf32>
      %37 = vector.broadcast %36 : vector<16x1xf32> to vector<16x128xf32>
      %38 = arith.mulf %33, %37 : vector<16x128xf32>
      %c0_23 = arith.constant 0 : index
      %c0_24 = arith.constant 0 : index
      %39 = vector.load %arg7[%c0_23, %c0_24] : memref<1x128xf32, #tpu.memory_space<vmem>>, vector<1x128xf32>
      %40 = vector.broadcast %39 : vector<1x128xf32> to vector<16x128xf32>
      %41 = arith.mulf %38, %40 : vector<16x128xf32>
      %c0_25 = arith.constant 0 : index
      %c0_26 = arith.constant 0 : index
      %42 = vector.load %arg8[%c0_25, %c0_26] : memref<1x128xf32, #tpu.memory_space<vmem>>, vector<1x128xf32>
      %43 = vector.broadcast %42 : vector<1x128xf32> to vector<16x128xf32>
      %44 = arith.addf %41, %43 : vector<16x128xf32>
      %45 = arith.truncf %44 : vector<16x128xf32> to vector<16x128xbf16>
      %c0_27 = arith.constant 0 : index
      %c0_28 = arith.constant 0 : index
      %46 = vector.load %arg11[%c0_27, %c0_28] : memref<16x128xbf16, #tpu.memory_space<vmem>>, vector<16x128xbf16>
      tpu.vector_store %arg11[%c0_27, %c0_28], %45 {strides = array<i32>} : memref<16x128xbf16, #tpu.memory_space<vmem>>, vector<16x128xbf16>,
      %cst_29 = arith.constant 0.000000e+00 : f32
      %47 = vector.broadcast %cst_29 : f32 to vector<16x128xf32>
      %c0_30 = arith.constant 0 : index
      %c0_31 = arith.constant 0 : index
      %48 = vector.load %arg10[%c0_30, %c0_31] : memref<16x128xf32, #tpu.memory_space<vmem>>, vector<16x128xf32>
      tpu.vector_store %arg10[%c0_30, %c0_31], %47 {strides = array<i32>} : memref<16x128xf32, #tpu.memory_space<vmem>>, vector<16x128xf32>,
    } else {
    }
    %c0 = arith.constant 0 : index
    %c0_1 = arith.constant 0 : index
    %3 = vector.load %arg11[%c0, %c0_1] : memref<16x128xbf16, #tpu.memory_space<vmem>>, vector<16x128xbf16>
    %c0_2 = arith.constant 0 : index
    %c0_3 = arith.constant 0 : index
    %4 = vector.load %arg3[%c0_2, %c0_3] : memref<128x128xbf16, #tpu.memory_space<vmem>>, vector<128x128xbf16>
    %cst = arith.constant dense<0.000000e+00> : vector<16x128xf32>
    %5 = tpu.matmul %3, %4, %cst {dimension_numbers = #tpu.dot_dimension_numbers<[1], [0], [0], [1], [0, 0, 1, 1], [], []>} : vector<16x128xbf16>, vector<128x128xbf16>, vector<16x128xf32> -> vector<16x128xf32>
    %c0_4 = arith.constant 0 : index
    %c0_5 = arith.constant 0 : index
    %6 = vector.load %arg4[%c0_4, %c0_5] : memref<1x128xf32, #tpu.memory_space<vmem>>, vector<1x128xf32>
    %7 = vector.broadcast %6 : vector<1x128xf32> to vector<16x128xf32>
    %8 = arith.addf %5, %7 : vector<16x128xf32>
    %cst_6 = arith.constant 0.000000e+00 : f32
    %9 = vector.broadcast %cst_6 : f32 to vector<16x128xf32>
    %10 = arith.maximumf %8, %9 : vector<16x128xf32>
    %c0_7 = arith.constant 0 : index
    %c0_8 = arith.constant 0 : index
    %11 = vector.load %arg10[%c0_7, %c0_8] : memref<16x128xf32, #tpu.memory_space<vmem>>, vector<16x128xf32>
    %12 = arith.truncf %10 : vector<16x128xf32> to vector<16x128xbf16>
    %c0_9 = arith.constant 0 : index
    %c0_10 = arith.constant 0 : index
    %13 = vector.load %arg5[%c0_9, %c0_10] : memref<128x128xbf16, #tpu.memory_space<vmem>>, vector<128x128xbf16>
    %cst_11 = arith.constant dense<0.000000e+00> : vector<16x128xf32>
    %14 = tpu.matmul %12, %13, %cst_11 {dimension_numbers = #tpu.dot_dimension_numbers<[1], [0], [0], [1], [0, 0, 1, 1], [], []>} : vector<16x128xbf16>, vector<128x128xbf16>, vector<16x128xf32> -> vector<16x128xf32>
    %15 = arith.addf %11, %14 : vector<16x128xf32>
    %c0_12 = arith.constant 0 : index
    %c0_13 = arith.constant 0 : index
    %16 = vector.load %arg10[%c0_12, %c0_13] : memref<16x128xf32, #tpu.memory_space<vmem>>, vector<16x128xf32>
    tpu.vector_store %arg10[%c0_12, %c0_13], %15 {strides = array<i32>} : memref<16x128xf32, #tpu.memory_space<vmem>>, vector<16x128xf32>,
    %c0_i32_14 = arith.constant 0 : i32
    %17 = arith.cmpi eq, %arg1, %c0_i32_14 : i32
    %18 = arith.extui %17 : i1 to i32
    %c0_i32_15 = arith.constant 0 : i32
    %19 = arith.cmpi ne, %18, %c0_i32_15 : i32
    scf.if %19 {
      %c0_16 = arith.constant 0 : index
      %c0_17 = arith.constant 0 : index
      %20 = vector.load %arg2[%c0_16, %c0_17] : memref<16x128xf32, #tpu.memory_space<vmem>>, vector<16x128xf32>
      %c0_18 = arith.constant 0 : index
      %c0_19 = arith.constant 0 : index
      %21 = vector.load %arg10[%c0_18, %c0_19] : memref<16x128xf32, #tpu.memory_space<vmem>>, vector<16x128xf32>
      %22 = arith.addf %20, %21 : vector<16x128xf32>
      %c0_20 = arith.constant 0 : index
      %c0_21 = arith.constant 0 : index
      %23 = vector.load %arg6[%c0_20, %c0_21] : memref<1x128xf32, #tpu.memory_space<vmem>>, vector<1x128xf32>
      %24 = vector.broadcast %23 : vector<1x128xf32> to vector<16x128xf32>
      %25 = arith.addf %22, %24 : vector<16x128xf32>
      %c0_22 = arith.constant 0 : index
      %c0_23 = arith.constant 0 : index
      %26 = vector.load %arg9[%c0_22, %c0_23] : memref<16x128xf32, #tpu.memory_space<vmem>>, vector<16x128xf32>
      tpu.vector_store %arg9[%c0_22, %c0_23], %25 {strides = array<i32>} : memref<16x128xf32, #tpu.memory_space<vmem>>, vector<16x128xf32>,
    } else {
    }
    return
  }
  func.func @transform_0(%arg0: i32, %arg1: i32) -> (i32, i32) {
    %c0_i32 = arith.constant 0 : i32
    %c0_i32_0 = arith.constant 0 : i32
    return %arg0, %c0_i32 : i32, i32
  }
  func.func @transform_1(%arg0: i32, %arg1: i32) -> (i32, i32) {
    %c0_i32 = arith.constant 0 : i32
    %c0_i32_0 = arith.constant 0 : i32
    return %c0_i32, %arg1 : i32, i32
  }
  func.func @transform_2(%arg0: i32, %arg1: i32) -> (i32, i32) {
    %c0_i32 = arith.constant 0 : i32
    %c0_i32_0 = arith.constant 0 : i32
    return %c0_i32, %arg1 : i32, i32
  }
  func.func @transform_3(%arg0: i32, %arg1: i32) -> (i32, i32) {
    %c0_i32 = arith.constant 0 : i32
    %c0_i32_0 = arith.constant 0 : i32
    return %arg1, %c0_i32 : i32, i32
  }
  func.func @transform_4(%arg0: i32, %arg1: i32) -> (i32, i32) {
    %c0_i32 = arith.constant 0 : i32
    %c0_i32_0 = arith.constant 0 : i32
    %c0_i32_1 = arith.constant 0 : i32
    return %c0_i32, %c0_i32_0 : i32, i32
  }
  func.func @transform_5(%arg0: i32, %arg1: i32) -> (i32, i32) {
    %c0_i32 = arith.constant 0 : i32
    %c0_i32_0 = arith.constant 0 : i32
    %c0_i32_1 = arith.constant 0 : i32
    return %c0_i32, %c0_i32_0 : i32, i32
  }
  func.func @transform_6(%arg0: i32, %arg1: i32) -> (i32, i32) {
    %c0_i32 = arith.constant 0 : i32
    %c0_i32_0 = arith.constant 0 : i32
    %c0_i32_1 = arith.constant 0 : i32
    return %c0_i32, %c0_i32_0 : i32, i32
  }
  func.func @transform_7(%arg0: i32, %arg1: i32) -> (i32, i32) {
    %c0_i32 = arith.constant 0 : i32
    %c0_i32_0 = arith.constant 0 : i32
    return %arg0, %c0_i32 : i32, i32
  }
}

module attributes {stable_mosaic.version = 11 : i64} {
  func.func @_ffn_block_kernel(%arg0: i32, %arg1: i32, %arg2: memref<16x128xf32, #tpu.memory_space<vmem>>, %arg3: memref<128x128xbf16, #tpu.memory_space<vmem>>, %arg4: memref<1x128xf32, #tpu.memory_space<vmem>>, %arg5: memref<128x128xbf16, #tpu.memory_space<vmem>>, %arg6: memref<1x128xf32, #tpu.memory_space<vmem>>, %arg7: memref<1x128xf32, #tpu.memory_space<vmem>>, %arg8: memref<1x128xf32, #tpu.memory_space<vmem>>, %arg9: memref<16x128xf32, #tpu.memory_space<vmem>>, %arg10: memref<16x128xf32, #tpu.memory_space<vmem>>, %arg11: memref<16x128xbf16, #tpu.memory_space<vmem>>) attributes {dimension_semantics = [#tpu.dimension_semantics<parallel>, #tpu.dimension_semantics<arbitrary>], iteration_bounds = array<i64: 1, 1>, scalar_prefetch = 0 : i64, scratch_operands = 2 : i64, tpu.core_type = #tpu.core_type<tc>, window_params = [{transform_indices = @transform_0, window_bounds = array<i64: 16, 128>}, {transform_indices = @transform_1, window_bounds = array<i64: 128, 128>}, {transform_indices = @transform_2, window_bounds = array<i64: 1, 128>}, {transform_indices = @transform_3, window_bounds = array<i64: 128, 128>}, {pipeline_mode = #tpu.pipeline_mode<synchronous>, transform_indices = @transform_4, window_bounds = array<i64: 1, 128>}, {pipeline_mode = #tpu.pipeline_mode<synchronous>, transform_indices = @transform_5, window_bounds = array<i64: 1, 128>}, {pipeline_mode = #tpu.pipeline_mode<synchronous>, transform_indices = @transform_6, window_bounds = array<i64: 1, 128>}, {transform_indices = @transform_7, window_bounds = array<i64: 16, 128>}]} {
    %c0_i32 = arith.constant 0 : i32
    %0 = arith.cmpi eq, %arg1, %c0_i32 : i32
    %1 = arith.extui %0 : i1 to i32
    %c0_i32_0 = arith.constant 0 : i32
    %2 = arith.cmpi ne, %1, %c0_i32_0 : i32
    scf.if %2 {
      %c0_16 = arith.constant 0 : index
      %c0_17 = arith.constant 0 : index
      %20 = vector.load %arg2[%c0_16, %c0_17] : memref<16x128xf32, #tpu.memory_space<vmem>>, vector<16x128xf32>
      %cst_18 = arith.constant dense<0.000000e+00> : vector<16xf32>
      %21 = vector.multi_reduction <add>, %20, %cst_18 [1] : vector<16x128xf32> to vector<16xf32>
      %22 = vector.shape_cast %21 : vector<16xf32> to vector<16x1xf32>
      %cst_19 = arith.constant 3.125000e-02 : f32
      %23 = vector.broadcast %cst_19 : f32 to vector<16x1xf32>
      %24 = arith.mulf %22, %23 : vector<16x1xf32>
      %25 = arith.mulf %20, %20 : vector<16x128xf32>
      %cst_20 = arith.constant dense<0.000000e+00> : vector<16xf32>
      %26 = vector.multi_reduction <add>, %25, %cst_20 [1] : vector<16x128xf32> to vector<16xf32>
      %27 = vector.shape_cast %26 : vector<16xf32> to vector<16x1xf32>
      %cst_21 = arith.constant 3.125000e-02 : f32
      %28 = vector.broadcast %cst_21 : f32 to vector<16x1xf32>
      %29 = arith.mulf %27, %28 : vector<16x1xf32>
      %30 = arith.mulf %24, %24 : vector<16x1xf32>
      %31 = arith.subf %29, %30 : vector<16x1xf32>
      %32 = vector.broadcast %24 : vector<16x1xf32> to vector<16x128xf32>
      %33 = arith.subf %20, %32 : vector<16x128xf32>
      %cst_22 = arith.constant 9.99999997E-7 : f32
      %34 = vector.broadcast %cst_22 : f32 to vector<16x1xf32>
      %35 = arith.addf %31, %34 : vector<16x1xf32>
      %36 = math.rsqrt %35 : vector<16x1xf32>
      %37 = vector.broadcast %36 : vector<16x1xf32> to vector<16x128xf32>
      %38 = arith.mulf %33, %37 : vector<16x128xf32>
      %c0_23 = arith.constant 0 : index
      %c0_24 = arith.constant 0 : index
      %39 = vector.load %arg7[%c0_23, %c0_24] : memref<1x128xf32, #tpu.memory_space<vmem>>, vector<1x128xf32>
      %40 = vector.broadcast %39 : vector<1x128xf32> to vector<16x128xf32>
      %41 = arith.mulf %38, %40 : vector<16x128xf32>
      %c0_25 = arith.constant 0 : index
      %c0_26 = arith.constant 0 : index
      %42 = vector.load %arg8[%c0_25, %c0_26] : memref<1x128xf32, #tpu.memory_space<vmem>>, vector<1x128xf32>
      %43 = vector.broadcast %42 : vector<1x128xf32> to vector<16x128xf32>
      %44 = arith.addf %41, %43 : vector<16x128xf32>
      %45 = arith.truncf %44 : vector<16x128xf32> to vector<16x128xbf16>
      %c0_27 = arith.constant 0 : index
      %c0_28 = arith.constant 0 : index
      %46 = vector.load %arg11[%c0_27, %c0_28] : memref<16x128xbf16, #tpu.memory_space<vmem>>, vector<16x128xbf16>
      tpu.vector_store %arg11[%c0_27, %c0_28], %45 {strides = array<i32>} : memref<16x128xbf16, #tpu.memory_space<vmem>>, vector<16x128xbf16>,
      %cst_29 = arith.constant 0.000000e+00 : f32
      %47 = vector.broadcast %cst_29 : f32 to vector<16x128xf32>
      %c0_30 = arith.constant 0 : index
      %c0_31 = arith.constant 0 : index
      %48 = vector.load %arg10[%c0_30, %c0_31] : memref<16x128xf32, #tpu.memory_space<vmem>>, vector<16x128xf32>
      tpu.vector_store %arg10[%c0_30, %c0_31], %47 {strides = array<i32>} : memref<16x128xf32, #tpu.memory_space<vmem>>, vector<16x128xf32>,
    } else {
    }
    %c0 = arith.constant 0 : index
    %c0_1 = arith.constant 0 : index
    %3 = vector.load %arg11[%c0, %c0_1] : memref<16x128xbf16, #tpu.memory_space<vmem>>, vector<16x128xbf16>
    %c0_2 = arith.constant 0 : index
    %c0_3 = arith.constant 0 : index
    %4 = vector.load %arg3[%c0_2, %c0_3] : memref<128x128xbf16, #tpu.memory_space<vmem>>, vector<128x128xbf16>
    %cst = arith.constant dense<0.000000e+00> : vector<16x128xf32>
    %5 = tpu.matmul %3, %4, %cst {dimension_numbers = #tpu.dot_dimension_numbers<[1], [0], [0], [1], [0, 0, 1, 1], [], []>} : vector<16x128xbf16>, vector<128x128xbf16>, vector<16x128xf32> -> vector<16x128xf32>
    %c0_4 = arith.constant 0 : index
    %c0_5 = arith.constant 0 : index
    %6 = vector.load %arg4[%c0_4, %c0_5] : memref<1x128xf32, #tpu.memory_space<vmem>>, vector<1x128xf32>
    %7 = vector.broadcast %6 : vector<1x128xf32> to vector<16x128xf32>
    %8 = arith.addf %5, %7 : vector<16x128xf32>
    %cst_6 = arith.constant 0.000000e+00 : f32
    %9 = vector.broadcast %cst_6 : f32 to vector<16x128xf32>
    %10 = arith.maximumf %8, %9 : vector<16x128xf32>
    %c0_7 = arith.constant 0 : index
    %c0_8 = arith.constant 0 : index
    %11 = vector.load %arg10[%c0_7, %c0_8] : memref<16x128xf32, #tpu.memory_space<vmem>>, vector<16x128xf32>
    %12 = arith.truncf %10 : vector<16x128xf32> to vector<16x128xbf16>
    %c0_9 = arith.constant 0 : index
    %c0_10 = arith.constant 0 : index
    %13 = vector.load %arg5[%c0_9, %c0_10] : memref<128x128xbf16, #tpu.memory_space<vmem>>, vector<128x128xbf16>
    %cst_11 = arith.constant dense<0.000000e+00> : vector<16x128xf32>
    %14 = tpu.matmul %12, %13, %cst_11 {dimension_numbers = #tpu.dot_dimension_numbers<[1], [0], [0], [1], [0, 0, 1, 1], [], []>} : vector<16x128xbf16>, vector<128x128xbf16>, vector<16x128xf32> -> vector<16x128xf32>
    %15 = arith.addf %11, %14 : vector<16x128xf32>
    %c0_12 = arith.constant 0 : index
    %c0_13 = arith.constant 0 : index
    %16 = vector.load %arg10[%c0_12, %c0_13] : memref<16x128xf32, #tpu.memory_space<vmem>>, vector<16x128xf32>
    tpu.vector_store %arg10[%c0_12, %c0_13], %15 {strides = array<i32>} : memref<16x128xf32, #tpu.memory_space<vmem>>, vector<16x128xf32>,
    %c0_i32_14 = arith.constant 0 : i32
    %17 = arith.cmpi eq, %arg1, %c0_i32_14 : i32
    %18 = arith.extui %17 : i1 to i32
    %c0_i32_15 = arith.constant 0 : i32
    %19 = arith.cmpi ne, %18, %c0_i32_15 : i32
    scf.if %19 {
      %c0_16 = arith.constant 0 : index
      %c0_17 = arith.constant 0 : index
      %20 = vector.load %arg2[%c0_16, %c0_17] : memref<16x128xf32, #tpu.memory_space<vmem>>, vector<16x128xf32>
      %c0_18 = arith.constant 0 : index
      %c0_19 = arith.constant 0 : index
      %21 = vector.load %arg10[%c0_18, %c0_19] : memref<16x128xf32, #tpu.memory_space<vmem>>, vector<16x128xf32>
      %22 = arith.addf %20, %21 : vector<16x128xf32>
      %c0_20 = arith.constant 0 : index
      %c0_21 = arith.constant 0 : index
      %23 = vector.load %arg6[%c0_20, %c0_21] : memref<1x128xf32, #tpu.memory_space<vmem>>, vector<1x128xf32>
      %24 = vector.broadcast %23 : vector<1x128xf32> to vector<16x128xf32>
      %25 = arith.addf %22, %24 : vector<16x128xf32>
      %c0_22 = arith.constant 0 : index
      %c0_23 = arith.constant 0 : index
      %26 = vector.load %arg9[%c0_22, %c0_23] : memref<16x128xf32, #tpu.memory_space<vmem>>, vector<16x128xf32>
      tpu.vector_store %arg9[%c0_22, %c0_23], %25 {strides = array<i32>} : memref<16x128xf32, #tpu.memory_space<vmem>>, vector<16x128xf32>,
    } else {
    }
    return
  }
  func.func @transform_0(%arg0: i32, %arg1: i32) -> (i32, i32) {
    %c0_i32 = arith.constant 0 : i32
    %c0_i32_0 = arith.constant 0 : i32
    return %arg0, %c0_i32 : i32, i32
  }
  func.func @transform_1(%arg0: i32, %arg1: i32) -> (i32, i32) {
    %c0_i32 = arith.constant 0 : i32
    %c0_i32_0 = arith.constant 0 : i32
    return %c0_i32, %arg1 : i32, i32
  }
  func.func @transform_2(%arg0: i32, %arg1: i32) -> (i32, i32) {
    %c0_i32 = arith.constant 0 : i32
    %c0_i32_0 = arith.constant 0 : i32
    return %c0_i32, %arg1 : i32, i32
  }
  func.func @transform_3(%arg0: i32, %arg1: i32) -> (i32, i32) {
    %c0_i32 = arith.constant 0 : i32
    %c0_i32_0 = arith.constant 0 : i32
    return %arg1, %c0_i32 : i32, i32
  }
  func.func @transform_4(%arg0: i32, %arg1: i32) -> (i32, i32) {
    %c0_i32 = arith.constant 0 : i32
    %c0_i32_0 = arith.constant 0 : i32
    %c0_i32_1 = arith.constant 0 : i32
    return %c0_i32, %c0_i32_0 : i32, i32
  }
  func.func @transform_5(%arg0: i32, %arg1: i32) -> (i32, i32) {
    %c0_i32 = arith.constant 0 : i32
    %c0_i32_0 = arith.constant 0 : i32
    %c0_i32_1 = arith.constant 0 : i32
    return %c0_i32, %c0_i32_0 : i32, i32
  }
  func.func @transform_6(%arg0: i32, %arg1: i32) -> (i32, i32) {
    %c0_i32 = arith.constant 0 : i32
    %c0_i32_0 = arith.constant 0 : i32
    %c0_i32_1 = arith.constant 0 : i32
    return %c0_i32, %c0_i32_0 : i32, i32
  }
  func.func @transform_7(%arg0: i32, %arg1: i32) -> (i32, i32) {
    %c0_i32 = arith.constant 0 : i32
    %c0_i32_0 = arith.constant 0 : i32
    return %arg0, %c0_i32 : i32, i32
  }
}

</mosaic_0001>

<bundles_post_ra>
// kernel: tpu_custom_call.1
= control target key start
LH: loop header
LB: loop body
LE: loop exit
PB: predicated region body
PF: predicated region fallthrough
CT: control target
= control target key end

     0   :  { %6 = vsyncpa [#allocation3], 0  ;;  %s448_s0 = inlined_call_operand.hbm [shape: f32[8,128], index: 0, kind: input, shape index: {}]   ;;  %s449_s1 = inlined_call_operand.hbm [shape: f32[16,128], index: 1, kind: output, shape index: {}]  }
   0x1   :  { %7 = vsyncpa [#allocation4], 0 }
   0x2   :  { %9 = vsyncpa [#allocation4 + $0x1], 0  ;;  %s348_s6 = smov 0   ;;  %s350_s7 = smov 0  }
   0x3   :  { %s352_s8 = smov 0   ;;  %s354_s9 = smov 0  }
   0x4 LB: > { %s369_s10 = sadd.s32 4294967295, %s334_s9   ;;  %s184_s11 = sadd.s32 4294967294, %s334_s9   ;;  %s334_s9 = sphi %s354_s9, %s457_s9   ;;  %s330_s8 = sphi %s352_s8, %s456_s8   ;;  %s326_s7 = sphi %s350_s7, %s455_s7   ;;  %s322_s6 = sphi %s348_s6, %s454_s6  }
   0x5   : > { %s373_s12 = sadd.s32 1, %s334_s9   ;;  %s43_s13 = sadd.s32 1, %s330_s8 }
   0x6   : > { %s40_s14 = ssub.s32 %s334_s9, %s373_s12  ;;  %p53_p0 = scmp.ne.s32.totalorder %s330_s8, %s326_s7 }
   0x7   : > { %p41_p1 = scmp.eq.s32.totalorder %s40_s14, 0  ;;  %p54_p2 = scmp.eq.s32.totalorder %s369_s10, 1 }
   0x8   : > { %p59_p3 = scmp.ne.s32.totalorder %s326_s7, %s322_s6  ;;  %p60_p4 = scmp.eq.s32.totalorder %s184_s11, 1 }
   0x9   : > { %s384_s15 = scalar_select %p41_p1, %s330_s8, %s43_s13  }
   0xa   : > { %p386_p5 = por %p54_p2, %p53_p0  ;;  %p390_p6 = por %p60_p4, %p59_p3 }
   0xb   : > { %p185_p7 = scmp.ge.s32.totalorder %s334_s9, 1  ;;  %p67_p8 = scmp.lt.s32.totalorder %s334_s9, 3 }
   0xc   : > { %s451_s17 = scalar_select %p390_p6, 1, 0 }
   0xd   : > { %p208_p9 = scmp.eq.s32.totalorder %s369_s10, 0  ;;  %p397_p10 = pnand %p185_p7, %p67_p8 }
   0xe   : > { %s336_s19 = smov [#allocation2]  }
   0xf   : > { %s80_s20 = sshll.u32 %s336_s19, 4  ;;  %p200_p11 = pneg %p397_p10  ;;  %s81_s20 = int_to_ptr.vmem [resolvable:$true] %s80_s20 }
  0x10   : > { %s255_s21 = scalar_lea.vmem %s81_s20, 128  ;;  %p263_p3 = scmp.lt.s32.totalorder %s81_s20, %s81_s20 }
  0x11   : > { %p201_p12 = pnand %p208_p9, %p200_p11  ;;  %p256_p0 = scmp.ne.s32.totalorder %s81_s20, %s255_s21 }
  0x12   : > { %p264_p4 = scmp.lt.s32.totalorder %s255_s21, %s255_s21 }
  0x13   : > { %p246_p13 = pneg %p201_p12 }
  0x14   : > { %p265_p6 = por %p264_p4, %p263_p3 }
  0x15   : > { %p258_p1 = pnand %p256_p0, %p246_p13 }
  0x17   : > { %p259_p2 = pneg %p258_p1 }
  0x19   : > { %p266_p7 = pnand %p265_p6, %p259_p2 }
  0x1b   : > { %269 = shalt.err (!%p266_p7)
}
  0x1c   : > { %203 = dma.hbm_to_vmem [thread:$0]  (!%p201_p12), %s448_s0, 128, %s81_s20, [#allocation3]  }
  0x1d   : > { %93 = sbr.rel (%p397_p10) target bundleno = 60 (0x3c), region = 24 }
  0x22   : > { %313 = dma.done.wait (%p208_p9), [#allocation3], 128  }
  0x23   : > { %315 = vsyncadd (%p208_p9), [#allocation3], 4294967168  ;;  %s105_s24 = sand.u32 1, %s326_s7   ;;  %s191_s28 = sshll.u32 %s369_s10, 7  ;;  %v108_v0 = vld [vmem:[#allocation2] sm:$0xff] }
  0x24   : > { %s189_s25 = sshll.u32 %s105_s24, 3  ;;  %v109_v1 = vadd.f32 1.0, %v108_v0  ;;  %s123_s2 = scalar_lea.hbm %s449_s1, %s191_s28 }
  0x25   : > { %s107_s26 = scalar_lea.vmem [#allocation5], %s189_s25  ;;  %s112_s3 = scalar_lea.sflag [#allocation4], %s105_s24 }
  0x26   : > { %s125_s27 = sshll.u32 %s107_s26, 4  ;;  %110 = vst [vmem:[%s107_s26] sm:$0xff] %v109_v1  ;;  %s337_s5 = smov [#allocation5]   ;;  %s126_s27 = int_to_ptr.vmem [resolvable:$true] %s125_s27 }
  0x27   : > { %s270_s4 = scalar_lea.vmem %s126_s27, 128  ;;  %s274_s11 = sshll.u32 %s337_s5, 4  ;;  %s275_s11 = int_to_ptr.vmem [resolvable:$false] %s274_s11 }
  0x28   : > { %p271_p6 = scmp.ne.s32.totalorder %s126_s27, %s270_s4  ;;  %s276_s13 = scalar_lea.vmem %s275_s11, 256 }
  0x29   : > { %p277_p10 = scmp.lt.s32.totalorder %s126_s27, %s275_s11  ;;  %p278_p11 = scmp.lt.s32.totalorder %s276_s13, %s270_s4 }
  0x2a   : > { %p272_p8 = pnand %p271_p6, %p386_p5 }
  0x2b   : > { %p279_p12 = por %p278_p11, %p277_p10 }
  0x2c   : > { %p273_p9 = pneg %p272_p8 }
  0x2e   : > { %p280_p13 = pnand %p279_p12, %p273_p9 }
  0x30   : > { %283 = shalt.err (!%p280_p13)
}
  0x31   : > { %s284_s10 = scalar_lea.hbm %s123_s2, 128  ;;  %s288_s19 = scalar_lea.hbm %s449_s1, 256 }
  0x32   : > { %p285_p0 = scmp.ne.s32.totalorder %s123_s2, %s284_s10  ;;  %p289_p3 = scmp.lt.s32.totalorder %s123_s2, %s449_s1 }
  0x33   : > { %p290_p4 = scmp.lt.s32.totalorder %s288_s19, %s284_s10 }
  0x34   : > { %p286_p1 = pnand %p285_p0, %p386_p5 }
  0x35   : > { %p291_p7 = por %p290_p4, %p289_p3 }
  0x36   : > { %p287_p2 = pneg %p286_p1 }
  0x38   : > { %p292_p6 = pnand %p291_p7, %p287_p2 }
  0x3a   : > { %295 = shalt.err (!%p292_p6)
}
  0x3b   : > { %198 = dma.vmem_to_hbm [thread:$0]  (%p386_p5), %s126_s27, 128, %s123_s2, %s112_s3  }
  0x3c PF: > { %p210_p8 = scmp.ge.s32.totalorder %s334_s9, 2  ;;  %s137_s22 = sand.u32 1, %s322_s6  }
  0x3d   : > { %p453_p9 = scmp.ne.s32.totalorder %s451_s17, 0  ;;  %s138_s23 = scalar_lea.sflag [#allocation4], %s137_s22 }
  0x3f   : > { %p205_p10 = pnand %p210_p8, %p453_p9 }
  0x41   : > { %p206_p11 = pneg %p205_p10 }
  0x43   : > { %317 = dma.done.wait (%p206_p11), %s138_s23, 128  }
  0x44   : > { %319 = vsyncadd (%p206_p11), %s138_s23, 4294967168  ;;  %p12_p12 = scmp.ge.s32.totalorder %s373_s12, 4   ;;  %s454_s6 = smov %s326_s7 }
  0x45   : > { %s455_s7 = smov %s330_s8  ;;  %s456_s8 = smov %s384_s15 }
  0x46   : > { %s457_s9 = smov %s373_s12  ;;  %14 = sbr.rel (!%p12_p12) target bundleno = 4 (0x4), region = 61 }
  0x4b   :  { %143 = vsyncpa [#allocation3], 1 }
  0x4c   :  { %145 = vsyncpa [#allocation3 + $0x1], 1 }
  0x4d   :  { %146 = vsyncpa [#allocation4], 1 }
  0x4e   :  { %148 = vsyncpa [#allocation4 + $0x1], 1 }

// kernel: decoder_forward.8
= control target key start
LH: loop header
LB: loop body
LE: loop exit
PB: predicated region body
PF: predicated region fallthrough
CT: control target
= control target key end

     0   :  { %v458_v5 = vmov 0.0   ;;  %vm459_vm0 = vmmov 0   ;;  %s604_s0 = inlined_call_operand.vmem [shape: f32[16,128], index: 0, kind: input, shape index: {}]   ;;  %s605_s1 = inlined_call_operand.vmem [shape: bf16[128,128], index: 1, kind: input, shape index: {}]   ;;  %s606_s3 = inlined_call_operand.vmem [shape: bf16[128,128], index: 3, kind: input, shape index: {}]   ;;  %s607_s5 = inlined_call_operand.vmem [shape: f32[1,128], index: 5, kind: input, shape index: {}]   ;;  %s608_s6 = inlined_call_operand.vmem [shape: f32[1,128], index: 6, kind: input, shape index: {}]   ;;  %s609_s2 = inlined_call_operand.vmem [shape: f32[1,128], index: 2, kind: input, shape index: {}]   ;;  %s610_s4 = inlined_call_operand.vmem [shape: f32[1,128], index: 4, kind: input, shape index: {}]   ;;  %s611_s7 = inlined_call_operand.vmem [shape: f32[16,128], index: 7, kind: output, shape index: {}]  }
   0x1   :  { %v503_v0 = vld [vmem:[%s604_s0] sm:$0xff]  ;;  %v508_v1 = vld [vmem:[%s604_s0 + $0x8] sm:$0xff]  ;;  %v437_v4 = vld [vmem:[%s605_s1 + $0x38] sm:$0xff]   ;;  %395 = vmatprep.subr.bf16.mxu0 %v458_v5  ;;  %415 = vmatprep.subr.bf16.mxu1 %v458_v5 }
   0x2   :  { %33 = vadd.xlane.f32.xlu0 %v503_v0  ;;  %v39_v2 = vmul.f32 %v503_v0, %v503_v0  ;;  %v40_v3 = vmul.f32 %v508_v1, %v508_v1  ;;  %396 = vmatpush3.bf16.msra.mxu0 %v437_v4  ;;  %v438_v6 = vld [vmem:[%s605_s1 + $0x30] sm:$0xff]   ;;  %v439_v7 = vld [vmem:[%s605_s1 + $0x28] sm:$0xff]   ;;  %v440_v8 = vld [vmem:[%s605_s1 + $0x20] sm:$0xff]  }
   0x3   :  { %397 = vmatprep.subr.bf16.mxu0 %v458_v5  ;;  %v441_v9 = vld [vmem:[%s605_s1 + $0x18] sm:$0xff]   ;;  %v442_v10 = vld [vmem:[%s605_s1 + $0x10] sm:$0xff]   ;;  %v443_v11 = vld [vmem:[%s605_s1 + $0x8] sm:$0xff]   ;;  %411 = vmatprep.mubr.msk.bf16.mxu0 %vm459_vm0, %v458_v5 }
   0x4   :  { %41 = vadd.xlane.f32.xlu1 %v39_v2  ;;  %431 = vmatprep.mubr.msk.bf16.mxu1 %vm459_vm0, %v458_v5  ;;  %v444_v12 = vld [vmem:[%s605_s1] sm:$0xff]   ;;  %v446_v13 = vld [vmem:[%s606_s3 + $0x38] sm:$0xff]   ;;  %v447_v14 = vld [vmem:[%s606_s3 + $0x30] sm:$0xff]  }
   0x5   :  { %416 = vmatpush3.bf16.msra.mxu1 %v446_v13  ;;  %v448_v15 = vld [vmem:[%s606_s3 + $0x28] sm:$0xff]   ;;  %v449_v16 = vld [vmem:[%s606_s3 + $0x20] sm:$0xff]   ;;  %v450_v17 = vld [vmem:[%s606_s3 + $0x18] sm:$0xff]  }
   0x6   :  { %35 = vadd.xlane.f32.xlu0 %v508_v1  ;;  %398 = vmatpush3.bf16.msra.mxu0 %v438_v6  ;;  %v347_v35 = vld [vmem:[%s607_s5] ss:$0 sm:$0xff]  ;;  %v451_v46 = vld [vmem:[%s606_s3 + $0x10] sm:$0xff]   ;;  %v452_v47 = vld [vmem:[%s606_s3 + $0x8] sm:$0xff]  }
   0x7   :  { %399 = vmatprep.subr.bf16.mxu0 %v458_v5  ;;  %417 = vmatprep.subr.bf16.mxu1 %v458_v5  ;;  %v348_v40 = vld [vmem:[%s608_s6] ss:$0 sm:$0xff] }
   0x8   :  { %43 = vadd.xlane.f32.xlu1 %v40_v3  ;;  %v453_v48 = vld [vmem:[%s606_s3] sm:$0xff]  }
   0x9   :  { %418 = vmatpush3.bf16.msra.mxu1 %v447_v14  ;;  %v351_v49 = vld [vmem:[%s609_s2] ss:$0 sm:$0xff] }
   0xa   :  { %400 = vmatpush3.bf16.msra.mxu0 %v439_v7  ;;  %419 = vmatprep.subr.bf16.mxu1 %v458_v5  ;;  %v369_v60 = vld [vmem:[%s610_s4] ss:$0 sm:$0xff] }
   0xb   :  { %401 = vmatprep.subr.bf16.mxu0 %v458_v5 }
   0xd   :  { %420 = vmatpush3.bf16.msra.mxu1 %v448_v15 }
   0xe   :  { %402 = vmatpush3.bf16.msra.mxu0 %v440_v8  ;;  %421 = vmatprep.subr.bf16.mxu1 %v458_v5 }
   0xf   :  { %403 = vmatprep.subr.bf16.mxu0 %v458_v5 }
  0x11   :  { %422 = vmatpush3.bf16.msra.mxu1 %v449_v16 }
  0x12   :  { %404 = vmatpush3.bf16.msra.mxu0 %v441_v9  ;;  %423 = vmatprep.subr.bf16.mxu1 %v458_v5 }
  0x13   :  { %405 = vmatprep.subr.bf16.mxu0 %v458_v5 }
  0x15   :  { %424 = vmatpush3.bf16.msra.mxu1 %v450_v17 }
  0x16   :  { %406 = vmatpush3.bf16.msra.mxu0 %v442_v10  ;;  %425 = vmatprep.subr.bf16.mxu1 %v458_v5 }
  0x17   :  { %407 = vmatprep.subr.bf16.mxu0 %v458_v5 }
  0x19   :  { %426 = vmatpush3.bf16.msra.mxu1 %v451_v46 }
  0x1a   :  { %408 = vmatpush3.bf16.msra.mxu0 %v443_v11  ;;  %427 = vmatprep.subr.bf16.mxu1 %v458_v5 }
  0x1b   :  { %409 = vmatprep.subr.bf16.mxu0 %v458_v5 }
  0x1d   :  { %428 = vmatpush3.bf16.msra.mxu1 %v452_v47 }
  0x1e   :  { %410 = vmatpush3.bf16.msra.mxu0 %v444_v12  ;;  %429 = vmatprep.subr.bf16.mxu1 %v458_v5 }
  0x21   :  { %430 = vmatpush3.bf16.msra.mxu1 %v453_v48 }
  0x8b   :  { %v34_v18 = vpop.xlane.xlu0 %33 }
  0x8c   :  { %v37_v19 = vmul.f32 0.03125, %v34_v18 }
  0x8d   :  { %v42_v20 = vpop.xlane.xlu1 %41 }
  0x8e   :  { %v47_v21 = vmul.f32 %v37_v19, %v37_v19  ;;  %v45_v22 = vmul.f32 0.03125, %v42_v20  ;;  %v51_v32 = vsub.f32 %v503_v0, %v37_v19 }
  0x8f   :  { %v36_v23 = vpop.xlane.xlu0 %35 }
  0x90   :  { %v49_v24 = vsub.f32 %v45_v22, %v47_v21  ;;  %v38_v25 = vmul.f32 0.03125, %v36_v23 }
  0x91   :  { %v44_v26 = vpop.xlane.xlu1 %43 }
  0x92   :  { %v53_v27 = vadd.f32 1e-06, %v49_v24  ;;  %v48_v28 = vmul.f32 %v38_v25, %v38_v25  ;;  %v46_v29 = vmul.f32 0.03125, %v44_v26  ;;  %v52_v36 = vsub.f32 %v508_v1, %v38_v25 }
  0x94   :  { %454 = vrsqrt.f32 %v53_v27  ;;  %v50_v30 = vsub.f32 %v46_v29, %v48_v28 }
  0x96   :  { %v54_v31 = vadd.f32 1e-06, %v50_v30 }
  0x98   :  { %456 = vrsqrt.f32 %v54_v31 }
  0xa1   :  { %v455_v33 = vpop.eup %454 }
  0xa2   :  { %v57_v34 = vmul.f32 %v455_v33, %v51_v32 }
  0xa4   :  { %v66_v38 = vmul.f32 %v347_v35, %v57_v34 }
  0xa5   :  { %v457_v37 = vpop.eup %456 }
  0xa6   :  { %v58_v39 = vmul.f32 %v457_v37, %v52_v36  ;;  %v75_v42 = vadd.f32 %v348_v40, %v66_v38 }
  0xa8   :  { %v67_v41 = vmul.f32 %v347_v35, %v58_v39 }
  0xaa   :  { %v76_v43 = vadd.f32 %v348_v40, %v67_v41 }
  0xac   :  { %v375_v44 = vpack.c.bf16 %v76_v43, %v75_v42 }
  0xae   :  { %376 = vst [vmem:[#allocation3] sm:$0xff] %v375_v44  }
  0xb5   :  { %v445_v45 = vld [vmem:[#allocation3] sm:$0xff]  }
  0xb6   :  { %412 = vmatmul.mubr.bf16.vlgmr.msra.gmra.mxu0 %v445_v45 }
 0x176   :  { %v202_v50 = vpop.f32.mrf.mxu0 }
 0x177   :  { %v203_v52 = vadd.f32 %v351_v49, %v202_v50 }
 0x178   :  { %v413_v51 = vpop.f32.mrf.mxu0 }
 0x179   :  { %v209_v56 = vmax.f32 %v203_v52, 0.0 }
 0x17a   :  { %v205_v53 = vpop.f32.mrf.mxu0 }
 0x17b   :  { %v206_v54 = vadd.f32 %v351_v49, %v205_v53 }
 0x17c   :  { %v414_v55 = vpop.f32.mrf.mxu0 }
 0x17d   :  { %v210_v57 = vmax.f32 %v206_v54, 0.0 }
 0x17f   :  { %v213_v58 = vpack.c.bf16 %v210_v57, %v209_v56 }
 0x181   :  { %432 = vmatmul.mubr.bf16.vlgmr.msra.gmra.mxu1 %v213_v58 }
 0x241   :  { %v312_v59 = vpop.f32.mrf.mxu1 }
 0x242   :  { %v330_v61 = vadd.f32 %v312_v59, %v503_v0 }
 0x243   :  { %v433_v62 = vpop.f32.mrf.mxu1 }
 0x244   :  { %v339_v63 = vadd.f32 %v369_v60, %v330_v61 }
 0x245   :  { %v315_v2 = vpop.f32.mrf.mxu1 }
 0x246   :  { %341 = vst [vmem:[%s611_s7] sm:$0xff] %v339_v63  ;;  %v331_v3 = vadd.f32 %v315_v2, %v508_v1 }
 0x247   :  { %v434_v4 = vpop.f32.mrf.mxu1 }
 0x248   :  { %v340_v5 = vadd.f32 %v369_v60, %v331_v3 }
 0x24a   :  { %342 = vst [vmem:[%s611_s7 + $0x8] sm:$0xff] %v340_v5 }

// kernel: decoder_forward.6
= control target key start
LH: loop header
LB: loop body
LE: loop exit
PB: predicated region body
PF: predicated region fallthrough
CT: control target
= control target key end

     0   :  { %s1745_s13 = smov 0   ;;  %s1747_s14 = smov 0   ;;  %s1986_s0 = inlined_call_operand.vmem [shape: f32[2,8,128], index: 0, kind: input, shape index: {}]   ;;  %s1987_s1 = inlined_call_operand.vmem [shape: f32[2,1,8], index: 1, kind: input, shape index: {}]   ;;  %s1988_s2 = inlined_call_operand.vmem [shape: bf16[128,32], index: 2, kind: input, shape index: {}]   ;;  %s1989_s3 = inlined_call_operand.vmem [shape: f32[1,32], index: 3, kind: input, shape index: {}]   ;;  %s1990_s4 = inlined_call_operand.vmem [shape: bf16[128,64], index: 4, kind: input, shape index: {}]   ;;  %s1991_s5 = inlined_call_operand.vmem [shape: f32[1,64], index: 5, kind: input, shape index: {}]   ;;  %s1992_s6 = inlined_call_operand.vmem [shape: bf16[32,128], index: 6, kind: input, shape index: {}]   ;;  %s1993_s7 = inlined_call_operand.vmem [shape: f32[1,128], index: 7, kind: input, shape index: {}]   ;;  %s1994_s8 = inlined_call_operand.vmem [shape: f32[1,128], index: 8, kind: input, shape index: {}]   ;;  %s1995_s9 = inlined_call_operand.vmem [shape: f32[1,128], index: 9, kind: input, shape index: {}]   ;;  %s1996_s10 = inlined_call_operand.vmem [shape: f32[2,8,128], index: 10, kind: output, shape index: {}]  }
   0x1   :  { %s1749_s15 = smov 0  }
   0x2 LB: > { %s32_s16 = sadd.s32 1, %s1675_s14  ;;  %p1397_p0 = scmp.ge.s32.totalorder %s1679_s15, 1  ;;  %s1679_s15 = sphi %s1749_s15, %s20_s15   ;;  %s1675_s14 = sphi %s1747_s14, %s1998_s14   ;;  %s1671_s13 = sphi %s1745_s13, %s1997_s13  }
   0x3   : > { %p34_p1 = scmp.ge.s32.totalorder %s32_s16, 2  ;;  %p333_p2 = scmp.lt.s32.totalorder %s1679_s15, 3 }
   0x5   : > { %s2000_s16 = smov (%p34_p1, %s32_s16), 0  ;;  %p334_p3 = pnand %p1397_p0, %p333_p2 }
   0x6   : > { %p375_p4 = scmp.lt.s32.totalorder (!%p334_p3), %s1671_s13, 1  ;;  %s1683_s26 = smov (!%p334_p3), 96  }
   0x7   : > { %337 = sbr.rel (%p334_p3) target bundleno = 2869 (0xb35), region = 60  ;;  %s1684_s27 = smov (!%p334_p3), 120  }
   0x8   : > { %s1685_s17 = smov (!%p334_p3), 88   ;;  %s1686_s18 = smov (!%p334_p3), 112  }
   0x9   : > { %s1687_s21 = smov (!%p334_p3), 80   ;;  %s1688_s22 = smov (!%p334_p3), 104  }
   0xa   : > { %s1689_s28 = smov (!%p334_p3), 72  }
   0xc   : > { %v1623_v0 = vld [vmem:[%s1990_s4 + $0x38] sm:$0xff]   ;;  %v1681_v1 = vmov 0.0   ;;  %v1625_v3 = vld [vmem:[%s1990_s4 + $0x30] sm:$0xff]   ;;  %vm1682_vm0 = vmmov 0   ;;  %v1627_v5 = vld [vmem:[%s1990_s4 + $0x28] sm:$0xff]   ;;  %s2002_s13 = smov (!%p375_p4, %s1671_s13), 1  ;;  %v622_v37 = vlaneseq }
   0xd   : > { %1498 = vmatprep.subr.bf16.mxu1 %v1681_v1  ;;  %1478 = vmatprep.subr.bf16.mxu0 %v1681_v1  ;;  %v1624_v2 = vld [vmem:[%s1988_s2 + $0x38] sm:$0xff]   ;;  %v1626_v4 = vld [vmem:[%s1988_s2 + $0x30] sm:$0xff]   ;;  %v1628_v6 = vld [vmem:[%s1988_s2 + $0x28] sm:$0xff]   ;;  %s1398_s25 = sshll.u32 %s2002_s13, 3  ;;  %vm649_vm1 = vcmask 64512   ;;  %vm714_vm2 = vcmask 1043456   ;;  %s381_s30 = scalar_lea.vmem %s1987_s1, %s2002_s13 }
   0xe   : > { %1499 = vmatpush3.bf16.msra.mxu1 %v1623_v0  ;;  %1514 = vmatprep.mubr.msk.bf16.mxu1 %vm1682_vm0, %v1681_v1  ;;  %v1629_v7 = vld [vmem:[%s1990_s4 + $0x20] sm:$0xff]   ;;  %v1631_v9 = vld [vmem:[%s1990_s4 + $0x18] sm:$0xff]   ;;  %v1633_v11 = vld [vmem:[%s1990_s4 + $0x10] sm:$0xff]   ;;  %s378_s12 = scalar_lea.vmem %s1986_s0, %s1398_s25  ;;  %v623_v38 = vshrl.u32 %v622_v37, 7  ;;  %v627_v39 = vand.u32 127, %v622_v37 }
   0xf   : > { %1479 = vmatpush3.bf16.msra.mxu0 %v1624_v2  ;;  %1500 = vmatprep.subr.bf16.mxu1 %v1681_v1  ;;  %v1630_v8 = vld [vmem:[%s1988_s2 + $0x20] sm:$0xff]   ;;  %v1632_v10 = vld [vmem:[%s1988_s2 + $0x18] sm:$0xff]   ;;  %v1634_v12 = vld [vmem:[%s1988_s2 + $0x10] sm:$0xff]  }
  0x10   : > { %1480 = vmatprep.subr.bf16.mxu0 %v1681_v1  ;;  %1494 = vmatprep.mubr.msk.bf16.mxu0 %vm1682_vm0, %v1681_v1  ;;  %v1635_v13 = vld [vmem:[%s1990_s4 + $0x8] sm:$0xff]   ;;  %v1637_v15 = vld [vmem:[%s1990_s4] sm:$0xff]   ;;  %vm628_vm3 = vcmp.gt.s32.totalorder %v627_v39, %v623_v38 }
  0x11   : > { %v1636_v14 = vld [vmem:[%s1988_s2 + $0x8] sm:$0xff]   ;;  %v1838_v16 = vld [vmem:[%s378_s12] sm:$0xff]  ;;  %v629_v41 = vsel %vm628_vm3, -1e+09, %v1681_v1 }
  0x12   : > { %1501 = vmatpush3.bf16.msra.mxu1 %v1625_v3  ;;  %v1638_v17 = vld [vmem:[%s1988_s2] sm:$0xff]   ;;  %v506_v18 = vpack.c.bf16 %v1838_v16, %v1838_v16 }
  0x13   : > { %1481 = vmatpush3.bf16.msra.mxu0 %v1626_v4  ;;  %1502 = vmatprep.subr.bf16.mxu1 %v1681_v1  ;;  %v1409_v19 = vld [vmem:[%s1991_s5] ss:$0 sm:$0xff] }
  0x14   : > { %1482 = vmatprep.subr.bf16.mxu0 %v1681_v1  ;;  %v1400_v20 = vld [vmem:[%s1989_s3] ss:$0 sm:$0xff] }
  0x15   : > { %v1418_v40 = vld [vmem:[%s381_s30] ss:$0 sm:$0xff] }
  0x16   : > { %1503 = vmatpush3.bf16.msra.mxu1 %v1627_v5  ;;  %v1880_v42 = vadd.f32 %v1418_v40, %v629_v41  ;;  %v637_v61 = vld [vmem:[%s1992_s6] sm:$0xf] }
  0x17   : > { %1483 = vmatpush3.bf16.msra.mxu0 %v1628_v6  ;;  %1504 = vmatprep.subr.bf16.mxu1 %v1681_v1  ;;  %v763_v62 = vsel %vm714_vm2, %v637_v61, 0 }
  0x18   : > { %1484 = vmatprep.subr.bf16.mxu0 %v1681_v1 }
  0x1a   : > { %1505 = vmatpush3.bf16.msra.mxu1 %v1629_v7 }
  0x1b   : > { %1485 = vmatpush3.bf16.msra.mxu0 %v1630_v8  ;;  %1506 = vmatprep.subr.bf16.mxu1 %v1681_v1 }
  0x1c   : > { %1486 = vmatprep.subr.bf16.mxu0 %v1681_v1 }
  0x1e   : > { %1507 = vmatpush3.bf16.msra.mxu1 %v1631_v9 }
  0x1f   : > { %1487 = vmatpush3.bf16.msra.mxu0 %v1632_v10  ;;  %1508 = vmatprep.subr.bf16.mxu1 %v1681_v1 }
  0x20   : > { %1488 = vmatprep.subr.bf16.mxu0 %v1681_v1 }
  0x22   : > { %1509 = vmatpush3.bf16.msra.mxu1 %v1633_v11 }
  0x23   : > { %1489 = vmatpush3.bf16.msra.mxu0 %v1634_v12  ;;  %1510 = vmatprep.subr.bf16.mxu1 %v1681_v1 }
  0x24   : > { %1490 = vmatprep.subr.bf16.mxu0 %v1681_v1 }
  0x26   : > { %1511 = vmatpush3.bf16.msra.mxu1 %v1635_v13 }
  0x27   : > { %1491 = vmatpush3.bf16.msra.mxu0 %v1636_v14  ;;  %1512 = vmatprep.subr.bf16.mxu1 %v1681_v1 }
  0x28   : > { %1492 = vmatprep.subr.bf16.mxu0 %v1681_v1 }
  0x2a   : > { %1513 = vmatpush3.bf16.msra.mxu1 %v1637_v15 }
  0x2b   : > { %1493 = vmatpush3.bf16.msra.mxu0 %v1638_v17  ;;  %1524 = vmatprep.subr.bf16.mxu1 %v1681_v1 }
  0x2c   : > { %1518 = vmatprep.subr.bf16.mxu0 %v1681_v1 }
  0x2d   : > { %1515 = vmatmul.mubr.bf16.vlgmr.msra.gmra.mxu1 %v506_v18 }
  0x2e   : > { %1495 = vmatmul.mubr.bf16.vlgmr.msra.gmra.mxu0 %v506_v18  ;;  %1526 = vmatprep.mubr.msk.bf16.mxu1 %vm1682_vm0, %v1681_v1 }
  0x2f   : > { %1520 = vmatprep.mubr.msk.bf16.mxu0 %vm1682_vm0, %v1681_v1 }
  0xed   : > { %v612_v21 = vpop.f32.mrf.mxu1 }
  0xee   : > { %v613_v22 = vadd.f32 %v1409_v19, %v612_v21  ;;  %v500_v23 = vpop.f32.mrf.mxu0 }
  0xef   : > { %v501_v24 = vadd.f32 %v1400_v20, %v500_v23  ;;  %v1516_v25 = vpop.f32.mrf.mxu1 }
  0xf0   : > { %v1859_v26 = vpack.c.bf16 %v613_v22, %v613_v22  ;;  %v1496_v27 = vpop.f32.mrf.mxu0 }
  0xf1   : > { %v615_v28 = vpop.f32.mrf.mxu1  ;;  %v618_v29 = vmul.f32 0.35355338, %v501_v24 }
  0xf2   : > { %709 = vrot.lane.b32.xlu1 %v1859_v26, %s1683_s26  ;;  %v503_v30 = vpop.f32.mrf.mxu0  ;;  %v654_v31 = vsel %vm649_vm1, %v1859_v26, 0 }
  0xf3   : > { %v1517_v32 = vpop.f32.mrf.mxu1  ;;  %1519 = vmatpush3.bf16.xpose.msra.mxu0 %v654_v31  ;;  %v1865_v34 = vpack.c.bf16 %v618_v29, %v618_v29  ;;  %v638_v31 = vld [vmem:[%s1992_s6 + $0x4] sm:$0xf] }
  0xf4   : > { %v1497_v33 = vpop.f32.mrf.mxu0  ;;  %1530 = vmatprep.subr.bf16.mxu0 %v1681_v1  ;;  %v922_v32 = vsel %vm714_vm2, %v638_v31, 0 }
  0xf6   : > { %809 = vrot.lane.b32.xlu1 %v1859_v26, %s1684_s27 }
  0xfa   : > { %1521 = vmatmul.mubr.msk.bf16.vlgmr.msra.gmra.mxu0 %vm649_vm1, %v1865_v34 }
  0xfb   : > { %1532 = vmatprep.mubr.msk.bf16.mxu0 %vm1682_vm0, %v1681_v1  ;;  %1531 = vmatpush3.bf16.msra.mxu0 %v763_v62 }
  0xfc   : > { %1542 = vmatprep.subr.bf16.mxu0 %v1681_v1 }
 0x164   : > { %v710_v35 = vpop.permute.xlu1 %709 }
 0x165   : > { %v716_v36 = vsel %vm714_vm2, %v710_v35, 0 }
 0x166   : > { %1525 = vmatpush3.bf16.msra.mxu1 %v716_v36 }
 0x167   : > { %1536 = vmatprep.subr.bf16.mxu1 %v1681_v1 }
 0x168   : > { %v810_v57 = vpop.permute.xlu1 %809 }
 0x169   : > { %v815_v59 = vsel %vm649_vm1, %v810_v57, 0 }
 0x1ba   : > { %v690_v43 = vpop.f32.mrf.mxu0 }
 0x1bb   : > { %v691_v44 = vadd.f32 %v690_v43, %v1880_v42 }
 0x1bc   : > { %v1522_v45 = vpop.f32.mrf.mxu0 }
 0x1bd   : > { %v696_v46 = vsel %vm649_vm1, %v691_v44, -inf }
 0x1be   : > { %697 = vmax.xlane.f32.xlu0 %v696_v46  ;;  %v693_v47 = vpop.f32.mrf.mxu0 }
 0x1c0   : > { %v1523_v48 = vpop.f32.mrf.mxu0 }
 0x247   : > { %v698_v49 = vpop.xlane.xlu0 %697 }
 0x248   : > { %v699_v50 = vsub.f32 %v691_v44, %v698_v49 }
 0x24a   : > { %v700_v51 = vmul.f32 1.442695, %v699_v50 }
 0x24c   : > { %1639 = vpow2.f32 %v700_v51 }
 0x259   : > { %v1640_v52 = vpop.eup %1639 }
 0x25a   : > { %v702_v53 = vsel %vm649_vm1, %v1640_v52, 0.0 }
 0x25b   : > { %703 = vadd.xlane.f32.xlu0 %v702_v53  ;;  %v1419_v53 = vld [vmem:[%s1993_s7] ss:$0 sm:$0xff] }
 0x271   : > { %807 = vrot.lane.b32.xlu0 %v1865_v34, %s1684_s27 }
 0x2e4   : > { %v704_v54 = vpop.xlane.xlu0 %703 }
 0x2e5   : > { %1641 = vrcp.f32 %v704_v54 }
 0x2e8   : > { %v808_v60 = vpop.permute.xlu0 %807 }
 0x2f2   : > { %v1642_v55 = vpop.eup %1641 }
 0x2f3   : > { %v706_v56 = vmul.f32 %v1642_v55, %v1640_v52 }
 0x2f5   : > { %v707_v58 = vpack.c.bf16 %v706_v56, %v706_v56 }
 0x2f7   : > { %1527 = vmatmul.mubr.msk.bf16.vlgmr.msra.gmra.mxu1 %vm649_vm1, %v707_v58 }
 0x2f8   : > { %1537 = vmatpush3.bf16.xpose.msra.mxu1 %v815_v59  ;;  %1538 = vmatprep.mubr.msk.bf16.mxu1 %vm1682_vm0, %v1681_v1 }
 0x2f9   : > { %1548 = vmatprep.subr.bf16.mxu1 %v1681_v1 }
 0x2ff   : > { %1539 = vmatmul.mubr.msk.bf16.vlgmr.msra.gmra.mxu1 %vm649_vm1, %v808_v60 }
 0x300   : > { %1550 = vmatprep.mubr.msk.bf16.mxu1 %vm1682_vm0, %v1681_v1  ;;  %1549 = vmatpush3.bf16.msra.mxu1 %v922_v32 }
 0x301   : > { %1560 = vmatprep.subr.bf16.mxu1 %v1681_v1 }
 0x3b7   : > { %v752_v63 = vpop.f32.mrf.mxu1 }
 0x3b8   : > { %v758_v0 = vpack.c.bf16 %v752_v63, %v752_v63 }
 0x3b9   : > { %v1528_v2 = vpop.f32.mrf.mxu1 }
 0x3ba   : > { %1533 = vmatmul.mubr.msk.bf16.vlgmr.msra.gmra.mxu0 %vm649_vm1, %v758_v0 }
 0x3bb   : > { %v755_v3 = vpop.f32.mrf.mxu1  ;;  %1544 = vmatprep.mubr.msk.bf16.mxu0 %vm1682_vm0, %v1681_v1 }
 0x3bc   : > { %v639_v3 = vld [vmem:[%s1992_s6 + $0x8] sm:$0xf] }
 0x3bd   : > { %v1529_v4 = vpop.f32.mrf.mxu1 }
 0x3be   : > { %v1080_v4 = vsel %vm714_vm2, %v639_v3, 0 }
 0x3bf   : > { %v851_v5 = vpop.f32.mrf.mxu1 }
 0x3c0   : > { %v852_v6 = vadd.f32 %v851_v5, %v1880_v42 }
 0x3c1   : > { %v1540_v7 = vpop.f32.mrf.mxu1 }
 0x3c2   : > { %v857_v8 = vsel %vm649_vm1, %v852_v6, -inf }
 0x3c3   : > { %858 = vmax.xlane.f32.xlu1 %v857_v8  ;;  %v854_v9 = vpop.f32.mrf.mxu1 }
 0x3c5   : > { %v1541_v10 = vpop.f32.mrf.mxu1 }
 0x3d4   : > { %869 = vrot.lane.b32.xlu1 %v1859_v26, %s1685_s17 }
 0x3d8   : > { %965 = vrot.lane.b32.xlu1 %v1865_v34, %s1686_s18 }
 0x44c   : > { %v859_v11 = vpop.xlane.xlu1 %858 }
 0x44d   : > { %v860_v12 = vsub.f32 %v852_v6, %v859_v11 }
 0x44f   : > { %v861_v13 = vmul.f32 1.442695, %v860_v12 }
 0x450   : > { %v870_v14 = vpop.permute.xlu1 %869 }
 0x451   : > { %1643 = vpow2.f32 %v861_v13  ;;  %v875_v15 = vsel %vm714_vm2, %v870_v14, 0 }
 0x452   : > { %1543 = vmatpush3.bf16.msra.mxu0 %v875_v15 }
 0x453   : > { %1554 = vmatprep.subr.bf16.mxu0 %v1681_v1 }
 0x454   : > { %v966_v30 = vpop.permute.xlu1 %965 }
 0x45e   : > { %v1644_v17 = vpop.eup %1643 }
 0x45f   : > { %v863_v18 = vsel %vm649_vm1, %v1644_v17, 0.0 }
 0x460   : > { %864 = vadd.xlane.f32.xlu0 %v863_v18 }
 0x476   : > { %967 = vrot.lane.b32.xlu0 %v1859_v26, %s1686_s18 }
 0x47a   : > { %v799_v19 = vpop.f32.mrf.mxu0 }
 0x47c   : > { %v1534_v20 = vpop.f32.mrf.mxu0 }
 0x47e   : > { %v802_v21 = vpop.f32.mrf.mxu0 }
 0x480   : > { %v1535_v22 = vpop.f32.mrf.mxu0 }
 0x4e9   : > { %v865_v23 = vpop.xlane.xlu0 %864 }
 0x4ea   : > { %1645 = vrcp.f32 %v865_v23 }
 0x4ed   : > { %v968_v27 = vpop.permute.xlu0 %967 }
 0x4ee   : > { %v973_v29 = vsel %vm649_vm1, %v968_v27, 0 }
 0x4f7   : > { %v1646_v24 = vpop.eup %1645 }
 0x4f8   : > { %v867_v25 = vmul.f32 %v1646_v24, %v1644_v17 }
 0x4fa   : > { %v868_v28 = vpack.c.bf16 %v867_v25, %v867_v25  ;;  %v640_v25 = vld [vmem:[%s1992_s6 + $0xc] sm:$0xf] }
 0x4fc   : > { %1545 = vmatmul.mubr.msk.bf16.vlgmr.msra.gmra.mxu0 %vm649_vm1, %v868_v28 }
 0x4fd   : > { %1555 = vmatpush3.bf16.xpose.msra.mxu0 %v973_v29  ;;  %1556 = vmatprep.mubr.msk.bf16.mxu0 %vm1682_vm0, %v1681_v1 }
 0x4fe   : > { %1566 = vmatprep.subr.bf16.mxu0 %v1681_v1 }
 0x504   : > { %1557 = vmatmul.mubr.msk.bf16.vlgmr.msra.gmra.mxu0 %vm649_vm1, %v966_v30 }
 0x505   : > { %1568 = vmatprep.mubr.msk.bf16.mxu0 %vm1682_vm0, %v1681_v1  ;;  %1567 = vmatpush3.bf16.msra.mxu0 %v1080_v4 }
 0x506   : > { %1578 = vmatprep.subr.bf16.mxu0 %v1681_v1 }
 0x5bc   : > { %v911_v33 = vpop.f32.mrf.mxu0 }
 0x5bd   : > { %v917_v35 = vpack.c.bf16 %v911_v33, %v911_v33 }
 0x5be   : > { %v1546_v36 = vpop.f32.mrf.mxu0 }
 0x5bf   : > { %1551 = vmatmul.mubr.msk.bf16.vlgmr.msra.gmra.mxu1 %vm649_vm1, %v917_v35 }
 0x5c0   : > { %v914_v37 = vpop.f32.mrf.mxu0  ;;  %1562 = vmatprep.mubr.msk.bf16.mxu1 %vm1682_vm0, %v1681_v1 }
 0x5c2   : > { %v1547_v38 = vpop.f32.mrf.mxu0 }
 0x5c4   : > { %v1009_v39 = vpop.f32.mrf.mxu0 }
 0x5c5   : > { %v1010_v40 = vadd.f32 %v1009_v39, %v1880_v42 }
 0x5c6   : > { %v1558_v41 = vpop.f32.mrf.mxu0 }
 0x5c7   : > { %v1015_v43 = vsel %vm649_vm1, %v1010_v40, -inf }
 0x5c8   : > { %1016 = vmax.xlane.f32.xlu1 %v1015_v43  ;;  %v1012_v44 = vpop.f32.mrf.mxu0 }
 0x5ca   : > { %v1559_v45 = vpop.f32.mrf.mxu0 }
 0x5d9   : > { %1027 = vrot.lane.b32.xlu1 %v1859_v26, %s1687_s21  ;;  %s388_s21 = scalar_lea.vmem %s1996_s10, %s1398_s25 }
 0x5dd   : > { %1123 = vrot.lane.b32.xlu1 %v1865_v34, %s1688_s22  ;;  %v648_v34 = vadd.f32 %v1419_v53, %v1838_v16 }
 0x5df   : > { %v805_v54 = vadd.f32 %v799_v19, %v648_v34 }
 0x651   : > { %v1017_v46 = vpop.xlane.xlu1 %1016 }
 0x652   : > { %v1018_v47 = vsub.f32 %v1010_v40, %v1017_v46 }
 0x654   : > { %v1019_v48 = vmul.f32 1.442695, %v1018_v47 }
 0x655   : > { %v1028_v49 = vpop.permute.xlu1 %1027 }
 0x656   : > { %1647 = vpow2.f32 %v1019_v48  ;;  %v1033_v50 = vsel %vm714_vm2, %v1028_v49, 0 }
 0x657   : > { %1561 = vmatpush3.bf16.msra.mxu1 %v1033_v50 }
 0x658   : > { %1572 = vmatprep.subr.bf16.mxu1 %v1681_v1 }
 0x659   : > { %v1124_v16 = vpop.permute.xlu1 %1123 }
 0x663   : > { %v1648_v51 = vpop.eup %1647 }
 0x664   : > { %v1021_v52 = vsel %vm649_vm1, %v1648_v51, 0.0 }
 0x665   : > { %1022 = vadd.xlane.f32.xlu0 %v1021_v52 }
 0x67b   : > { %1125 = vrot.lane.b32.xlu0 %v1859_v26, %s1688_s22 }
 0x67f   : > { %v958_v55 = vpop.f32.mrf.mxu1 }
 0x680   : > { %v964_v56 = vadd.f32 %v958_v55, %v805_v54  ;;  %v1432_v54 = vld [vmem:[%s1994_s8] ss:$0 sm:$0xff] }
 0x681   : > { %v1552_v57 = vpop.f32.mrf.mxu1 }
 0x683   : > { %v961_v58 = vpop.f32.mrf.mxu1 }
 0x685   : > { %v1553_v59 = vpop.f32.mrf.mxu1 }
 0x6ee   : > { %v1023_v60 = vpop.xlane.xlu0 %1022 }
 0x6ef   : > { %1649 = vrcp.f32 %v1023_v60 }
 0x6f2   : > { %v1126_v63 = vpop.permute.xlu0 %1125 }
 0x6f3   : > { %v1131_v2 = vsel %vm649_vm1, %v1126_v63, 0 }
 0x6fc   : > { %v1650_v61 = vpop.eup %1649 }
 0x6fd   : > { %v1025_v62 = vmul.f32 %v1650_v61, %v1648_v51 }
 0x6ff   : > { %v1026_v0 = vpack.c.bf16 %v1025_v62, %v1025_v62 }
 0x701   : > { %1563 = vmatmul.mubr.msk.bf16.vlgmr.msra.gmra.mxu1 %vm649_vm1, %v1026_v0 }
 0x702   : > { %1573 = vmatpush3.bf16.xpose.msra.mxu1 %v1131_v2  ;;  %1574 = vmatprep.mubr.msk.bf16.mxu1 %vm1682_vm0, %v1681_v1 }
 0x703   : > { %1584 = vmatprep.subr.bf16.mxu1 %v1681_v1 }
 0x709   : > { %1575 = vmatmul.mubr.msk.bf16.vlgmr.msra.gmra.mxu1 %vm649_vm1, %v1124_v16 }
 0x70a   : > { %1586 = vmatprep.mubr.msk.bf16.mxu1 %vm1682_vm0, %v1681_v1 }
 0x7c1   : > { %v1069_v5 = vpop.f32.mrf.mxu1 }
 0x7c2   : > { %v1075_v6 = vpack.c.bf16 %v1069_v5, %v1069_v5 }
 0x7c3   : > { %v1564_v7 = vpop.f32.mrf.mxu1 }
 0x7c4   : > { %1569 = vmatmul.mubr.msk.bf16.vlgmr.msra.gmra.mxu0 %vm649_vm1, %v1075_v6 }
 0x7c5   : > { %v1072_v8 = vpop.f32.mrf.mxu1  ;;  %1580 = vmatprep.mubr.msk.bf16.mxu0 %vm1682_vm0, %v1681_v1 }
 0x7c7   : > { %v1565_v9 = vpop.f32.mrf.mxu1 }
 0x7c9   : > { %v1167_v10 = vpop.f32.mrf.mxu1 }
 0x7ca   : > { %v1168_v11 = vadd.f32 %v1167_v10, %v1880_v42 }
 0x7cb   : > { %v1576_v12 = vpop.f32.mrf.mxu1 }
 0x7cc   : > { %v1173_v13 = vsel %vm649_vm1, %v1168_v11, -inf }
 0x7cd   : > { %1174 = vmax.xlane.f32.xlu1 %v1173_v13  ;;  %v1170_v14 = vpop.f32.mrf.mxu1 }
 0x7cf   : > { %v1577_v15 = vpop.f32.mrf.mxu1 }
 0x7de   : > { %1185 = vrot.lane.b32.xlu1 %v1859_v26, %s1689_s28  ;;  %v1238_v26 = vsel %vm714_vm2, %v640_v25, 0 }
 0x7df   : > { %1585 = vmatpush3.bf16.msra.mxu1 %v1238_v26 }
 0x856   : > { %v1175_v17 = vpop.xlane.xlu1 %1174 }
 0x857   : > { %v1176_v18 = vsub.f32 %v1168_v11, %v1175_v17 }
 0x859   : > { %v1177_v19 = vmul.f32 1.442695, %v1176_v18 }
 0x85a   : > { %v1186_v20 = vpop.permute.xlu1 %1185 }
 0x85b   : > { %1651 = vpow2.f32 %v1177_v19  ;;  %v1191_v1 = vsel %vm714_vm2, %v1186_v20, 0 }
 0x85c   : > { %1579 = vmatpush3.bf16.msra.mxu0 %v1191_v1 }
 0x868   : > { %v1652_v21 = vpop.eup %1651 }
 0x869   : > { %v1179_v42 = vsel %vm649_vm1, %v1652_v21, 0.0 }
 0x86a   : > { %1180 = vadd.xlane.f32.xlu0 %v1179_v42 }
 0x884   : > { %v1116_v22 = vpop.f32.mrf.mxu0 }
 0x885   : > { %v1122_v23 = vadd.f32 %v1116_v22, %v964_v56  ;;  %v1433_v56 = vld [vmem:[%s1995_s9] ss:$0 sm:$0xff] }
 0x886   : > { %v1570_v24 = vpop.f32.mrf.mxu0 }
 0x888   : > { %v1119_v27 = vpop.f32.mrf.mxu0 }
 0x88a   : > { %v1571_v28 = vpop.f32.mrf.mxu0 }
 0x8f3   : > { %v1181_v29 = vpop.xlane.xlu0 %1180 }
 0x8f4   : > { %1653 = vrcp.f32 %v1181_v29 }
 0x901   : > { %v1654_v30 = vpop.eup %1653 }
 0x902   : > { %v1183_v31 = vmul.f32 %v1654_v30, %v1652_v21 }
 0x904   : > { %v1184_v32 = vpack.c.bf16 %v1183_v31, %v1183_v31 }
 0x906   : > { %1581 = vmatmul.mubr.msk.bf16.vlgmr.msra.gmra.mxu0 %vm649_vm1, %v1184_v32 }
 0x9c6   : > { %v1227_v33 = vpop.f32.mrf.mxu0 }
 0x9c7   : > { %v1233_v35 = vpack.c.bf16 %v1227_v33, %v1227_v33 }
 0x9c8   : > { %v1582_v36 = vpop.f32.mrf.mxu0 }
 0x9c9   : > { %1587 = vmatmul.mubr.msk.bf16.vlgmr.msra.gmra.mxu1 %vm649_vm1, %v1233_v35 }
 0x9ca   : > { %v1230_v37 = vpop.f32.mrf.mxu0 }
 0x9cc   : > { %v1583_v38 = vpop.f32.mrf.mxu0 }
 0xa89   : > { %v1274_v39 = vpop.f32.mrf.mxu1 }
 0xa8a   : > { %v1280_v40 = vadd.f32 %v1274_v39, %v1122_v23 }
 0xa8b   : > { %v1588_v41 = vpop.f32.mrf.mxu1 }
 0xa8c   : > { %1281 = vadd.xlane.f32.xlu0 %v1280_v40  ;;  %v1284_v44 = vmul.f32 %v1280_v40, %v1280_v40 }
 0xa8d   : > { %v1277_v43 = vpop.f32.mrf.mxu1 }
 0xa8f   : > { %v1589_v45 = vpop.f32.mrf.mxu1 }
 0xa90   : > { %1285 = vadd.xlane.f32.xlu0 %v1284_v44 }
 0xb15   : > { %v1282_v46 = vpop.xlane.xlu0 %1281 }
 0xb16   : > { %v1283_v47 = vmul.f32 0.03125, %v1282_v46 }
 0xb18   : > { %v1288_v49 = vmul.f32 %v1283_v47, %v1283_v47  ;;  %v1290_v53 = vsub.f32 %v1280_v40, %v1283_v47 }
 0xb19   : > { %v1286_v48 = vpop.xlane.xlu0 %1285 }
 0xb1a   : > { %v1287_v50 = vmul.f32 0.03125, %v1286_v48 }
 0xb1c   : > { %v1289_v51 = vsub.f32 %v1287_v50, %v1288_v49 }
 0xb1e   : > { %v1291_v52 = vadd.f32 1e-06, %v1289_v51 }
 0xb20   : > { %1655 = vrsqrt.f32 %v1291_v52 }
 0xb2d   : > { %v1656_v34 = vpop.eup %1655 }
 0xb2e   : > { %v1293_v55 = vmul.f32 %v1656_v34, %v1290_v53 }
 0xb30   : > { %v1301_v57 = vmul.f32 %v1432_v54, %v1293_v55 }
 0xb32   : > { %v1309_v58 = vadd.f32 %v1433_v56, %v1301_v57 }
 0xb34   : > { %1310 = vst [vmem:[%s388_s21] sm:$0xff] %v1309_v58 }
 0xb35 PF: > { %s20_s15 = sadd.s32 1, %s1679_s15   ;;  %s1997_s13 = smov %s1675_s14 }
 0xb36   : > { %p17_p5 = scmp.ge.s32.totalorder %s20_s15, 4   ;;  %s1998_s14 = smov %s2000_s16 }
 0xb38   :  { %19 = sbr.rel (!%p17_p5) target bundleno = 2 (0x2), region = 94 }

// kernel: decoder_forward.11
= control target key start
LH: loop header
LB: loop body
LE: loop exit
PB: predicated region body
PF: predicated region fallthrough
CT: control target
= control target key end

     0   :  { %s642_s0 = inlined_call_operand.vmem [shape: f32[16,128], index: 0, kind: input, shape index: {}]   ;;  %s643_s1 = inlined_call_operand.vmem [shape: bf16[128,128], index: 1, kind: input, shape index: {}]   ;;  %s644_s2 = inlined_call_operand.vmem [shape: f32[1,128], index: 2, kind: input, shape index: {}]   ;;  %s645_s3 = inlined_call_operand.vmem [shape: bf16[128,128], index: 3, kind: input, shape index: {}]   ;;  %s646_s4 = inlined_call_operand.vmem [shape: f32[1,128], index: 4, kind: input, shape index: {}]   ;;  %s647_s5 = inlined_call_operand.vmem [shape: f32[1,128], index: 5, kind: input, shape index: {}]   ;;  %s648_s6 = inlined_call_operand.vmem [shape: f32[1,128], index: 6, kind: input, shape index: {}]   ;;  %s649_s7 = inlined_call_operand.hbm [shape: f32[16,128], index: 7, kind: output, shape index: {}]  }
   0x1   :  { %v544_v0 = vld [vmem:[%s642_s0] sm:$0xff]  ;;  %v549_v1 = vld [vmem:[%s642_s0 + $0x8] sm:$0xff] }
   0x2   :  { %34 = vadd.xlane.f32.xlu0 %v544_v0  ;;  %v40_v2 = vmul.f32 %v544_v0, %v544_v0  ;;  %v41_v3 = vmul.f32 %v549_v1, %v549_v1 }
   0x4   :  { %42 = vadd.xlane.f32.xlu1 %v40_v2 }
   0x6   :  { %36 = vadd.xlane.f32.xlu0 %v549_v1 }
   0x8   :  { %44 = vadd.xlane.f32.xlu1 %v41_v3 }
   0x9   :  { %12 = vsyncpa [#allocation5], 0  ;;  %v453_v4 = vld [vmem:[%s643_s1 + $0x38] sm:$0xff]   ;;  %v496_v5 = vmov 0.0   ;;  %v454_v6 = vld [vmem:[%s643_s1 + $0x30] sm:$0xff]   ;;  %vm497_vm0 = vmmov 0  }
   0xa   :  { %408 = vmatprep.subr.bf16.mxu0 %v496_v5  ;;  %428 = vmatprep.subr.bf16.mxu1 %v496_v5  ;;  %v455_v7 = vld [vmem:[%s643_s1 + $0x28] sm:$0xff]   ;;  %v456_v8 = vld [vmem:[%s643_s1 + $0x20] sm:$0xff]   ;;  %v457_v9 = vld [vmem:[%s643_s1 + $0x18] sm:$0xff]  }
   0xb   :  { %409 = vmatpush3.bf16.msra.mxu0 %v453_v4  ;;  %v458_v10 = vld [vmem:[%s643_s1 + $0x10] sm:$0xff]   ;;  %v459_v11 = vld [vmem:[%s643_s1 + $0x8] sm:$0xff]   ;;  %424 = vmatprep.mubr.msk.bf16.mxu0 %vm497_vm0, %v496_v5  ;;  %v460_v12 = vld [vmem:[%s643_s1] sm:$0xff]  }
   0xc   :  { %410 = vmatprep.subr.bf16.mxu0 %v496_v5  ;;  %444 = vmatprep.mubr.msk.bf16.mxu1 %vm497_vm0, %v496_v5  ;;  %v462_v13 = vld [vmem:[%s645_s3 + $0x38] sm:$0xff]   ;;  %v463_v14 = vld [vmem:[%s645_s3 + $0x30] sm:$0xff]   ;;  %v464_v15 = vld [vmem:[%s645_s3 + $0x28] sm:$0xff]  }
   0xd   :  { %429 = vmatpush3.bf16.msra.mxu1 %v462_v13  ;;  %v465_v16 = vld [vmem:[%s645_s3 + $0x20] sm:$0xff]   ;;  %v466_v17 = vld [vmem:[%s645_s3 + $0x18] sm:$0xff]   ;;  %v467_v46 = vld [vmem:[%s645_s3 + $0x10] sm:$0xff]  }
   0xe   :  { %430 = vmatprep.subr.bf16.mxu1 %v496_v5  ;;  %v360_v35 = vld [vmem:[%s647_s5] ss:$0 sm:$0xff]  ;;  %v468_v47 = vld [vmem:[%s645_s3 + $0x8] sm:$0xff]  }
   0xf   :  { %411 = vmatpush3.bf16.msra.mxu0 %v454_v6  ;;  %v361_v40 = vld [vmem:[%s648_s6] ss:$0 sm:$0xff] }
  0x10   :  { %412 = vmatprep.subr.bf16.mxu0 %v496_v5  ;;  %v469_v48 = vld [vmem:[%s645_s3] sm:$0xff]  }
  0x11   :  { %431 = vmatpush3.bf16.msra.mxu1 %v463_v14  ;;  %v364_v49 = vld [vmem:[%s644_s2] ss:$0 sm:$0xff]  ;;  %s498_s2 = smov [#allocation4]  }
  0x12   :  { %432 = vmatprep.subr.bf16.mxu1 %v496_v5  ;;  %v382_v60 = vld [vmem:[%s646_s4] ss:$0 sm:$0xff]  ;;  %s349_s3 = sshll.u32 %s498_s2, 4  ;;  %s350_s3 = int_to_ptr.vmem [resolvable:$true] %s349_s3 }
  0x13   :  { %413 = vmatpush3.bf16.msra.mxu0 %v455_v7  ;;  %s474_s17 = scalar_lea.vmem %s350_s3, 256  ;;  %p479_p1 = scmp.lt.s32.totalorder %s350_s3, %s350_s3 }
  0x14   :  { %414 = vmatprep.subr.bf16.mxu0 %v496_v5  ;;  %p475_p0 = scmp.ne.s32.totalorder %s350_s3, %s474_s17  ;;  %p480_p2 = scmp.lt.s32.totalorder %s474_s17, %s474_s17 }
  0x15   :  { %433 = vmatpush3.bf16.msra.mxu1 %v464_v15 }
  0x16   :  { %434 = vmatprep.subr.bf16.mxu1 %v496_v5  ;;  %p481_p3 = por %p480_p2, %p479_p1 }
  0x17   :  { %415 = vmatpush3.bf16.msra.mxu0 %v456_v8 }
  0x18   :  { %416 = vmatprep.subr.bf16.mxu0 %v496_v5  ;;  %p482_p4 = pnand %p481_p3, %p475_p0 }
  0x19   :  { %435 = vmatpush3.bf16.msra.mxu1 %v465_v16 }
  0x1a   :  { %436 = vmatprep.subr.bf16.mxu1 %v496_v5 }
  0x1b   :  { %417 = vmatpush3.bf16.msra.mxu0 %v457_v9 }
  0x1c   :  { %418 = vmatprep.subr.bf16.mxu0 %v496_v5 }
  0x1d   :  { %437 = vmatpush3.bf16.msra.mxu1 %v466_v17 }
  0x1e   :  { %438 = vmatprep.subr.bf16.mxu1 %v496_v5 }
  0x1f   :  { %419 = vmatpush3.bf16.msra.mxu0 %v458_v10 }
  0x20   :  { %420 = vmatprep.subr.bf16.mxu0 %v496_v5 }
  0x21   :  { %439 = vmatpush3.bf16.msra.mxu1 %v467_v46 }
  0x22   :  { %440 = vmatprep.subr.bf16.mxu1 %v496_v5 }
  0x23   :  { %421 = vmatpush3.bf16.msra.mxu0 %v459_v11 }
  0x24   :  { %422 = vmatprep.subr.bf16.mxu0 %v496_v5 }
  0x25   :  { %441 = vmatpush3.bf16.msra.mxu1 %v468_v47 }
  0x26   :  { %442 = vmatprep.subr.bf16.mxu1 %v496_v5 }
  0x27   :  { %423 = vmatpush3.bf16.msra.mxu0 %v460_v12 }
  0x29   :  { %443 = vmatpush3.bf16.msra.mxu1 %v469_v48 }
  0x8b   :  { %v35_v18 = vpop.xlane.xlu0 %34 }
  0x8c   :  { %v38_v19 = vmul.f32 0.03125, %v35_v18 }
  0x8d   :  { %v43_v20 = vpop.xlane.xlu1 %42 }
  0x8e   :  { %v48_v21 = vmul.f32 %v38_v19, %v38_v19  ;;  %v46_v22 = vmul.f32 0.03125, %v43_v20  ;;  %v52_v32 = vsub.f32 %v544_v0, %v38_v19 }
  0x8f   :  { %v37_v23 = vpop.xlane.xlu0 %36 }
  0x90   :  { %v50_v24 = vsub.f32 %v46_v22, %v48_v21  ;;  %v39_v25 = vmul.f32 0.03125, %v37_v23 }
  0x91   :  { %v45_v26 = vpop.xlane.xlu1 %44 }
  0x92   :  { %v54_v27 = vadd.f32 1e-06, %v50_v24  ;;  %v49_v28 = vmul.f32 %v39_v25, %v39_v25  ;;  %v47_v29 = vmul.f32 0.03125, %v45_v26  ;;  %v53_v36 = vsub.f32 %v549_v1, %v39_v25 }
  0x94   :  { %470 = vrsqrt.f32 %v54_v27  ;;  %v51_v30 = vsub.f32 %v47_v29, %v49_v28 }
  0x96   :  { %v55_v31 = vadd.f32 1e-06, %v51_v30 }
  0x98   :  { %472 = vrsqrt.f32 %v55_v31 }
  0xa1   :  { %v471_v33 = vpop.eup %470 }
  0xa2   :  { %v58_v34 = vmul.f32 %v471_v33, %v52_v32 }
  0xa4   :  { %v67_v38 = vmul.f32 %v360_v35, %v58_v34 }
  0xa5   :  { %v473_v37 = vpop.eup %472 }
  0xa6   :  { %v59_v39 = vmul.f32 %v473_v37, %v53_v36  ;;  %v76_v42 = vadd.f32 %v361_v40, %v67_v38 }
  0xa8   :  { %v68_v41 = vmul.f32 %v360_v35, %v59_v39 }
  0xaa   :  { %v77_v43 = vadd.f32 %v361_v40, %v68_v41 }
  0xac   :  { %v388_v44 = vpack.c.bf16 %v77_v43, %v76_v42 }
  0xae   :  { %389 = vst [vmem:[#allocation3] sm:$0xff] %v388_v44  }
  0xb5   :  { %v461_v45 = vld [vmem:[#allocation3] sm:$0xff]  }
  0xb6   :  { %425 = vmatmul.mubr.bf16.vlgmr.msra.gmra.mxu0 %v461_v45 }
 0x176   :  { %v203_v50 = vpop.f32.mrf.mxu0 }
 0x177   :  { %v204_v52 = vadd.f32 %v364_v49, %v203_v50 }
 0x178   :  { %v426_v51 = vpop.f32.mrf.mxu0 }
 0x179   :  { %v210_v56 = vmax.f32 %v204_v52, 0.0 }
 0x17a   :  { %v206_v53 = vpop.f32.mrf.mxu0 }
 0x17b   :  { %v207_v54 = vadd.f32 %v364_v49, %v206_v53 }
 0x17c   :  { %v427_v55 = vpop.f32.mrf.mxu0 }
 0x17d   :  { %v211_v57 = vmax.f32 %v207_v54, 0.0 }
 0x17f   :  { %v214_v58 = vpack.c.bf16 %v211_v57, %v210_v56 }
 0x181   :  { %445 = vmatmul.mubr.bf16.vlgmr.msra.gmra.mxu1 %v214_v58 }
 0x241   :  { %v313_v59 = vpop.f32.mrf.mxu1 }
 0x242   :  { %v331_v61 = vadd.f32 %v313_v59, %v544_v0 }
 0x243   :  { %v446_v62 = vpop.f32.mrf.mxu1 }
 0x244   :  { %v340_v63 = vadd.f32 %v382_v60, %v331_v61 }
 0x245   :  { %v316_v2 = vpop.f32.mrf.mxu1 }
 0x246   :  { %342 = vst [vmem:[#allocation4] sm:$0xff] %v340_v63  ;;  %v332_v3 = vadd.f32 %v316_v2, %v549_v1 }
 0x247   :  { %v447_v4 = vpop.f32.mrf.mxu1 }
 0x248   :  { %v341_v5 = vadd.f32 %v382_v60, %v332_v3 }
 0x24a   :  { %343 = vst [vmem:[#allocation4 + $0x8] sm:$0xff] %v341_v5 }
 0x24b   :  { %485 = shalt.err (!%p482_p4)
}
 0x24c   :  { %s499_s4 = smov 128   ;;  %s500_s18 = smov 8  }
 0x24d   :  { %355 = dma.vmem_to_hbm [thread:$0]  %s350_s3, 256, %s649_s7, [#allocation5], %s499_s4, %s499_s4, %s500_s18  }
 0x24e   :  { %494 = dma.done.wait [#allocation5], 256  }
 0x24f   :  { %495 = vsyncadd [#allocation5], 4294967040 }
 0x250   :  { %359 = vsyncpa [#allocation5], 1 }

// kernel: decoder_forward.7
= control target key start
LH: loop header
LB: loop body
LE: loop exit
PB: predicated region body
PF: predicated region fallthrough
CT: control target
= control target key end

     0   :  { %18 = vsyncpa [#allocation3], 0  ;;  %s2361_s0 = inlined_call_operand.vmem [shape: f32[2,8,128], index: 0, kind: input, shape index: {}]   ;;  %s2362_s1 = inlined_call_operand.vmem [shape: f32[2,10,128], index: 1, kind: input, shape index: {}]   ;;  %s2363_s2 = inlined_call_operand.vmem [shape: f32[2,1,10], index: 2, kind: input, shape index: {}]   ;;  %s2364_s3 = inlined_call_operand.vmem [shape: bf16[128,32], index: 3, kind: input, shape index: {}]   ;;  %s2365_s4 = inlined_call_operand.vmem [shape: f32[1,32], index: 4, kind: input, shape index: {}]   ;;  %s2366_s5 = inlined_call_operand.vmem [shape: bf16[128,64], index: 5, kind: input, shape index: {}]   ;;  %s2367_s6 = inlined_call_operand.vmem [shape: f32[1,64], index: 6, kind: input, shape index: {}]   ;;  %s2368_s7 = inlined_call_operand.vmem [shape: bf16[32,128], index: 7, kind: input, shape index: {}]   ;;  %s2369_s8 = inlined_call_operand.vmem [shape: f32[1,128], index: 8, kind: input, shape index: {}]   ;;  %s2370_s9 = inlined_call_operand.vmem [shape: f32[1,128], index: 9, kind: input, shape index: {}]   ;;  %s2371_s10 = inlined_call_operand.vmem [shape: f32[1,128], index: 10, kind: input, shape index: {}]   ;;  %s2372_s11 = inlined_call_operand.vmem [shape: f32[2,8,128], index: 11, kind: output, shape index: {0}]   ;;  %s2373_s12 = inlined_call_operand.hbm [shape: f32[2,4,8,10], index: 12, kind: output, shape index: {1}]  }
   0x1   :  { %20 = vsyncpa [#allocation3 + $0x1], 0  ;;  %s2024_s21 = smov 0   ;;  %s2026_s22 = smov 0  }
   0x2   :  { %s2028_s23 = smov 0   ;;  %s2030_s24 = smov 0  }
   0x3   :  { %s2032_s25 = smov 0   ;;  %s2034_s26 = smov 0  }
   0x4 LB: > { %2378 = sst [smem:[#allocation5_spill]] %s1933_s23  ;;  %s1561_s27 = sadd.s32 4294967295, %s1945_s26   ;;  %s1945_s26 = sphi %s2034_s26, %s26_s26   ;;  %s1941_s25 = sphi %s2032_s25, %s2389_s25   ;;  %s1937_s24 = sphi %s2030_s24, %s2388_s24   ;;  %s1933_s23 = sphi %s2028_s23, %s2387_s23   ;;  %s1929_s22 = sphi %s2026_s22, %s2391_s22   ;;  %s1925_s21 = sphi %s2024_s21, %s2390_s21  }
   0x5   : > { %2379 = sst [smem:[#allocation6_spill]] %s1941_s25  ;;  %s1562_s28 = sadd.s32 4294967294, %s1945_s26  }
   0x6   : > { %s38_s29 = sadd.s32 1, %s1941_s25  ;;  %s323_s30 = sadd.s32 1, %s1933_s23 }
   0x7   : > { %p40_p0 = scmp.ge.s32.totalorder %s38_s29, 2  ;;  %p333_p1 = scmp.ne.s32.totalorder %s1933_s23, %s1929_s22 }
   0x8   : > { %p334_p2 = scmp.eq.s32.totalorder %s1561_s27, 1  ;;  %p339_p3 = scmp.ne.s32.totalorder %s1929_s22, %s1925_s21 }
   0x9   : > { %s2393_s29 = smov (%p40_p0, %s38_s29), 0  ;;  %p340_p5 = scmp.eq.s32.totalorder %s1562_s28, 1 }
   0xa   : > { %2380 = sst [smem:[#allocation7_spill]] %s2393_s29  ;;  %p2064_p4 = por %p334_p2, %p333_p1 }
   0xb   : > { %s318_s14 = ssub.s32 %s1941_s25, %s2393_s29  ;;  %p1565_p6 = scmp.ge.s32.totalorder %s1945_s26, 1 }
   0xc   : > { %p321_p7 = scmp.eq.s32.totalorder %s318_s14, 0  ;;  %p2071_p8 = por %p340_p5, %p339_p3 }
   0xd   : > { %p406_p9 = scmp.lt.s32.totalorder %s1945_s26, 3 }
   0xe   : > { %s2382_s15 = scalar_select %p2071_p8, 1, 0 }
   0xf   : > { %s2077_s16 = scalar_select %p321_p7, %s1933_s23, %s323_s30  }
  0x10   : > { %2383 = sst [smem:[#allocation8_spill]] %s2382_s15  ;;  %p407_p10 = pnand %p1565_p6, %p406_p9 }
  0x11   : > { %2384 = sst [smem:[#allocation9_spill]] %s2077_s16  ;;  %p465_p11 = scmp.lt.s32.totalorder (!%p407_p10), %s1937_s24, 1 }
  0x12   : > { %410 = sbr.rel (%p407_p10) target bundleno = 2884 (0xb44), region = 64  ;;  %s1949_s30 = smov (!%p407_p10), 96  }
  0x13   : > { %s1950_s14 = smov (!%p407_p10), 120   ;;  %s1951_s28 = smov (!%p407_p10), 88  }
  0x17   : > { %v1835_v0 = vld [vmem:[%s2366_s5 + $0x38] sm:$0xff]   ;;  %v1947_v1 = vmov 0.0   ;;  %v1836_v2 = vld [vmem:[%s2366_s5 + $0x30] sm:$0xff]   ;;  %vm1948_vm0 = vmmov 0   ;;  %v1838_v5 = vld [vmem:[%s2366_s5 + $0x28] sm:$0xff]   ;;  %s2124_s27 = scalar_select %p465_p11, %s1937_s24, 1 }
  0x18   : > { %1677 = vmatprep.subr.bf16.mxu1 %v1947_v1  ;;  %1657 = vmatprep.subr.bf16.mxu0 %v1947_v1  ;;  %v1837_v3 = vld [vmem:[%s2364_s3 + $0x38] sm:$0xff]   ;;  %v1839_v4 = vld [vmem:[%s2364_s3 + $0x30] sm:$0xff]   ;;  %v1841_v6 = vld [vmem:[%s2364_s3 + $0x28] sm:$0xff]   ;;  %vm738_vm1 = vcmask 64512   ;;  %vm805_vm2 = vcmask 1044480   ;;  %vm785_vm3 = vcmask 80896  }
  0x19   : > { %1678 = vmatpush3.bf16.msra.mxu1 %v1835_v0  ;;  %1693 = vmatprep.mubr.msk.bf16.mxu1 %vm1948_vm0, %v1947_v1  ;;  %v1840_v7 = vld [vmem:[%s2366_s5 + $0x20] sm:$0xff]   ;;  %v1842_v9 = vld [vmem:[%s2366_s5 + $0x18] sm:$0xff]   ;;  %v1844_v11 = vld [vmem:[%s2366_s5 + $0x10] sm:$0xff]   ;;  %s1613_s18 = sshll.u32 %s2124_s27, 4  ;;  %s1567_s29 = sshll.u32 %s2124_s27, 3  ;;  %vm853_vm4 = vcmask 1043456  }
  0x1a   : > { %1679 = vmatprep.subr.bf16.mxu1 %v1947_v1  ;;  %1673 = vmatprep.mubr.msk.bf16.mxu0 %vm1948_vm0, %v1947_v1  ;;  %v1843_v8 = vld [vmem:[%s2364_s3 + $0x20] sm:$0xff]   ;;  %v1845_v10 = vld [vmem:[%s2364_s3 + $0x18] sm:$0xff]   ;;  %v1847_v12 = vld [vmem:[%s2364_s3 + $0x10] sm:$0xff]   ;;  %s476_s25 = scalar_lea.vmem %s2362_s1, %s1613_s18  ;;  %s471_s19 = scalar_lea.vmem %s2361_s0, %s1567_s29 }
  0x1b   : > { %1658 = vmatpush3.bf16.msra.mxu0 %v1837_v3  ;;  %v1846_v13 = vld [vmem:[%s2366_s5 + $0x8] sm:$0xff]   ;;  %v1848_v15 = vld [vmem:[%s2366_s5] sm:$0xff]   ;;  %s479_s20 = scalar_lea.vmem %s2363_s2, %s2124_s27  ;;  %s462_s18 = sand.u32 1, %s1929_s22  }
  0x1c   : > { %1659 = vmatprep.subr.bf16.mxu0 %v1947_v1  ;;  %v1849_v14 = vld [vmem:[%s2364_s3 + $0x8] sm:$0xff]   ;;  %v489_v16 = vld [vmem:[%s476_s25] sm:$0xff]  ;;  %s1566_s23 = sshll.u32 %s462_s18, 5 }
  0x1d   : > { %1680 = vmatpush3.bf16.msra.mxu1 %v1836_v2  ;;  %v490_v17 = vld [vmem:[%s476_s25 + $0x8] sm:$0x3]  ;;  %v1850_v18 = vld [vmem:[%s2364_s3] sm:$0xff]   ;;  %s2205_s25 = scalar_lea.vmem [#allocation2], %s1566_s23 }
  0x1e   : > { %1681 = vmatprep.subr.bf16.mxu1 %v1947_v1  ;;  %v2160_v19 = vld [vmem:[%s471_s19] sm:$0xff]  ;;  %v603_v20 = vpack.c.bf16 %v490_v17, %v489_v16  ;;  %s1953_s19 = smov 80  }
  0x1f   : > { %1660 = vmatpush3.bf16.msra.mxu0 %v1839_v4  ;;  %v491_v21 = vpack.c.bf16 %v2160_v19, %v2160_v19  ;;  %v1580_v23 = vld [vmem:[%s2367_s6] ss:$0 sm:$0xff] }
  0x20   : > { %1661 = vmatprep.subr.bf16.mxu0 %v1947_v1  ;;  %v1571_v25 = vld [vmem:[%s2365_s4] ss:$0 sm:$0xff] }
  0x21   : > { %1682 = vmatpush3.bf16.msra.mxu1 %v1838_v5  ;;  %v2196_v41 = vld [vmem:[%s479_s20] ss:$0 sm:$0xff]  ;;  %s1954_s20 = smov 104  }
  0x22   : > { %1683 = vmatprep.subr.bf16.mxu1 %v1947_v1  ;;  %v720_v60 = vld [vmem:[%s2368_s7] sm:$0xf] }
  0x23   : > { %1662 = vmatpush3.bf16.msra.mxu0 %v1841_v6  ;;  %v855_v61 = vsel %vm853_vm4, %v720_v60, 0 }
  0x24   : > { %1663 = vmatprep.subr.bf16.mxu0 %v1947_v1 }
  0x25   : > { %1684 = vmatpush3.bf16.msra.mxu1 %v1840_v7 }
  0x26   : > { %1685 = vmatprep.subr.bf16.mxu1 %v1947_v1 }
  0x27   : > { %1664 = vmatpush3.bf16.msra.mxu0 %v1843_v8 }
  0x28   : > { %1665 = vmatprep.subr.bf16.mxu0 %v1947_v1 }
  0x29   : > { %1686 = vmatpush3.bf16.msra.mxu1 %v1842_v9 }
  0x2a   : > { %1687 = vmatprep.subr.bf16.mxu1 %v1947_v1 }
  0x2b   : > { %1666 = vmatpush3.bf16.msra.mxu0 %v1845_v10 }
  0x2c   : > { %1667 = vmatprep.subr.bf16.mxu0 %v1947_v1 }
  0x2d   : > { %1688 = vmatpush3.bf16.msra.mxu1 %v1844_v11 }
  0x2e   : > { %1689 = vmatprep.subr.bf16.mxu1 %v1947_v1 }
  0x2f   : > { %1668 = vmatpush3.bf16.msra.mxu0 %v1847_v12 }
  0x30   : > { %1669 = vmatprep.subr.bf16.mxu0 %v1947_v1 }
  0x31   : > { %1690 = vmatpush3.bf16.msra.mxu1 %v1846_v13 }
  0x32   : > { %1691 = vmatprep.subr.bf16.mxu1 %v1947_v1 }
  0x33   : > { %1670 = vmatpush3.bf16.msra.mxu0 %v1849_v14 }
  0x34   : > { %1671 = vmatprep.subr.bf16.mxu0 %v1947_v1 }
  0x35   : > { %1692 = vmatpush3.bf16.msra.mxu1 %v1848_v15 }
  0x36   : > { %1703 = vmatprep.subr.bf16.mxu1 %v1947_v1 }
  0x37   : > { %1672 = vmatpush3.bf16.msra.mxu0 %v1850_v18 }
  0x38   : > { %1694 = vmatmul.mubr.bf16.vlgmr.msra.gmra.mxu1 %v603_v20  ;;  %1697 = vmatprep.subr.bf16.mxu0 %v1947_v1 }
  0x39   : > { %1705 = vmatprep.mubr.msk.bf16.mxu1 %vm1948_vm0, %v1947_v1 }
  0x3a   : > { %1674 = vmatmul.mubr.bf16.vlgmr.msra.gmra.mxu0 %v491_v21 }
  0x3b   : > { %1699 = vmatprep.mubr.msk.bf16.mxu0 %vm1948_vm0, %v1947_v1 }
  0xf8   : > { %v709_v22 = vpop.f32.mrf.mxu1 }
  0xf9   : > { %v710_v29 = vadd.f32 %v1580_v23, %v709_v22 }
  0xfa   : > { %v1695_v24 = vpop.f32.mrf.mxu1  ;;  %v597_v26 = vpop.f32.mrf.mxu0 }
  0xfb   : > { %v598_v31 = vadd.f32 %v1571_v25, %v597_v26 }
  0xfc   : > { %v712_v27 = vpop.f32.mrf.mxu1  ;;  %v1675_v28 = vpop.f32.mrf.mxu0 }
  0xfd   : > { %v713_v30 = vadd.f32 %v1580_v23, %v712_v27  ;;  %v716_v36 = vmul.f32 0.35355338, %v598_v31 }
  0xfe   : > { %v1696_v32 = vpop.f32.mrf.mxu1  ;;  %v600_v33 = vpop.f32.mrf.mxu0 }
  0xff   : > { %v2177_v34 = vpack.c.bf16 %v713_v30, %v710_v29  ;;  %v2183_v38 = vpack.c.bf16 %v716_v36, %v716_v36  ;;  %v721_v29 = vld [vmem:[%s2368_s7 + $0x4] sm:$0xf] }
 0x100   : > { %v1676_v35 = vpop.f32.mrf.mxu0  ;;  %v1016_v30 = vsel %vm853_vm4, %v721_v29, 0 }
 0x101   : > { %800 = vrot.lane.b32.xlu1 %v2177_v34, %s1949_s30  ;;  %v743_v37 = vsel %vm738_vm1, %v2177_v34, 0  ;;  %s1952_s30 = smov 112  }
 0x102   : > { %1698 = vmatpush3.bf16.xpose.msra.mxu0 %v743_v37 }
 0x103   : > { %1709 = vmatprep.subr.bf16.mxu0 %v1947_v1 }
 0x105   : > { %901 = vrot.lane.b32.xlu1 %v2177_v34, %s1950_s14 }
 0x109   : > { %1700 = vmatmul.mubr.msk.bf16.vlgmr.msra.gmra.mxu0 %vm738_vm1, %v2183_v38 }
 0x10a   : > { %1711 = vmatprep.mubr.msk.bf16.mxu0 %vm1948_vm0, %v1947_v1  ;;  %1710 = vmatpush3.bf16.msra.mxu0 %v855_v61 }
 0x10b   : > { %1721 = vmatprep.subr.bf16.mxu0 %v1947_v1 }
 0x173   : > { %v801_v39 = vpop.permute.xlu1 %800 }
 0x174   : > { %v807_v40 = vsel %vm805_vm2, %v801_v39, 0 }
 0x175   : > { %1704 = vmatpush3.bf16.msra.mxu1 %v807_v40 }
 0x176   : > { %1715 = vmatprep.subr.bf16.mxu1 %v1947_v1 }
 0x177   : > { %v902_v56 = vpop.permute.xlu1 %901 }
 0x178   : > { %v907_v58 = vsel %vm738_vm1, %v902_v56, 0 }
 0x1c9   : > { %v779_v42 = vpop.f32.mrf.mxu0 }
 0x1ca   : > { %v780_v43 = vadd.f32 %v2196_v41, %v779_v42 }
 0x1cb   : > { %v1701_v44 = vpop.f32.mrf.mxu0 }
 0x1cc   : > { %v786_v45 = vsel %vm785_vm3, %v780_v43, -inf }
 0x1cd   : > { %787 = vmax.xlane.f32.xlu0 %v786_v45  ;;  %v782_v46 = vpop.f32.mrf.mxu0 }
 0x1cf   : > { %v1702_v47 = vpop.f32.mrf.mxu0 }
 0x256   : > { %v788_v48 = vpop.xlane.xlu0 %787 }
 0x257   : > { %v789_v49 = vsub.f32 %v780_v43, %v788_v48 }
 0x259   : > { %v790_v50 = vmul.f32 1.442695, %v789_v49 }
 0x25b   : > { %1851 = vpow2.f32 %v790_v50 }
 0x268   : > { %v1852_v51 = vpop.eup %1851 }
 0x269   : > { %v792_v52 = vsel %vm785_vm3, %v1852_v51, 0.0 }
 0x26a   : > { %793 = vadd.xlane.f32.xlu0 %v792_v52  ;;  %v1589_v52 = vld [vmem:[%s2369_s8] ss:$0 sm:$0xff] }
 0x280   : > { %899 = vrot.lane.b32.xlu0 %v2183_v38, %s1950_s14 }
 0x2f3   : > { %v794_v53 = vpop.xlane.xlu0 %793 }
 0x2f4   : > { %1853 = vrcp.f32 %v794_v53 }
 0x2f7   : > { %v900_v59 = vpop.permute.xlu0 %899 }
 0x301   : > { %v1854_v54 = vpop.eup %1853 }
 0x302   : > { %v796_v55 = vmul.f32 %v1854_v54, %v1852_v51 }
 0x304   : > { %797 = vst.msk [vmem:[%s2205_s25] sm:$0xff] %vm785_vm3, %v796_v55  ;;  %v798_v57 = vpack.c.bf16 %v796_v55, %v796_v55 }
 0x306   : > { %1706 = vmatmul.mubr.msk.bf16.vlgmr.msra.gmra.mxu1 %vm785_vm3, %v798_v57 }
 0x307   : > { %1716 = vmatpush3.bf16.xpose.msra.mxu1 %v907_v58  ;;  %1717 = vmatprep.mubr.msk.bf16.mxu1 %vm1948_vm0, %v1947_v1 }
 0x308   : > { %1727 = vmatprep.subr.bf16.mxu1 %v1947_v1 }
 0x30e   : > { %1718 = vmatmul.mubr.msk.bf16.vlgmr.msra.gmra.mxu1 %vm738_vm1, %v900_v59 }
 0x30f   : > { %1729 = vmatprep.mubr.msk.bf16.mxu1 %vm1948_vm0, %v1947_v1  ;;  %1728 = vmatpush3.bf16.msra.mxu1 %v1016_v30 }
 0x310   : > { %1739 = vmatprep.subr.bf16.mxu1 %v1947_v1 }
 0x3c6   : > { %v843_v62 = vpop.f32.mrf.mxu1 }
 0x3c7   : > { %v849_v63 = vpack.c.bf16 %v843_v62, %v843_v62 }
 0x3c8   : > { %v1707_v0 = vpop.f32.mrf.mxu1 }
 0x3c9   : > { %1712 = vmatmul.mubr.msk.bf16.vlgmr.msra.gmra.mxu0 %vm738_vm1, %v849_v63 }
 0x3ca   : > { %v846_v2 = vpop.f32.mrf.mxu1  ;;  %1723 = vmatprep.mubr.msk.bf16.mxu0 %vm1948_vm0, %v1947_v1 }
 0x3cb   : > { %v722_v2 = vld [vmem:[%s2368_s7 + $0x8] sm:$0xf] }
 0x3cc   : > { %v1708_v3 = vpop.f32.mrf.mxu1 }
 0x3cd   : > { %v1176_v3 = vsel %vm853_vm4, %v722_v2, 0 }
 0x3ce   : > { %v943_v4 = vpop.f32.mrf.mxu1 }
 0x3cf   : > { %v944_v5 = vadd.f32 %v2196_v41, %v943_v4 }
 0x3d0   : > { %v1719_v6 = vpop.f32.mrf.mxu1 }
 0x3d1   : > { %v949_v7 = vsel %vm785_vm3, %v944_v5, -inf }
 0x3d2   : > { %950 = vmax.xlane.f32.xlu1 %v949_v7  ;;  %v946_v8 = vpop.f32.mrf.mxu1 }
 0x3d4   : > { %v1720_v9 = vpop.f32.mrf.mxu1 }
 0x3e3   : > { %963 = vrot.lane.b32.xlu1 %v2177_v34, %s1951_s28  ;;  %s2305_s28 = scalar_lea.sflag [#allocation3], %s462_s18 }
 0x3e7   : > { %1059 = vrot.lane.b32.xlu1 %v2183_v38, %s1952_s30 }
 0x45b   : > { %v951_v10 = vpop.xlane.xlu1 %950 }
 0x45c   : > { %v952_v11 = vsub.f32 %v944_v5, %v951_v10 }
 0x45e   : > { %v953_v12 = vmul.f32 1.442695, %v952_v11 }
 0x45f   : > { %v964_v13 = vpop.permute.xlu1 %963 }
 0x460   : > { %1855 = vpow2.f32 %v953_v12  ;;  %v969_v14 = vsel %vm805_vm2, %v964_v13, 0 }
 0x461   : > { %1722 = vmatpush3.bf16.msra.mxu0 %v969_v14 }
 0x462   : > { %1733 = vmatprep.subr.bf16.mxu0 %v1947_v1 }
 0x463   : > { %v1060_v28 = vpop.permute.xlu1 %1059 }
 0x46d   : > { %v1856_v15 = vpop.eup %1855 }
 0x46e   : > { %v955_v16 = vsel %vm785_vm3, %v1856_v15, 0.0 }
 0x46f   : > { %956 = vadd.xlane.f32.xlu0 %v955_v16 }
 0x485   : > { %1061 = vrot.lane.b32.xlu0 %v2177_v34, %s1952_s30  ;;  %s1955_s30 = smov 72  }
 0x489   : > { %v891_v17 = vpop.f32.mrf.mxu0 }
 0x48b   : > { %v1713_v18 = vpop.f32.mrf.mxu0 }
 0x48d   : > { %v894_v20 = vpop.f32.mrf.mxu0 }
 0x48f   : > { %v1714_v21 = vpop.f32.mrf.mxu0 }
 0x4f8   : > { %v957_v22 = vpop.xlane.xlu0 %956 }
 0x4f9   : > { %1857 = vrcp.f32 %v957_v22 }
 0x4fc   : > { %v1062_v25 = vpop.permute.xlu0 %1061 }
 0x4fd   : > { %v1067_v27 = vsel %vm738_vm1, %v1062_v25, 0 }
 0x506   : > { %v1858_v23 = vpop.eup %1857 }
 0x507   : > { %v959_v24 = vmul.f32 %v1858_v23, %v1856_v15 }
 0x509   : > { %1595 = vst.msk [vmem:[%s2205_s25 + $0x8] sm:$0xff] %vm785_vm3, %v959_v24  ;;  %v962_v26 = vpack.c.bf16 %v959_v24, %v959_v24 }
 0x50b   : > { %1724 = vmatmul.mubr.msk.bf16.vlgmr.msra.gmra.mxu0 %vm785_vm3, %v962_v26 }
 0x50c   : > { %1734 = vmatpush3.bf16.xpose.msra.mxu0 %v1067_v27  ;;  %1735 = vmatprep.mubr.msk.bf16.mxu0 %vm1948_vm0, %v1947_v1 }
 0x50d   : > { %1745 = vmatprep.subr.bf16.mxu0 %v1947_v1 }
 0x513   : > { %1736 = vmatmul.mubr.msk.bf16.vlgmr.msra.gmra.mxu0 %vm738_vm1, %v1060_v28 }
 0x514   : > { %1747 = vmatprep.mubr.msk.bf16.mxu0 %vm1948_vm0, %v1947_v1  ;;  %1746 = vmatpush3.bf16.msra.mxu0 %v1176_v3 }
 0x515   : > { %1757 = vmatprep.subr.bf16.mxu0 %v1947_v1 }
 0x5cb   : > { %v1005_v31 = vpop.f32.mrf.mxu0 }
 0x5cc   : > { %v1011_v32 = vpack.c.bf16 %v1005_v31, %v1005_v31 }
 0x5cd   : > { %v1725_v33 = vpop.f32.mrf.mxu0 }
 0x5ce   : > { %1730 = vmatmul.mubr.msk.bf16.vlgmr.msra.gmra.mxu1 %vm738_vm1, %v1011_v32 }
 0x5cf   : > { %v1008_v35 = vpop.f32.mrf.mxu0  ;;  %1741 = vmatprep.mubr.msk.bf16.mxu1 %vm1948_vm0, %v1947_v1 }
 0x5d1   : > { %v1726_v36 = vpop.f32.mrf.mxu0 }
 0x5d3   : > { %v1103_v37 = vpop.f32.mrf.mxu0 }
 0x5d4   : > { %v1104_v39 = vadd.f32 %v2196_v41, %v1103_v37 }
 0x5d5   : > { %v1737_v40 = vpop.f32.mrf.mxu0 }
 0x5d6   : > { %v1109_v42 = vsel %vm785_vm3, %v1104_v39, -inf }
 0x5d7   : > { %1110 = vmax.xlane.f32.xlu1 %v1109_v42  ;;  %v1106_v43 = vpop.f32.mrf.mxu0 }
 0x5d9   : > { %v1738_v44 = vpop.f32.mrf.mxu0 }
 0x5e8   : > { %1123 = vrot.lane.b32.xlu1 %v2177_v34, %s1953_s19  ;;  %s1614_s19 = sshll.u32 %s1937_s24, 9  ;;  %s1956_s24 = smov [#allocation2]  }
 0x5e9   : > { %s2299_s16 = scalar_lea.hbm %s2373_s12, %s1614_s19 }
 0x5ec   : > { %1219 = vrot.lane.b32.xlu1 %v2183_v38, %s1954_s20  ;;  %v731_v38 = vadd.f32 %v1589_v52, %v2160_v19 }
 0x5ee   : > { %v897_v53 = vadd.f32 %v891_v17, %v731_v38 }
 0x660   : > { %v1111_v45 = vpop.xlane.xlu1 %1110 }
 0x661   : > { %v1112_v46 = vsub.f32 %v1104_v39, %v1111_v45 }
 0x663   : > { %v1113_v47 = vmul.f32 1.442695, %v1112_v46 }
 0x664   : > { %v1124_v48 = vpop.permute.xlu1 %1123 }
 0x665   : > { %1859 = vpow2.f32 %v1113_v47  ;;  %v1129_v49 = vsel %vm805_vm2, %v1124_v48, 0 }
 0x666   : > { %1740 = vmatpush3.bf16.msra.mxu1 %v1129_v49 }
 0x667   : > { %1751 = vmatprep.subr.bf16.mxu1 %v1947_v1 }
 0x668   : > { %v1220_v19 = vpop.permute.xlu1 %1219 }
 0x672   : > { %v1860_v50 = vpop.eup %1859 }
 0x673   : > { %v1115_v51 = vsel %vm785_vm3, %v1860_v50, 0.0 }
 0x674   : > { %1116 = vadd.xlane.f32.xlu0 %v1115_v51 }
 0x68a   : > { %1221 = vrot.lane.b32.xlu0 %v2177_v34, %s1954_s20  ;;  %s1434_s20 = sshll.u32 %s2205_s25, 4  ;;  %s2301_s20 = int_to_ptr.vmem [resolvable:$true] %s1434_s20 }
 0x68e   : > { %v1052_v54 = vpop.f32.mrf.mxu1 }
 0x68f   : > { %v1058_v55 = vadd.f32 %v1052_v54, %v897_v53 }
 0x690   : > { %v1731_v56 = vpop.f32.mrf.mxu1 }
 0x692   : > { %v1055_v57 = vpop.f32.mrf.mxu1 }
 0x694   : > { %v1732_v58 = vpop.f32.mrf.mxu1 }
 0x6fd   : > { %v1117_v59 = vpop.xlane.xlu0 %1116 }
 0x6fe   : > { %1861 = vrcp.f32 %v1117_v59 }
 0x701   : > { %v1222_v62 = vpop.permute.xlu0 %1221 }
 0x702   : > { %v1227_v0 = vsel %vm738_vm1, %v1222_v62, 0 }
 0x70b   : > { %v1862_v60 = vpop.eup %1861 }
 0x70c   : > { %v1119_v61 = vmul.f32 %v1862_v60, %v1860_v50 }
 0x70e   : > { %1599 = vst.msk [vmem:[%s2205_s25 + $0x10] sm:$0xff] %vm785_vm3, %v1119_v61  ;;  %v1122_v63 = vpack.c.bf16 %v1119_v61, %v1119_v61 }
 0x710   : > { %1742 = vmatmul.mubr.msk.bf16.vlgmr.msra.gmra.mxu1 %vm785_vm3, %v1122_v63 }
 0x711   : > { %1752 = vmatpush3.bf16.xpose.msra.mxu1 %v1227_v0  ;;  %1753 = vmatprep.mubr.msk.bf16.mxu1 %vm1948_vm0, %v1947_v1 }
 0x712   : > { %1763 = vmatprep.subr.bf16.mxu1 %v1947_v1 }
 0x718   : > { %1754 = vmatmul.mubr.msk.bf16.vlgmr.msra.gmra.mxu1 %vm738_vm1, %v1220_v19 }
 0x719   : > { %1765 = vmatprep.mubr.msk.bf16.mxu1 %vm1948_vm0, %v1947_v1 }
 0x7d0   : > { %v1165_v4 = vpop.f32.mrf.mxu1 }
 0x7d1   : > { %v1171_v5 = vpack.c.bf16 %v1165_v4, %v1165_v4 }
 0x7d2   : > { %v1743_v6 = vpop.f32.mrf.mxu1 }
 0x7d3   : > { %1748 = vmatmul.mubr.msk.bf16.vlgmr.msra.gmra.mxu0 %vm738_vm1, %v1171_v5 }
 0x7d4   : > { %v1168_v7 = vpop.f32.mrf.mxu1  ;;  %1759 = vmatprep.mubr.msk.bf16.mxu0 %vm1948_vm0, %v1947_v1 }
 0x7d6   : > { %v1744_v8 = vpop.f32.mrf.mxu1 }
 0x7d8   : > { %v1263_v9 = vpop.f32.mrf.mxu1 }
 0x7d9   : > { %v1264_v10 = vadd.f32 %v2196_v41, %v1263_v9 }
 0x7da   : > { %v1755_v11 = vpop.f32.mrf.mxu1 }
 0x7db   : > { %v1269_v12 = vsel %vm785_vm3, %v1264_v10, -inf }
 0x7dc   : > { %1270 = vmax.xlane.f32.xlu1 %v1269_v12  ;;  %v1266_v13 = vpop.f32.mrf.mxu1 }
 0x7de   : > { %v1756_v14 = vpop.f32.mrf.mxu1 }
 0x7ed   : > { %1283 = vrot.lane.b32.xlu1 %v2177_v34, %s1955_s30  ;;  %v723_v34 = vld [vmem:[%s2368_s7 + $0xc] sm:$0xf]  ;;  %s1869_s30 = scalar_lea.vmem %s2301_s20, 512 }
 0x7ee   : > { %v1336_v24 = vsel %vm853_vm4, %v723_v34, 0  ;;  %p1870_p12 = scmp.ne.s32.totalorder %s2301_s20, %s1869_s30 }
 0x7ef   : > { %1764 = vmatpush3.bf16.msra.mxu1 %v1336_v24 }
 0x7f0   : > { %p1871_p13 = pnand %p1870_p12, %p2064_p4 }
 0x7f2   : > { %p1872_p0 = pneg %p1871_p13 }
 0x865   : > { %v1271_v15 = vpop.xlane.xlu1 %1270 }
 0x866   : > { %v1272_v16 = vsub.f32 %v1264_v10, %v1271_v15 }
 0x868   : > { %v1273_v17 = vmul.f32 1.442695, %v1272_v16 }
 0x869   : > { %v1284_v18 = vpop.permute.xlu1 %1283 }
 0x86a   : > { %1863 = vpow2.f32 %v1273_v17  ;;  %v1289_v1 = vsel %vm805_vm2, %v1284_v18, 0 }
 0x86b   : > { %1758 = vmatpush3.bf16.msra.mxu0 %v1289_v1 }
 0x877   : > { %v1864_v20 = vpop.eup %1863 }
 0x878   : > { %v1275_v41 = vsel %vm785_vm3, %v1864_v20, 0.0 }
 0x879   : > { %1276 = vadd.xlane.f32.xlu0 %v1275_v41 }
 0x893   : > { %v1212_v21 = vpop.f32.mrf.mxu0 }
 0x894   : > { %v1218_v22 = vadd.f32 %v1212_v21, %v1058_v55 }
 0x895   : > { %v1749_v23 = vpop.f32.mrf.mxu0 }
 0x897   : > { %v1215_v25 = vpop.f32.mrf.mxu0 }
 0x899   : > { %v1750_v26 = vpop.f32.mrf.mxu0 }
 0x902   : > { %v1277_v27 = vpop.xlane.xlu0 %1276 }
 0x903   : > { %1865 = vrcp.f32 %v1277_v27 }
 0x910   : > { %v1866_v28 = vpop.eup %1865 }
 0x911   : > { %v1279_v29 = vmul.f32 %v1866_v28, %v1864_v20 }
 0x913   : > { %1603 = vst.msk [vmem:[%s2205_s25 + $0x18] sm:$0xff] %vm785_vm3, %v1279_v29  ;;  %v1282_v30 = vpack.c.bf16 %v1279_v29, %v1279_v29  ;;  %s1873_s25 = sshll.u32 %s1956_s24, 4  ;;  %s1874_s25 = int_to_ptr.vmem [resolvable:$false] %s1873_s25 }
 0x914   : > { %s1875_s14 = scalar_lea.vmem %s1874_s25, 1024  ;;  %p1876_p1 = scmp.lt.s32.totalorder %s2301_s20, %s1874_s25 }
 0x915   : > { %1760 = vmatmul.mubr.msk.bf16.vlgmr.msra.gmra.mxu0 %vm785_vm3, %v1282_v30  ;;  %p1877_p2 = scmp.lt.s32.totalorder %s1875_s14, %s1869_s30 }
 0x917   : > { %p1878_p3 = por %p1877_p2, %p1876_p1 }
 0x919   : > { %p1879_p5 = pnand %p1878_p3, %p1872_p0 }
 0x9d5   : > { %v1325_v31 = vpop.f32.mrf.mxu0 }
 0x9d6   : > { %v1331_v32 = vpack.c.bf16 %v1325_v31, %v1325_v31 }
 0x9d7   : > { %v1761_v33 = vpop.f32.mrf.mxu0 }
 0x9d8   : > { %1766 = vmatmul.mubr.msk.bf16.vlgmr.msra.gmra.mxu1 %vm738_vm1, %v1331_v32 }
 0x9d9   : > { %v1328_v35 = vpop.f32.mrf.mxu0 }
 0x9db   : > { %v1762_v36 = vpop.f32.mrf.mxu0 }
 0xa98   : > { %v1372_v37 = vpop.f32.mrf.mxu1 }
 0xa99   : > { %v1378_v39 = vadd.f32 %v1372_v37, %v1218_v22 }
 0xa9a   : > { %v1767_v40 = vpop.f32.mrf.mxu1 }
 0xa9b   : > { %1379 = vadd.xlane.f32.xlu0 %v1378_v39  ;;  %v1382_v43 = vmul.f32 %v1378_v39, %v1378_v39 }
 0xa9c   : > { %v1375_v42 = vpop.f32.mrf.mxu1 }
 0xa9e   : > { %v1768_v44 = vpop.f32.mrf.mxu1 }
 0xa9f   : > { %1383 = vadd.xlane.f32.xlu0 %v1382_v43 }
 0xaa0   : > { %1882 = shalt.err (!%p1879_p5)
}
 0xaa1   : > { %s1883_s18 = scalar_lea.hbm %s2299_s16, 512  ;;  %s1887_s23 = scalar_lea.hbm %s2373_s12, 1024 }
 0xaa2   : > { %p1884_p6 = scmp.ne.s32.totalorder %s2299_s16, %s1883_s18  ;;  %p1888_p10 = scmp.lt.s32.totalorder %s2299_s16, %s2373_s12 }
 0xaa3   : > { %p1889_p11 = scmp.lt.s32.totalorder %s1887_s23, %s1883_s18 }
 0xaa4   : > { %p1885_p7 = pnand %p1884_p6, %p2064_p4 }
 0xaa5   : > { %p1890_p12 = por %p1889_p11, %p1888_p10 }
 0xaa6   : > { %p1886_p9 = pneg %p1885_p7 }
 0xaa8   : > { %p1891_p13 = pnand %p1890_p12, %p1886_p9 }
 0xaaa   : > { %1894 = shalt.err (!%p1891_p13)
}
 0xaab   : > { %s1957_s30 = smov 128   ;;  %s1958_s25 = smov 8   ;;  %v1606_v53 = vld [vmem:[%s2370_s9] ss:$0 sm:$0xff] }
 0xaac   : > { %1769 = dma.vmem_to_hbm [thread:$0]  (%p2064_p4), %s2301_s20, 512, %s2299_s16, %s2305_s28, %s1957_s30, %s1957_s30, %s1958_s25  }
 0xaad   : > { %v1607_v55 = vld [vmem:[%s2371_s10] ss:$0 sm:$0xff]  ;;  %s486_s16 = scalar_lea.vmem %s2372_s11, %s1567_s29 }
 0xb24   : > { %v1380_v45 = vpop.xlane.xlu0 %1379 }
 0xb25   : > { %v1381_v46 = vmul.f32 0.03125, %v1380_v45 }
 0xb27   : > { %v1386_v48 = vmul.f32 %v1381_v46, %v1381_v46  ;;  %v1388_v52 = vsub.f32 %v1378_v39, %v1381_v46 }
 0xb28   : > { %v1384_v47 = vpop.xlane.xlu0 %1383 }
 0xb29   : > { %v1385_v49 = vmul.f32 0.03125, %v1384_v47 }
 0xb2b   : > { %v1387_v50 = vsub.f32 %v1385_v49, %v1386_v48 }
 0xb2d   : > { %v1389_v51 = vadd.f32 1e-06, %v1387_v50 }
 0xb2f   : > { %1867 = vrsqrt.f32 %v1389_v51 }
 0xb3c   : > { %v1868_v38 = vpop.eup %1867 }
 0xb3d   : > { %v1391_v54 = vmul.f32 %v1868_v38, %v1388_v52 }
 0xb3f   : > { %v1399_v56 = vmul.f32 %v1606_v53, %v1391_v54 }
 0xb41   : > { %v1407_v57 = vadd.f32 %v1607_v55, %v1399_v56 }
 0xb43   : > { %1408 = vst [vmem:[%s486_s16] sm:$0xff] %v1407_v57 }
 0xb44 PF: > { %p1775_p4 = scmp.ge.s32.totalorder %s1945_s26, 2  ;;  %s1459_s23 = sand.u32 1, %s1925_s21  }
 0xb45   : > { %s1460_s15 = scalar_lea.sflag [#allocation3], %s1459_s23 }
 0xb46   : > { %p1772_p0 = pnand %p1775_p4, %p2071_p8 }
 0xb48   : > { %p1773_p1 = pneg %p1772_p0 }
 0xb4a   : > { %1920 = dma.done.wait (%p1773_p1), %s1460_s15, 512  }
 0xb4b   : > { %1922 = vsyncadd (%p1773_p1), %s1460_s15, 4294966784  ;;  %s26_s26 = sadd.s32 1, %s1945_s26   ;;  %s2386_s27 = sld [smem:[#allocation5_spill]] }
 0xb4c   : > { %p23_p2 = scmp.ge.s32.totalorder %s26_s26, 4   ;;  %s2387_s23 = sld [smem:[#allocation9_spill]] }
 0xb4d   : > { %s2388_s24 = sld [smem:[#allocation6_spill]]  ;;  %s2390_s21 = smov %s1929_s22 }
 0xb4e   : > { %s2389_s25 = sld [smem:[#allocation7_spill]]  ;;  %25 = sbr.rel (!%p23_p2) target bundleno = 4 (0x4), region = 120 }
 0xb51   : > { %s2391_s22 = smov %s2386_s27 }
 0xb53   :  { %1465 = vsyncpa [#allocation3], 1 }
 0xb54   :  { %1467 = vsyncpa [#allocation3 + $0x1], 1 }

</bundles_post_ra>
